<compile_context>
chip_gen: v5e
topology: v5e:2x2
jax: 0.10.0
libtpu: 0.0.40
codegen_flags: <defaults>
</compile_context>

<pallas_src>
import functools

import numpy as np
import jax
import jax.numpy as jnp
from jax.experimental import pallas as pl
from jax.experimental.pallas import tpu as pltpu


# ---------------------------------------------------------------------------
# DFT matrices (host-side, cached per (n, center)).
# ---------------------------------------------------------------------------
@functools.lru_cache(maxsize=None)
def _dft_mats(n: int, center: bool):
    k = np.arange(n, dtype=np.int64)
    km = np.mod(np.outer(k, k), n).astype(np.float64)   # reduced phase index
    ang = (-2.0 * np.pi / n) * km
    scale = 1.0 / np.sqrt(float(n))
    fr = np.cos(ang) * scale
    fi = np.sin(ang) * scale
    if center:
        # fft2c = fftshift . fft2 . ifftshift.  Folding both shifts into F:
        #   out = F[ix_(idx, idx)] with idx = fftshift(arange(n))  (F symmetric)
        idx = np.fft.fftshift(np.arange(n))
        fr = fr[np.ix_(idx, idx)]
        fi = fi[np.ix_(idx, idx)]
    return fr.astype(np.float32), fi.astype(np.float32)


# ---------------------------------------------------------------------------
# Kernel: one block of TB slices, flattened to (TB*H, W).
# ---------------------------------------------------------------------------
def _fft2_mask_kernel(xr_ref, xi_ref, m_ref, fhr_ref, fhi_ref, fwr_ref, fwi_ref,
                      yr_ref, yi_ref, *, mxu_dtype):
    rows, _ = xr_ref.shape                 # rows == tb * H
    H = fhr_ref.shape[0]
    tb = rows // H
    f32 = jnp.float32
    karatsuba = mxu_dtype is None          # Karatsuba only on the f32 path
    cast = (lambda a: a) if karatsuba else (lambda a: a.astype(mxu_dtype))

    # DFT matrices arrive already in the MXU compute dtype (f32 or bf16).
    fwr = fwr_ref[...]
    fwi = fwi_ref[...]
    fhr = fhr_ref[...]
    fhi = fhi_ref[...]

    xr = cast(xr_ref[...])                 # (tb*H, W)
    xi = cast(xi_ref[...])

    # ---- stage 1: DFT along W for all tb slices, written straight to the
    #      output refs (f32) so no large values stay live across stage 2. ----
    if karatsuba:
        fws = fwr + fwi                    # built in-kernel (not shipped)
        fhs = fhr + fhi
        p1 = jnp.dot(xr, fwr, preferred_element_type=f32)
        p2 = jnp.dot(xi, fwi, preferred_element_type=f32)
        yr_ref[...] = p1 - p2
        p3 = jnp.dot(xr + xi, fws, preferred_element_type=f32)
        yi_ref[...] = p3 - p1 - p2
    else:
        # 4-mult complex form: avoids Karatsuba's catastrophic cancellation
        # when the MXU operands are bf16.
        yr_ref[...] = (jnp.dot(xr, fwr, preferred_element_type=f32)
                       - jnp.dot(xi, fwi, preferred_element_type=f32))
        yi_ref[...] = (jnp.dot(xr, fwi, preferred_element_type=f32)
                       + jnp.dot(xi, fwr, preferred_element_type=f32))

    shared_mask = m_ref.shape[0] == H      # one (H, W) mask for all slices
    m_all = m_ref[...] if shared_mask else None

    # ---- stage 2: DFT along H, slice by slice (read/overwrite output refs) --
    for b in range(tb):
        rs = pl.ds(b * H, H)               # static, sublane-aligned (H % 8 == 0)
        tr_b = cast(yr_ref[rs, :])
        ti_b = cast(yi_ref[rs, :])
        if karatsuba:
            q1 = jnp.dot(fhr, tr_b, preferred_element_type=f32)
            q2 = jnp.dot(fhi, ti_b, preferred_element_type=f32)
            q3 = jnp.dot(fhs, tr_b + ti_b, preferred_element_type=f32)
            out_r = q1 - q2
            out_i = q3 - q1 - q2
        else:
            out_r = (jnp.dot(fhr, tr_b, preferred_element_type=f32)
                     - jnp.dot(fhi, ti_b, preferred_element_type=f32))
            out_i = (jnp.dot(fhr, ti_b, preferred_element_type=f32)
                     + jnp.dot(fhi, tr_b, preferred_element_type=f32))
        m_b = m_all if shared_mask else m_ref[rs, :]
        yr_ref[rs, :] = out_r * m_b
        yi_ref[rs, :] = out_i * m_b


# ---------------------------------------------------------------------------
# Hardware-aware helpers.
# ---------------------------------------------------------------------------
def _vmem_capacity_bytes():
    try:
        info = pltpu.get_tpu_info()
        cap = int(getattr(info, "vmem_capacity_bytes", 0))
        if cap > 0:
            return cap
    except Exception:
        pass
    return 128 << 20                       # v5e / v6e class default


def _num_tensorcores(vmem_capacity):
    try:
        info = pltpu.get_tpu_info()
        for attr in ("num_cores", "tensorcore_count", "num_tensorcores",
                     "cores_per_chip"):
            v = getattr(info, attr, None)
            if v:
                return int(v)
    except Exception:
        pass
    # Heuristic: v7x exposes ~64 MiB VMEM per TensorCore and has 2 TCs/chip;
    # v5e / v6e expose 128 MiB and a single TensorCore.
    return 2 if vmem_capacity <= (64 << 20) else 1


def _pick_tb(nbc, tb_req, per_tb_bytes, plane_budget, n_cores):
    cap = max(1, plane_budget // max(1, per_tb_bytes))
    tb = int(max(1, min(tb_req, cap, nbc)))
    while nbc % tb:
        tb -= 1
    if n_cores > 1 and nbc >= n_cores:
        # Megacore (v7x): prefer a step count that is a multiple of the number
        # of TensorCores so the "parallel" split stays balanced.
        t = tb
        while t > 1 and (nbc // t) % n_cores != 0:
            t -= 1
            while t > 1 and nbc % t:
                t -= 1
        if t >= 1 and nbc % t == 0 and (nbc // t) % n_cores == 0:
            tb = t
    # On 1-TC chips (v5e/v6e) we never shrink tb just to create more steps.
    return tb


def _spec(shape, index_map, single_buffered=False):
    """BlockSpec; constants get a single pipeline buffer when supported."""
    if single_buffered:
        try:
            return pl.BlockSpec(shape, index_map, pipeline_mode=pl.Buffered(1))
        except Exception:                  # older JAX without pipeline_mode
            pass
    return pl.BlockSpec(shape, index_map)


# ---------------------------------------------------------------------------
# Wrappers.
# ---------------------------------------------------------------------------
def forward_op_planar(image_real, image_imag, mask, *, center=False, tb=16,
                      mxu_dtype=jnp.bfloat16, single_buffer_constants=True):
    """Masked ortho 2-D FFT with planar f32 (real, imag) input and output."""
    xr4 = jnp.asarray(image_real, jnp.float32)
    xi4 = jnp.asarray(image_imag, jnp.float32)
    if xr4.ndim != 4 or xr4.shape != xi4.shape:
        raise ValueError("image planes must both be (B, C, H, W)")
    B, C, H, W = xr4.shape
    nbc = B * C
    if H % 8 != 0:
        # TODO(synk): pad H to a multiple of 8 instead of raising.
        raise ValueError("H must be a multiple of 8 for the (tb*H, W) tiling")

    xr = xr4.reshape(nbc * H, W)
    xi = xi4.reshape(nbc * H, W)

    # Mask: keep a single (H, W) plane resident unless it truly varies over
    # batch/channel (never materialize the (B, C, H, W) broadcast otherwise).
    mask = jnp.asarray(mask, jnp.float32)
    varies = mask.ndim > 2 and any(int(d) != 1 for d in mask.shape[:-2])

    # ---- generation-aware VMEM budgeting --------------------------------
    capacity = _vmem_capacity_bytes()
    n_cores = _num_tensorcores(capacity)
    msize = 4 if mxu_dtype is None else np.dtype(mxu_dtype).itemsize
    const_bytes = 2 * (H * H + W * W) * msize          # fhr,fhi,fwr,fwi (1 buf)
    if mxu_dtype is None:
        const_bytes += (H * H + W * W) * 4             # in-kernel Fr+Fi mats
    shared_mask_bytes = 0 if varies else H * W * 4
    stage1_tmp = (16 if mxu_dtype is None else 8) * H * W
    per_tb = (32 * H * W                               # x/y planes, 2x-buffered f32
              + 2 * H * W * msize                      # casted xr/xi
              + stage1_tmp                             # stage-1 matmul temps
              + (8 * H * W if varies else 0))          # per-slice mask, 2x-buffered
    target = int(capacity * 0.70)
    plane_budget = max(per_tb, target - const_bytes - shared_mask_bytes)
    tb = _pick_tb(nbc, tb, per_tb, plane_budget, n_cores)
    grid = (nbc // tb,)

    est = const_bytes + shared_mask_bytes + per_tb * tb
    floor = min(32 << 20, int(capacity * 0.9))
    vmem_limit = int(min(max(floor, est * 13 // 10 + (4 << 20)),
                         int(capacity * 0.9)))

    # ---- operands ---------------------------------------------------------
    mat_dtype = jnp.float32 if mxu_dtype is None else mxu_dtype
    fhr_np, fhi_np = _dft_mats(int(H), bool(center))
    fwr_np, fwi_np = _dft_mats(int(W), bool(center))
    fhr = jnp.asarray(fhr_np, mat_dtype)
    fhi = jnp.asarray(fhi_np, mat_dtype)
    fwr = jnp.asarray(fwr_np, mat_dtype)
    fwi = jnp.asarray(fwi_np, mat_dtype)

    if varies:
        m_arr = jnp.broadcast_to(mask, (B, C, H, W)).reshape(nbc * H, W)
        m_spec = pl.BlockSpec((tb * H, W), lambda i: (i, 0))
    else:
        m2d = mask.reshape(mask.shape[-2:]) if mask.ndim > 2 else mask
        m_arr = jnp.broadcast_to(m2d, (H, W))
        m_spec = _spec((H, W), lambda i: (0, 0), single_buffer_constants)

    x_spec = pl.BlockSpec((tb * H, W), lambda i: (i, 0))
    fh_spec = _spec((H, H), lambda i: (0, 0), single_buffer_constants)
    fw_spec = _spec((W, W), lambda i: (0, 0), single_buffer_constants)

    kernel = functools.partial(_fft2_mask_kernel, mxu_dtype=mxu_dtype)

    yr, yi = pl.pallas_call(
        kernel,
        out_shape=(jax.ShapeDtypeStruct((nbc * H, W), jnp.float32),
                   jax.ShapeDtypeStruct((nbc * H, W), jnp.float32)),
        grid_spec=pltpu.PrefetchScalarGridSpec(
            num_scalar_prefetch=0,
            grid=grid,
            in_specs=[x_spec, x_spec, m_spec, fh_spec, fh_spec, fw_spec, fw_spec],
            out_specs=[x_spec, x_spec],
        ),
        compiler_params=pltpu.CompilerParams(
            dimension_semantics=("parallel",),
            vmem_limit_bytes=vmem_limit),
    )(xr, xi, m_arr, fhr, fhi, fwr, fwi)

    return yr.reshape(B, C, H, W), yi.reshape(B, C, H, W)


def forward_op(image, mask, *, center=False, tb=16, mxu_dtype=jnp.bfloat16,
               single_buffer_constants=True):
    """Pallas equivalent of ForwardOp(center).forward(image, mask) -> complex64."""
    image = jnp.asarray(image)
    xr = jnp.real(image).astype(jnp.float32)
    xi = (jnp.imag(image).astype(jnp.float32) if jnp.iscomplexobj(image)
          else jnp.zeros_like(xr))
    yr, yi = forward_op_planar(xr, xi, mask, center=center, tb=tb,
                               mxu_dtype=mxu_dtype,
                               single_buffer_constants=single_buffer_constants)
    # NOTE: perf-critical callers should use forward_op_planar end-to-end and
    # skip the complex <-> planar interleave HBM passes.
    return jax.lax.complex(yr, yi)


class ForwardOp:
    """Mirror of the PyTorch module."""

    def __init__(self, center=False):
        self.center = center

    def __call__(self, image, mask):
        return forward_op(image, mask, center=self.center)


if __name__ == "__main__":
    key = jax.random.PRNGKey(0)
    k_re, k_im, k_mask = jax.random.split(key, 3)

    B, C, H, W = 2, 4, 16, 16
    image = (jax.random.normal(k_re, (B, C, H, W), dtype=jnp.float32)
             + 1j * jax.random.normal(k_im, (B, C, H, W), dtype=jnp.float32)
             ).astype(jnp.complex64)
    mask = jax.random.bernoulli(k_mask, 0.5, (1, 1, H, W)).astype(jnp.float32)

    fwd = jax.jit(forward_op, static_argnames=("center", "tb", "mxu_dtype",
                                               "single_buffer_constants"))

    # Probe whether single-buffered constant operands lower on this JAX/libtpu;
    # fall back to default double-buffering otherwise.
    kw = {"single_buffer_constants": True}
    try:
        out = jax.block_until_ready(fwd(image, mask, **kw))
    except Exception:
        kw = {"single_buffer_constants": False}
        out = jax.block_until_ready(fwd(image, mask, **kw))

    ref = jnp.fft.fft2(image, axes=(-2, -1), norm="ortho") * mask
    assert out.shape == (B, C, H, W) and out.dtype == jnp.complex64
    # Default path runs the MXU in bf16 (4-mult complex form): ~0.3-0.5% rel err.
    rel = jnp.linalg.norm(out - ref) / jnp.linalg.norm(ref)
    assert float(rel) < 2e-2, float(rel)

    # f32 MXU path (Karatsuba), tight tolerance.
    out32 = jax.block_until_ready(fwd(image, mask, mxu_dtype=None, **kw))
    assert jnp.allclose(out32, ref, atol=1e-4, rtol=1e-4)

    # center=True (fft2c): shifts folded into the DFT matrices.
    ref_c = jnp.fft.fftshift(
        jnp.fft.fft2(jnp.fft.ifftshift(image, axes=(-2, -1)),
                     axes=(-2, -1), norm="ortho"),
        axes=(-2, -1)) * mask
    out_c32 = jax.block_until_ready(fwd(image, mask, center=True,
                                        mxu_dtype=None, **kw))
    assert jnp.allclose(out_c32, ref_c, atol=1e-4, rtol=1e-4)

    out_cb = jax.block_until_ready(fwd(image, mask, center=True, **kw))
    rel_c = jnp.linalg.norm(out_cb - ref_c) / jnp.linalg.norm(ref_c)
    assert float(rel_c) < 2e-2, float(rel_c)

    print("KERNEL_OK")
</pallas_src>

<mosaic_0001>
module attributes {stable_mosaic.version = 11 : i64} {
  func.func @_fft2_mask_kernel(%arg0: i32, %arg1: memref<128x16xf32, #tpu.memory_space<vmem>>, %arg2: memref<128x16xf32, #tpu.memory_space<vmem>>, %arg3: memref<16x16xf32, #tpu.memory_space<vmem>>, %arg4: memref<16x16xbf16, #tpu.memory_space<vmem>>, %arg5: memref<16x16xbf16, #tpu.memory_space<vmem>>, %arg6: memref<16x16xbf16, #tpu.memory_space<vmem>>, %arg7: memref<16x16xbf16, #tpu.memory_space<vmem>>, %arg8: memref<128x16xf32, #tpu.memory_space<vmem>>, %arg9: memref<128x16xf32, #tpu.memory_space<vmem>>) attributes {dimension_semantics = [#tpu.dimension_semantics<parallel>], iteration_bounds = array<i64: 1>, scalar_prefetch = 0 : i64, scratch_operands = 0 : i64, tpu.core_type = #tpu.core_type<tc>, window_params = [{transform_indices = @transform_0, window_bounds = array<i64: 128, 16>}, {transform_indices = @transform_1, window_bounds = array<i64: 128, 16>}, {pipeline_mode = #tpu.pipeline_mode<synchronous>, transform_indices = @transform_2, window_bounds = array<i64: 16, 16>}, {pipeline_mode = #tpu.pipeline_mode<synchronous>, transform_indices = @transform_3, window_bounds = array<i64: 16, 16>}, {pipeline_mode = #tpu.pipeline_mode<synchronous>, transform_indices = @transform_4, window_bounds = array<i64: 16, 16>}, {pipeline_mode = #tpu.pipeline_mode<synchronous>, transform_indices = @transform_5, window_bounds = array<i64: 16, 16>}, {pipeline_mode = #tpu.pipeline_mode<synchronous>, transform_indices = @transform_6, window_bounds = array<i64: 16, 16>}, {transform_indices = @transform_7, window_bounds = array<i64: 128, 16>}, {transform_indices = @transform_8, window_bounds = array<i64: 128, 16>}]} {
    %c0 = arith.constant 0 : index
    %c0_0 = arith.constant 0 : index
    %0 = vector.load %arg6[%c0, %c0_0] : memref<16x16xbf16, #tpu.memory_space<vmem>>, vector<16x16xbf16>
    %c0_1 = arith.constant 0 : index
    %c0_2 = arith.constant 0 : index
    %1 = vector.load %arg7[%c0_1, %c0_2] : memref<16x16xbf16, #tpu.memory_space<vmem>>, vector<16x16xbf16>
    %c0_3 = arith.constant 0 : index
    %c0_4 = arith.constant 0 : index
    %2 = vector.load %arg4[%c0_3, %c0_4] : memref<16x16xbf16, #tpu.memory_space<vmem>>, vector<16x16xbf16>
    %c0_5 = arith.constant 0 : index
    %c0_6 = arith.constant 0 : index
    %3 = vector.load %arg5[%c0_5, %c0_6] : memref<16x16xbf16, #tpu.memory_space<vmem>>, vector<16x16xbf16>
    %c0_7 = arith.constant 0 : index
    %c0_8 = arith.constant 0 : index
    %4 = vector.load %arg1[%c0_7, %c0_8] : memref<128x16xf32, #tpu.memory_space<vmem>>, vector<128x16xf32>
    %5 = arith.truncf %4 : vector<128x16xf32> to vector<128x16xbf16>
    %c0_9 = arith.constant 0 : index
    %c0_10 = arith.constant 0 : index
    %6 = vector.load %arg2[%c0_9, %c0_10] : memref<128x16xf32, #tpu.memory_space<vmem>>, vector<128x16xf32>
    %7 = arith.truncf %6 : vector<128x16xf32> to vector<128x16xbf16>
    %cst = arith.constant dense<0.000000e+00> : vector<128x16xf32>
    %8 = tpu.matmul %5, %0, %cst {dimension_numbers = #tpu.dot_dimension_numbers<[1], [0], [0], [1], [0, 0, 1, 1], [], []>} : vector<128x16xbf16>, vector<16x16xbf16>, vector<128x16xf32> -> vector<128x16xf32>
    %cst_11 = arith.constant dense<0.000000e+00> : vector<128x16xf32>
    %9 = tpu.matmul %7, %1, %cst_11 {dimension_numbers = #tpu.dot_dimension_numbers<[1], [0], [0], [1], [0, 0, 1, 1], [], []>} : vector<128x16xbf16>, vector<16x16xbf16>, vector<128x16xf32> -> vector<128x16xf32>
    %10 = arith.subf %8, %9 : vector<128x16xf32>
    %c0_12 = arith.constant 0 : index
    %c0_13 = arith.constant 0 : index
    %11 = vector.load %arg8[%c0_12, %c0_13] : memref<128x16xf32, #tpu.memory_space<vmem>>, vector<128x16xf32>
    tpu.vector_store %arg8[%c0_12, %c0_13], %10 {strides = array<i32>} : memref<128x16xf32, #tpu.memory_space<vmem>>, vector<128x16xf32>,
    %cst_14 = arith.constant dense<0.000000e+00> : vector<128x16xf32>
    %12 = tpu.matmul %5, %1, %cst_14 {dimension_numbers = #tpu.dot_dimension_numbers<[1], [0], [0], [1], [0, 0, 1, 1], [], []>} : vector<128x16xbf16>, vector<16x16xbf16>, vector<128x16xf32> -> vector<128x16xf32>
    %cst_15 = arith.constant dense<0.000000e+00> : vector<128x16xf32>
    %13 = tpu.matmul %7, %0, %cst_15 {dimension_numbers = #tpu.dot_dimension_numbers<[1], [0], [0], [1], [0, 0, 1, 1], [], []>} : vector<128x16xbf16>, vector<16x16xbf16>, vector<128x16xf32> -> vector<128x16xf32>
    %14 = arith.addf %12, %13 : vector<128x16xf32>
    %c0_16 = arith.constant 0 : index
    %c0_17 = arith.constant 0 : index
    %15 = vector.load %arg9[%c0_16, %c0_17] : memref<128x16xf32, #tpu.memory_space<vmem>>, vector<128x16xf32>
    tpu.vector_store %arg9[%c0_16, %c0_17], %14 {strides = array<i32>} : memref<128x16xf32, #tpu.memory_space<vmem>>, vector<128x16xf32>,
    %c0_18 = arith.constant 0 : index
    %c0_19 = arith.constant 0 : index
    %16 = vector.load %arg3[%c0_18, %c0_19] : memref<16x16xf32, #tpu.memory_space<vmem>>, vector<16x16xf32>
    %c0_20 = arith.constant 0 : index
    %c0_21 = arith.constant 0 : index
    %17 = vector.load %arg8[%c0_20, %c0_21] : memref<128x16xf32, #tpu.memory_space<vmem>>, vector<16x16xf32>
    %18 = arith.truncf %17 : vector<16x16xf32> to vector<16x16xbf16>
    %c0_22 = arith.constant 0 : index
    %c0_23 = arith.constant 0 : index
    %19 = vector.load %arg9[%c0_22, %c0_23] : memref<128x16xf32, #tpu.memory_space<vmem>>, vector<16x16xf32>
    %20 = arith.truncf %19 : vector<16x16xf32> to vector<16x16xbf16>
    %cst_24 = arith.constant dense<0.000000e+00> : vector<16x16xf32>
    %21 = tpu.matmul %2, %18, %cst_24 {dimension_numbers = #tpu.dot_dimension_numbers<[1], [0], [0], [1], [0, 0, 1, 1], [], []>} : vector<16x16xbf16>, vector<16x16xbf16>, vector<16x16xf32> -> vector<16x16xf32>
    %cst_25 = arith.constant dense<0.000000e+00> : vector<16x16xf32>
    %22 = tpu.matmul %3, %20, %cst_25 {dimension_numbers = #tpu.dot_dimension_numbers<[1], [0], [0], [1], [0, 0, 1, 1], [], []>} : vector<16x16xbf16>, vector<16x16xbf16>, vector<16x16xf32> -> vector<16x16xf32>
    %23 = arith.subf %21, %22 : vector<16x16xf32>
    %cst_26 = arith.constant dense<0.000000e+00> : vector<16x16xf32>
    %24 = tpu.matmul %2, %20, %cst_26 {dimension_numbers = #tpu.dot_dimension_numbers<[1], [0], [0], [1], [0, 0, 1, 1], [], []>} : vector<16x16xbf16>, vector<16x16xbf16>, vector<16x16xf32> -> vector<16x16xf32>
    %cst_27 = arith.constant dense<0.000000e+00> : vector<16x16xf32>
    %25 = tpu.matmul %3, %18, %cst_27 {dimension_numbers = #tpu.dot_dimension_numbers<[1], [0], [0], [1], [0, 0, 1, 1], [], []>} : vector<16x16xbf16>, vector<16x16xbf16>, vector<16x16xf32> -> vector<16x16xf32>
    %26 = arith.addf %24, %25 : vector<16x16xf32>
    %27 = arith.mulf %23, %16 : vector<16x16xf32>
    %c0_28 = arith.constant 0 : index
    %c0_29 = arith.constant 0 : index
    %28 = vector.load %arg8[%c0_28, %c0_29] : memref<128x16xf32, #tpu.memory_space<vmem>>, vector<16x16xf32>
    tpu.vector_store %arg8[%c0_28, %c0_29], %27 {strides = array<i32>} : memref<128x16xf32, #tpu.memory_space<vmem>>, vector<16x16xf32>,
    %29 = arith.mulf %26, %16 : vector<16x16xf32>
    %c0_30 = arith.constant 0 : index
    %c0_31 = arith.constant 0 : index
    %30 = vector.load %arg9[%c0_30, %c0_31] : memref<128x16xf32, #tpu.memory_space<vmem>>, vector<16x16xf32>
    tpu.vector_store %arg9[%c0_30, %c0_31], %29 {strides = array<i32>} : memref<128x16xf32, #tpu.memory_space<vmem>>, vector<16x16xf32>,
    %c16 = arith.constant 16 : index
    %c0_32 = arith.constant 0 : index
    %31 = vector.load %arg8[%c16, %c0_32] : memref<128x16xf32, #tpu.memory_space<vmem>>, vector<16x16xf32>
    %32 = arith.truncf %31 : vector<16x16xf32> to vector<16x16xbf16>
    %c16_33 = arith.constant 16 : index
    %c0_34 = arith.constant 0 : index
    %33 = vector.load %arg9[%c16_33, %c0_34] : memref<128x16xf32, #tpu.memory_space<vmem>>, vector<16x16xf32>
    %34 = arith.truncf %33 : vector<16x16xf32> to vector<16x16xbf16>
    %cst_35 = arith.constant dense<0.000000e+00> : vector<16x16xf32>
    %35 = tpu.matmul %2, %32, %cst_35 {dimension_numbers = #tpu.dot_dimension_numbers<[1], [0], [0], [1], [0, 0, 1, 1], [], []>} : vector<16x16xbf16>, vector<16x16xbf16>, vector<16x16xf32> -> vector<16x16xf32>
    %cst_36 = arith.constant dense<0.000000e+00> : vector<16x16xf32>
    %36 = tpu.matmul %3, %34, %cst_36 {dimension_numbers = #tpu.dot_dimension_numbers<[1], [0], [0], [1], [0, 0, 1, 1], [], []>} : vector<16x16xbf16>, vector<16x16xbf16>, vector<16x16xf32> -> vector<16x16xf32>
    %37 = arith.subf %35, %36 : vector<16x16xf32>
    %cst_37 = arith.constant dense<0.000000e+00> : vector<16x16xf32>
    %38 = tpu.matmul %2, %34, %cst_37 {dimension_numbers = #tpu.dot_dimension_numbers<[1], [0], [0], [1], [0, 0, 1, 1], [], []>} : vector<16x16xbf16>, vector<16x16xbf16>, vector<16x16xf32> -> vector<16x16xf32>
    %cst_38 = arith.constant dense<0.000000e+00> : vector<16x16xf32>
    %39 = tpu.matmul %3, %32, %cst_38 {dimension_numbers = #tpu.dot_dimension_numbers<[1], [0], [0], [1], [0, 0, 1, 1], [], []>} : vector<16x16xbf16>, vector<16x16xbf16>, vector<16x16xf32> -> vector<16x16xf32>
    %40 = arith.addf %38, %39 : vector<16x16xf32>
    %41 = arith.mulf %37, %16 : vector<16x16xf32>
    %c16_39 = arith.constant 16 : index
    %c0_40 = arith.constant 0 : index
    %42 = vector.load %arg8[%c16_39, %c0_40] : memref<128x16xf32, #tpu.memory_space<vmem>>, vector<16x16xf32>
    tpu.vector_store %arg8[%c16_39, %c0_40], %41 {strides = array<i32>} : memref<128x16xf32, #tpu.memory_space<vmem>>, vector<16x16xf32>,
    %43 = arith.mulf %40, %16 : vector<16x16xf32>
    %c16_41 = arith.constant 16 : index
    %c0_42 = arith.constant 0 : index
    %44 = vector.load %arg9[%c16_41, %c0_42] : memref<128x16xf32, #tpu.memory_space<vmem>>, vector<16x16xf32>
    tpu.vector_store %arg9[%c16_41, %c0_42], %43 {strides = array<i32>} : memref<128x16xf32, #tpu.memory_space<vmem>>, vector<16x16xf32>,
    %c32 = arith.constant 32 : index
    %c0_43 = arith.constant 0 : index
    %45 = vector.load %arg8[%c32, %c0_43] : memref<128x16xf32, #tpu.memory_space<vmem>>, vector<16x16xf32>
    %46 = arith.truncf %45 : vector<16x16xf32> to vector<16x16xbf16>
    %c32_44 = arith.constant 32 : index
    %c0_45 = arith.constant 0 : index
    %47 = vector.load %arg9[%c32_44, %c0_45] : memref<128x16xf32, #tpu.memory_space<vmem>>, vector<16x16xf32>
    %48 = arith.truncf %47 : vector<16x16xf32> to vector<16x16xbf16>
    %cst_46 = arith.constant dense<0.000000e+00> : vector<16x16xf32>
    %49 = tpu.matmul %2, %46, %cst_46 {dimension_numbers = #tpu.dot_dimension_numbers<[1], [0], [0], [1], [0, 0, 1, 1], [], []>} : vector<16x16xbf16>, vector<16x16xbf16>, vector<16x16xf32> -> vector<16x16xf32>
    %cst_47 = arith.constant dense<0.000000e+00> : vector<16x16xf32>
    %50 = tpu.matmul %3, %48, %cst_47 {dimension_numbers = #tpu.dot_dimension_numbers<[1], [0], [0], [1], [0, 0, 1, 1], [], []>} : vector<16x16xbf16>, vector<16x16xbf16>, vector<16x16xf32> -> vector<16x16xf32>
    %51 = arith.subf %49, %50 : vector<16x16xf32>
    %cst_48 = arith.constant dense<0.000000e+00> : vector<16x16xf32>
    %52 = tpu.matmul %2, %48, %cst_48 {dimension_numbers = #tpu.dot_dimension_numbers<[1], [0], [0], [1], [0, 0, 1, 1], [], []>} : vector<16x16xbf16>, vector<16x16xbf16>, vector<16x16xf32> -> vector<16x16xf32>
    %cst_49 = arith.constant dense<0.000000e+00> : vector<16x16xf32>
    %53 = tpu.matmul %3, %46, %cst_49 {dimension_numbers = #tpu.dot_dimension_numbers<[1], [0], [0], [1], [0, 0, 1, 1], [], []>} : vector<16x16xbf16>, vector<16x16xbf16>, vector<16x16xf32> -> vector<16x16xf32>
    %54 = arith.addf %52, %53 : vector<16x16xf32>
    %55 = arith.mulf %51, %16 : vector<16x16xf32>
    %c32_50 = arith.constant 32 : index
    %c0_51 = arith.constant 0 : index
    %56 = vector.load %arg8[%c32_50, %c0_51] : memref<128x16xf32, #tpu.memory_space<vmem>>, vector<16x16xf32>
    tpu.vector_store %arg8[%c32_50, %c0_51], %55 {strides = array<i32>} : memref<128x16xf32, #tpu.memory_space<vmem>>, vector<16x16xf32>,
    %57 = arith.mulf %54, %16 : vector<16x16xf32>
    %c32_52 = arith.constant 32 : index
    %c0_53 = arith.constant 0 : index
    %58 = vector.load %arg9[%c32_52, %c0_53] : memref<128x16xf32, #tpu.memory_space<vmem>>, vector<16x16xf32>
    tpu.vector_store %arg9[%c32_52, %c0_53], %57 {strides = array<i32>} : memref<128x16xf32, #tpu.memory_space<vmem>>, vector<16x16xf32>,
    %c48 = arith.constant 48 : index
    %c0_54 = arith.constant 0 : index
    %59 = vector.load %arg8[%c48, %c0_54] : memref<128x16xf32, #tpu.memory_space<vmem>>, vector<16x16xf32>
    %60 = arith.truncf %59 : vector<16x16xf32> to vector<16x16xbf16>
    %c48_55 = arith.constant 48 : index
    %c0_56 = arith.constant 0 : index
    %61 = vector.load %arg9[%c48_55, %c0_56] : memref<128x16xf32, #tpu.memory_space<vmem>>, vector<16x16xf32>
    %62 = arith.truncf %61 : vector<16x16xf32> to vector<16x16xbf16>
    %cst_57 = arith.constant dense<0.000000e+00> : vector<16x16xf32>
    %63 = tpu.matmul %2, %60, %cst_57 {dimension_numbers = #tpu.dot_dimension_numbers<[1], [0], [0], [1], [0, 0, 1, 1], [], []>} : vector<16x16xbf16>, vector<16x16xbf16>, vector<16x16xf32> -> vector<16x16xf32>
    %cst_58 = arith.constant dense<0.000000e+00> : vector<16x16xf32>
    %64 = tpu.matmul %3, %62, %cst_58 {dimension_numbers = #tpu.dot_dimension_numbers<[1], [0], [0], [1], [0, 0, 1, 1], [], []>} : vector<16x16xbf16>, vector<16x16xbf16>, vector<16x16xf32> -> vector<16x16xf32>
    %65 = arith.subf %63, %64 : vector<16x16xf32>
    %cst_59 = arith.constant dense<0.000000e+00> : vector<16x16xf32>
    %66 = tpu.matmul %2, %62, %cst_59 {dimension_numbers = #tpu.dot_dimension_numbers<[1], [0], [0], [1], [0, 0, 1, 1], [], []>} : vector<16x16xbf16>, vector<16x16xbf16>, vector<16x16xf32> -> vector<16x16xf32>
    %cst_60 = arith.constant dense<0.000000e+00> : vector<16x16xf32>
    %67 = tpu.matmul %3, %60, %cst_60 {dimension_numbers = #tpu.dot_dimension_numbers<[1], [0], [0], [1], [0, 0, 1, 1], [], []>} : vector<16x16xbf16>, vector<16x16xbf16>, vector<16x16xf32> -> vector<16x16xf32>
    %68 = arith.addf %66, %67 : vector<16x16xf32>
    %69 = arith.mulf %65, %16 : vector<16x16xf32>
    %c48_61 = arith.constant 48 : index
    %c0_62 = arith.constant 0 : index
    %70 = vector.load %arg8[%c48_61, %c0_62] : memref<128x16xf32, #tpu.memory_space<vmem>>, vector<16x16xf32>
    tpu.vector_store %arg8[%c48_61, %c0_62], %69 {strides = array<i32>} : memref<128x16xf32, #tpu.memory_space<vmem>>, vector<16x16xf32>,
    %71 = arith.mulf %68, %16 : vector<16x16xf32>
    %c48_63 = arith.constant 48 : index
    %c0_64 = arith.constant 0 : index
    %72 = vector.load %arg9[%c48_63, %c0_64] : memref<128x16xf32, #tpu.memory_space<vmem>>, vector<16x16xf32>
    tpu.vector_store %arg9[%c48_63, %c0_64], %71 {strides = array<i32>} : memref<128x16xf32, #tpu.memory_space<vmem>>, vector<16x16xf32>,
    %c64 = arith.constant 64 : index
    %c0_65 = arith.constant 0 : index
    %73 = vector.load %arg8[%c64, %c0_65] : memref<128x16xf32, #tpu.memory_space<vmem>>, vector<16x16xf32>
    %74 = arith.truncf %73 : vector<16x16xf32> to vector<16x16xbf16>
    %c64_66 = arith.constant 64 : index
    %c0_67 = arith.constant 0 : index
    %75 = vector.load %arg9[%c64_66, %c0_67] : memref<128x16xf32, #tpu.memory_space<vmem>>, vector<16x16xf32>
    %76 = arith.truncf %75 : vector<16x16xf32> to vector<16x16xbf16>
    %cst_68 = arith.constant dense<0.000000e+00> : vector<16x16xf32>
    %77 = tpu.matmul %2, %74, %cst_68 {dimension_numbers = #tpu.dot_dimension_numbers<[1], [0], [0], [1], [0, 0, 1, 1], [], []>} : vector<16x16xbf16>, vector<16x16xbf16>, vector<16x16xf32> -> vector<16x16xf32>
    %cst_69 = arith.constant dense<0.000000e+00> : vector<16x16xf32>
    %78 = tpu.matmul %3, %76, %cst_69 {dimension_numbers = #tpu.dot_dimension_numbers<[1], [0], [0], [1], [0, 0, 1, 1], [], []>} : vector<16x16xbf16>, vector<16x16xbf16>, vector<16x16xf32> -> vector<16x16xf32>
    %79 = arith.subf %77, %78 : vector<16x16xf32>
    %cst_70 = arith.constant dense<0.000000e+00> : vector<16x16xf32>
    %80 = tpu.matmul %2, %76, %cst_70 {dimension_numbers = #tpu.dot_dimension_numbers<[1], [0], [0], [1], [0, 0, 1, 1], [], []>} : vector<16x16xbf16>, vector<16x16xbf16>, vector<16x16xf32> -> vector<16x16xf32>
    %cst_71 = arith.constant dense<0.000000e+00> : vector<16x16xf32>
    %81 = tpu.matmul %3, %74, %cst_71 {dimension_numbers = #tpu.dot_dimension_numbers<[1], [0], [0], [1], [0, 0, 1, 1], [], []>} : vector<16x16xbf16>, vector<16x16xbf16>, vector<16x16xf32> -> vector<16x16xf32>
    %82 = arith.addf %80, %81 : vector<16x16xf32>
    %83 = arith.mulf %79, %16 : vector<16x16xf32>
    %c64_72 = arith.constant 64 : index
    %c0_73 = arith.constant 0 : index
    %84 = vector.load %arg8[%c64_72, %c0_73] : memref<128x16xf32, #tpu.memory_space<vmem>>, vector<16x16xf32>
    tpu.vector_store %arg8[%c64_72, %c0_73], %83 {strides = array<i32>} : memref<128x16xf32, #tpu.memory_space<vmem>>, vector<16x16xf32>,
    %85 = arith.mulf %82, %16 : vector<16x16xf32>
    %c64_74 = arith.constant 64 : index
    %c0_75 = arith.constant 0 : index
    %86 = vector.load %arg9[%c64_74, %c0_75] : memref<128x16xf32, #tpu.memory_space<vmem>>, vector<16x16xf32>
    tpu.vector_store %arg9[%c64_74, %c0_75], %85 {strides = array<i32>} : memref<128x16xf32, #tpu.memory_space<vmem>>, vector<16x16xf32>,
    %c80 = arith.constant 80 : index
    %c0_76 = arith.constant 0 : index
    %87 = vector.load %arg8[%c80, %c0_76] : memref<128x16xf32, #tpu.memory_space<vmem>>, vector<16x16xf32>
    %88 = arith.truncf %87 : vector<16x16xf32> to vector<16x16xbf16>
    %c80_77 = arith.constant 80 : index
    %c0_78 = arith.constant 0 : index
    %89 = vector.load %arg9[%c80_77, %c0_78] : memref<128x16xf32, #tpu.memory_space<vmem>>, vector<16x16xf32>
    %90 = arith.truncf %89 : vector<16x16xf32> to vector<16x16xbf16>
    %cst_79 = arith.constant dense<0.000000e+00> : vector<16x16xf32>
    %91 = tpu.matmul %2, %88, %cst_79 {dimension_numbers = #tpu.dot_dimension_numbers<[1], [0], [0], [1], [0, 0, 1, 1], [], []>} : vector<16x16xbf16>, vector<16x16xbf16>, vector<16x16xf32> -> vector<16x16xf32>
    %cst_80 = arith.constant dense<0.000000e+00> : vector<16x16xf32>
    %92 = tpu.matmul %3, %90, %cst_80 {dimension_numbers = #tpu.dot_dimension_numbers<[1], [0], [0], [1], [0, 0, 1, 1], [], []>} : vector<16x16xbf16>, vector<16x16xbf16>, vector<16x16xf32> -> vector<16x16xf32>
    %93 = arith.subf %91, %92 : vector<16x16xf32>
    %cst_81 = arith.constant dense<0.000000e+00> : vector<16x16xf32>
    %94 = tpu.matmul %2, %90, %cst_81 {dimension_numbers = #tpu.dot_dimension_numbers<[1], [0], [0], [1], [0, 0, 1, 1], [], []>} : vector<16x16xbf16>, vector<16x16xbf16>, vector<16x16xf32> -> vector<16x16xf32>
    %cst_82 = arith.constant dense<0.000000e+00> : vector<16x16xf32>
    %95 = tpu.matmul %3, %88, %cst_82 {dimension_numbers = #tpu.dot_dimension_numbers<[1], [0], [0], [1], [0, 0, 1, 1], [], []>} : vector<16x16xbf16>, vector<16x16xbf16>, vector<16x16xf32> -> vector<16x16xf32>
    %96 = arith.addf %94, %95 : vector<16x16xf32>
    %97 = arith.mulf %93, %16 : vector<16x16xf32>
    %c80_83 = arith.constant 80 : index
    %c0_84 = arith.constant 0 : index
    %98 = vector.load %arg8[%c80_83, %c0_84] : memref<128x16xf32, #tpu.memory_space<vmem>>, vector<16x16xf32>
    tpu.vector_store %arg8[%c80_83, %c0_84], %97 {strides = array<i32>} : memref<128x16xf32, #tpu.memory_space<vmem>>, vector<16x16xf32>,
    %99 = arith.mulf %96, %16 : vector<16x16xf32>
    %c80_85 = arith.constant 80 : index
    %c0_86 = arith.constant 0 : index
    %100 = vector.load %arg9[%c80_85, %c0_86] : memref<128x16xf32, #tpu.memory_space<vmem>>, vector<16x16xf32>
    tpu.vector_store %arg9[%c80_85, %c0_86], %99 {strides = array<i32>} : memref<128x16xf32, #tpu.memory_space<vmem>>, vector<16x16xf32>,
    %c96 = arith.constant 96 : index
    %c0_87 = arith.constant 0 : index
    %101 = vector.load %arg8[%c96, %c0_87] : memref<128x16xf32, #tpu.memory_space<vmem>>, vector<16x16xf32>
    %102 = arith.truncf %101 : vector<16x16xf32> to vector<16x16xbf16>
    %c96_88 = arith.constant 96 : index
    %c0_89 = arith.constant 0 : index
    %103 = vector.load %arg9[%c96_88, %c0_89] : memref<128x16xf32, #tpu.memory_space<vmem>>, vector<16x16xf32>
    %104 = arith.truncf %103 : vector<16x16xf32> to vector<16x16xbf16>
    %cst_90 = arith.constant dense<0.000000e+00> : vector<16x16xf32>
    %105 = tpu.matmul %2, %102, %cst_90 {dimension_numbers = #tpu.dot_dimension_numbers<[1], [0], [0], [1], [0, 0, 1, 1], [], []>} : vector<16x16xbf16>, vector<16x16xbf16>, vector<16x16xf32> -> vector<16x16xf32>
    %cst_91 = arith.constant dense<0.000000e+00> : vector<16x16xf32>
    %106 = tpu.matmul %3, %104, %cst_91 {dimension_numbers = #tpu.dot_dimension_numbers<[1], [0], [0], [1], [0, 0, 1, 1], [], []>} : vector<16x16xbf16>, vector<16x16xbf16>, vector<16x16xf32> -> vector<16x16xf32>
    %107 = arith.subf %105, %106 : vector<16x16xf32>
    %cst_92 = arith.constant dense<0.000000e+00> : vector<16x16xf32>
    %108 = tpu.matmul %2, %104, %cst_92 {dimension_numbers = #tpu.dot_dimension_numbers<[1], [0], [0], [1], [0, 0, 1, 1], [], []>} : vector<16x16xbf16>, vector<16x16xbf16>, vector<16x16xf32> -> vector<16x16xf32>
    %cst_93 = arith.constant dense<0.000000e+00> : vector<16x16xf32>
    %109 = tpu.matmul %3, %102, %cst_93 {dimension_numbers = #tpu.dot_dimension_numbers<[1], [0], [0], [1], [0, 0, 1, 1], [], []>} : vector<16x16xbf16>, vector<16x16xbf16>, vector<16x16xf32> -> vector<16x16xf32>
    %110 = arith.addf %108, %109 : vector<16x16xf32>
    %111 = arith.mulf %107, %16 : vector<16x16xf32>
    %c96_94 = arith.constant 96 : index
    %c0_95 = arith.constant 0 : index
    %112 = vector.load %arg8[%c96_94, %c0_95] : memref<128x16xf32, #tpu.memory_space<vmem>>, vector<16x16xf32>
    tpu.vector_store %arg8[%c96_94, %c0_95], %111 {strides = array<i32>} : memref<128x16xf32, #tpu.memory_space<vmem>>, vector<16x16xf32>,
    %113 = arith.mulf %110, %16 : vector<16x16xf32>
    %c96_96 = arith.constant 96 : index
    %c0_97 = arith.constant 0 : index
    %114 = vector.load %arg9[%c96_96, %c0_97] : memref<128x16xf32, #tpu.memory_space<vmem>>, vector<16x16xf32>
    tpu.vector_store %arg9[%c96_96, %c0_97], %113 {strides = array<i32>} : memref<128x16xf32, #tpu.memory_space<vmem>>, vector<16x16xf32>,
    %c112 = arith.constant 112 : index
    %c0_98 = arith.constant 0 : index
    %115 = vector.load %arg8[%c112, %c0_98] : memref<128x16xf32, #tpu.memory_space<vmem>>, vector<16x16xf32>
    %116 = arith.truncf %115 : vector<16x16xf32> to vector<16x16xbf16>
    %c112_99 = arith.constant 112 : index
    %c0_100 = arith.constant 0 : index
    %117 = vector.load %arg9[%c112_99, %c0_100] : memref<128x16xf32, #tpu.memory_space<vmem>>, vector<16x16xf32>
    %118 = arith.truncf %117 : vector<16x16xf32> to vector<16x16xbf16>
    %cst_101 = arith.constant dense<0.000000e+00> : vector<16x16xf32>
    %119 = tpu.matmul %2, %116, %cst_101 {dimension_numbers = #tpu.dot_dimension_numbers<[1], [0], [0], [1], [0, 0, 1, 1], [], []>} : vector<16x16xbf16>, vector<16x16xbf16>, vector<16x16xf32> -> vector<16x16xf32>
    %cst_102 = arith.constant dense<0.000000e+00> : vector<16x16xf32>
    %120 = tpu.matmul %3, %118, %cst_102 {dimension_numbers = #tpu.dot_dimension_numbers<[1], [0], [0], [1], [0, 0, 1, 1], [], []>} : vector<16x16xbf16>, vector<16x16xbf16>, vector<16x16xf32> -> vector<16x16xf32>
    %121 = arith.subf %119, %120 : vector<16x16xf32>
    %cst_103 = arith.constant dense<0.000000e+00> : vector<16x16xf32>
    %122 = tpu.matmul %2, %118, %cst_103 {dimension_numbers = #tpu.dot_dimension_numbers<[1], [0], [0], [1], [0, 0, 1, 1], [], []>} : vector<16x16xbf16>, vector<16x16xbf16>, vector<16x16xf32> -> vector<16x16xf32>
    %cst_104 = arith.constant dense<0.000000e+00> : vector<16x16xf32>
    %123 = tpu.matmul %3, %116, %cst_104 {dimension_numbers = #tpu.dot_dimension_numbers<[1], [0], [0], [1], [0, 0, 1, 1], [], []>} : vector<16x16xbf16>, vector<16x16xbf16>, vector<16x16xf32> -> vector<16x16xf32>
    %124 = arith.addf %122, %123 : vector<16x16xf32>
    %125 = arith.mulf %121, %16 : vector<16x16xf32>
    %c112_105 = arith.constant 112 : index
    %c0_106 = arith.constant 0 : index
    %126 = vector.load %arg8[%c112_105, %c0_106] : memref<128x16xf32, #tpu.memory_space<vmem>>, vector<16x16xf32>
    tpu.vector_store %arg8[%c112_105, %c0_106], %125 {strides = array<i32>} : memref<128x16xf32, #tpu.memory_space<vmem>>, vector<16x16xf32>,
    %127 = arith.mulf %124, %16 : vector<16x16xf32>
    %c112_107 = arith.constant 112 : index
    %c0_108 = arith.constant 0 : index
    %128 = vector.load %arg9[%c112_107, %c0_108] : memref<128x16xf32, #tpu.memory_space<vmem>>, vector<16x16xf32>
    tpu.vector_store %arg9[%c112_107, %c0_108], %127 {strides = array<i32>} : memref<128x16xf32, #tpu.memory_space<vmem>>, vector<16x16xf32>,
    return
  }
  func.func @transform_0(%arg0: i32) -> (i32, i32) {
    %c0_i32 = arith.constant 0 : i32
    %c0_i32_0 = arith.constant 0 : i32
    return %arg0, %c0_i32 : i32, i32
  }
  func.func @transform_1(%arg0: i32) -> (i32, i32) {
    %c0_i32 = arith.constant 0 : i32
    %c0_i32_0 = arith.constant 0 : i32
    return %arg0, %c0_i32 : i32, i32
  }
  func.func @transform_2(%arg0: i32) -> (i32, i32) {
    %c0_i32 = arith.constant 0 : i32
    %c0_i32_0 = arith.constant 0 : i32
    %c0_i32_1 = arith.constant 0 : i32
    return %c0_i32, %c0_i32_0 : i32, i32
  }
  func.func @transform_3(%arg0: i32) -> (i32, i32) {
    %c0_i32 = arith.constant 0 : i32
    %c0_i32_0 = arith.constant 0 : i32
    %c0_i32_1 = arith.constant 0 : i32
    return %c0_i32, %c0_i32_0 : i32, i32
  }
  func.func @transform_4(%arg0: i32) -> (i32, i32) {
    %c0_i32 = arith.constant 0 : i32
    %c0_i32_0 = arith.constant 0 : i32
    %c0_i32_1 = arith.constant 0 : i32
    return %c0_i32, %c0_i32_0 : i32, i32
  }
  func.func @transform_5(%arg0: i32) -> (i32, i32) {
    %c0_i32 = arith.constant 0 : i32
    %c0_i32_0 = arith.constant 0 : i32
    %c0_i32_1 = arith.constant 0 : i32
    return %c0_i32, %c0_i32_0 : i32, i32
  }
  func.func @transform_6(%arg0: i32) -> (i32, i32) {
    %c0_i32 = arith.constant 0 : i32
    %c0_i32_0 = arith.constant 0 : i32
    %c0_i32_1 = arith.constant 0 : i32
    return %c0_i32, %c0_i32_0 : i32, i32
  }
  func.func @transform_7(%arg0: i32) -> (i32, i32) {
    %c0_i32 = arith.constant 0 : i32
    %c0_i32_0 = arith.constant 0 : i32
    return %arg0, %c0_i32 : i32, i32
  }
  func.func @transform_8(%arg0: i32) -> (i32, i32) {
    %c0_i32 = arith.constant 0 : i32
    %c0_i32_0 = arith.constant 0 : i32
    return %arg0, %c0_i32 : i32, i32
  }
}

module attributes {stable_mosaic.version = 11 : i64} {
  func.func @_fft2_mask_kernel(%arg0: i32, %arg1: memref<128x16xf32, #tpu.memory_space<vmem>>, %arg2: memref<128x16xf32, #tpu.memory_space<vmem>>, %arg3: memref<16x16xf32, #tpu.memory_space<vmem>>, %arg4: memref<16x16xbf16, #tpu.memory_space<vmem>>, %arg5: memref<16x16xbf16, #tpu.memory_space<vmem>>, %arg6: memref<16x16xbf16, #tpu.memory_space<vmem>>, %arg7: memref<16x16xbf16, #tpu.memory_space<vmem>>, %arg8: memref<128x16xf32, #tpu.memory_space<vmem>>, %arg9: memref<128x16xf32, #tpu.memory_space<vmem>>) attributes {dimension_semantics = [#tpu.dimension_semantics<parallel>], iteration_bounds = array<i64: 1>, scalar_prefetch = 0 : i64, scratch_operands = 0 : i64, tpu.core_type = #tpu.core_type<tc>, window_params = [{transform_indices = @transform_0, window_bounds = array<i64: 128, 16>}, {transform_indices = @transform_1, window_bounds = array<i64: 128, 16>}, {pipeline_mode = #tpu.pipeline_mode<synchronous>, transform_indices = @transform_2, window_bounds = array<i64: 16, 16>}, {pipeline_mode = #tpu.pipeline_mode<synchronous>, transform_indices = @transform_3, window_bounds = array<i64: 16, 16>}, {pipeline_mode = #tpu.pipeline_mode<synchronous>, transform_indices = @transform_4, window_bounds = array<i64: 16, 16>}, {pipeline_mode = #tpu.pipeline_mode<synchronous>, transform_indices = @transform_5, window_bounds = array<i64: 16, 16>}, {pipeline_mode = #tpu.pipeline_mode<synchronous>, transform_indices = @transform_6, window_bounds = array<i64: 16, 16>}, {transform_indices = @transform_7, window_bounds = array<i64: 128, 16>}, {transform_indices = @transform_8, window_bounds = array<i64: 128, 16>}]} {
    %c0 = arith.constant 0 : index
    %c0_0 = arith.constant 0 : index
    %0 = vector.load %arg6[%c0, %c0_0] : memref<16x16xbf16, #tpu.memory_space<vmem>>, vector<16x16xbf16>
    %c0_1 = arith.constant 0 : index
    %c0_2 = arith.constant 0 : index
    %1 = vector.load %arg7[%c0_1, %c0_2] : memref<16x16xbf16, #tpu.memory_space<vmem>>, vector<16x16xbf16>
    %c0_3 = arith.constant 0 : index
    %c0_4 = arith.constant 0 : index
    %2 = vector.load %arg4[%c0_3, %c0_4] : memref<16x16xbf16, #tpu.memory_space<vmem>>, vector<16x16xbf16>
    %c0_5 = arith.constant 0 : index
    %c0_6 = arith.constant 0 : index
    %3 = vector.load %arg5[%c0_5, %c0_6] : memref<16x16xbf16, #tpu.memory_space<vmem>>, vector<16x16xbf16>
    %c0_7 = arith.constant 0 : index
    %c0_8 = arith.constant 0 : index
    %4 = vector.load %arg1[%c0_7, %c0_8] : memref<128x16xf32, #tpu.memory_space<vmem>>, vector<128x16xf32>
    %5 = arith.truncf %4 : vector<128x16xf32> to vector<128x16xbf16>
    %c0_9 = arith.constant 0 : index
    %c0_10 = arith.constant 0 : index
    %6 = vector.load %arg2[%c0_9, %c0_10] : memref<128x16xf32, #tpu.memory_space<vmem>>, vector<128x16xf32>
    %7 = arith.truncf %6 : vector<128x16xf32> to vector<128x16xbf16>
    %cst = arith.constant dense<0.000000e+00> : vector<128x16xf32>
    %8 = tpu.matmul %5, %0, %cst {dimension_numbers = #tpu.dot_dimension_numbers<[1], [0], [0], [1], [0, 0, 1, 1], [], []>} : vector<128x16xbf16>, vector<16x16xbf16>, vector<128x16xf32> -> vector<128x16xf32>
    %cst_11 = arith.constant dense<0.000000e+00> : vector<128x16xf32>
    %9 = tpu.matmul %7, %1, %cst_11 {dimension_numbers = #tpu.dot_dimension_numbers<[1], [0], [0], [1], [0, 0, 1, 1], [], []>} : vector<128x16xbf16>, vector<16x16xbf16>, vector<128x16xf32> -> vector<128x16xf32>
    %10 = arith.subf %8, %9 : vector<128x16xf32>
    %c0_12 = arith.constant 0 : index
    %c0_13 = arith.constant 0 : index
    %11 = vector.load %arg8[%c0_12, %c0_13] : memref<128x16xf32, #tpu.memory_space<vmem>>, vector<128x16xf32>
    tpu.vector_store %arg8[%c0_12, %c0_13], %10 {strides = array<i32>} : memref<128x16xf32, #tpu.memory_space<vmem>>, vector<128x16xf32>,
    %cst_14 = arith.constant dense<0.000000e+00> : vector<128x16xf32>
    %12 = tpu.matmul %5, %1, %cst_14 {dimension_numbers = #tpu.dot_dimension_numbers<[1], [0], [0], [1], [0, 0, 1, 1], [], []>} : vector<128x16xbf16>, vector<16x16xbf16>, vector<128x16xf32> -> vector<128x16xf32>
    %cst_15 = arith.constant dense<0.000000e+00> : vector<128x16xf32>
    %13 = tpu.matmul %7, %0, %cst_15 {dimension_numbers = #tpu.dot_dimension_numbers<[1], [0], [0], [1], [0, 0, 1, 1], [], []>} : vector<128x16xbf16>, vector<16x16xbf16>, vector<128x16xf32> -> vector<128x16xf32>
    %14 = arith.addf %12, %13 : vector<128x16xf32>
    %c0_16 = arith.constant 0 : index
    %c0_17 = arith.constant 0 : index
    %15 = vector.load %arg9[%c0_16, %c0_17] : memref<128x16xf32, #tpu.memory_space<vmem>>, vector<128x16xf32>
    tpu.vector_store %arg9[%c0_16, %c0_17], %14 {strides = array<i32>} : memref<128x16xf32, #tpu.memory_space<vmem>>, vector<128x16xf32>,
    %c0_18 = arith.constant 0 : index
    %c0_19 = arith.constant 0 : index
    %16 = vector.load %arg3[%c0_18, %c0_19] : memref<16x16xf32, #tpu.memory_space<vmem>>, vector<16x16xf32>
    %c0_20 = arith.constant 0 : index
    %c0_21 = arith.constant 0 : index
    %17 = vector.load %arg8[%c0_20, %c0_21] : memref<128x16xf32, #tpu.memory_space<vmem>>, vector<16x16xf32>
    %18 = arith.truncf %17 : vector<16x16xf32> to vector<16x16xbf16>
    %c0_22 = arith.constant 0 : index
    %c0_23 = arith.constant 0 : index
    %19 = vector.load %arg9[%c0_22, %c0_23] : memref<128x16xf32, #tpu.memory_space<vmem>>, vector<16x16xf32>
    %20 = arith.truncf %19 : vector<16x16xf32> to vector<16x16xbf16>
    %cst_24 = arith.constant dense<0.000000e+00> : vector<16x16xf32>
    %21 = tpu.matmul %2, %18, %cst_24 {dimension_numbers = #tpu.dot_dimension_numbers<[1], [0], [0], [1], [0, 0, 1, 1], [], []>} : vector<16x16xbf16>, vector<16x16xbf16>, vector<16x16xf32> -> vector<16x16xf32>
    %cst_25 = arith.constant dense<0.000000e+00> : vector<16x16xf32>
    %22 = tpu.matmul %3, %20, %cst_25 {dimension_numbers = #tpu.dot_dimension_numbers<[1], [0], [0], [1], [0, 0, 1, 1], [], []>} : vector<16x16xbf16>, vector<16x16xbf16>, vector<16x16xf32> -> vector<16x16xf32>
    %23 = arith.subf %21, %22 : vector<16x16xf32>
    %cst_26 = arith.constant dense<0.000000e+00> : vector<16x16xf32>
    %24 = tpu.matmul %2, %20, %cst_26 {dimension_numbers = #tpu.dot_dimension_numbers<[1], [0], [0], [1], [0, 0, 1, 1], [], []>} : vector<16x16xbf16>, vector<16x16xbf16>, vector<16x16xf32> -> vector<16x16xf32>
    %cst_27 = arith.constant dense<0.000000e+00> : vector<16x16xf32>
    %25 = tpu.matmul %3, %18, %cst_27 {dimension_numbers = #tpu.dot_dimension_numbers<[1], [0], [0], [1], [0, 0, 1, 1], [], []>} : vector<16x16xbf16>, vector<16x16xbf16>, vector<16x16xf32> -> vector<16x16xf32>
    %26 = arith.addf %24, %25 : vector<16x16xf32>
    %27 = arith.mulf %23, %16 : vector<16x16xf32>
    %c0_28 = arith.constant 0 : index
    %c0_29 = arith.constant 0 : index
    %28 = vector.load %arg8[%c0_28, %c0_29] : memref<128x16xf32, #tpu.memory_space<vmem>>, vector<16x16xf32>
    tpu.vector_store %arg8[%c0_28, %c0_29], %27 {strides = array<i32>} : memref<128x16xf32, #tpu.memory_space<vmem>>, vector<16x16xf32>,
    %29 = arith.mulf %26, %16 : vector<16x16xf32>
    %c0_30 = arith.constant 0 : index
    %c0_31 = arith.constant 0 : index
    %30 = vector.load %arg9[%c0_30, %c0_31] : memref<128x16xf32, #tpu.memory_space<vmem>>, vector<16x16xf32>
    tpu.vector_store %arg9[%c0_30, %c0_31], %29 {strides = array<i32>} : memref<128x16xf32, #tpu.memory_space<vmem>>, vector<16x16xf32>,
    %c16 = arith.constant 16 : index
    %c0_32 = arith.constant 0 : index
    %31 = vector.load %arg8[%c16, %c0_32] : memref<128x16xf32, #tpu.memory_space<vmem>>, vector<16x16xf32>
    %32 = arith.truncf %31 : vector<16x16xf32> to vector<16x16xbf16>
    %c16_33 = arith.constant 16 : index
    %c0_34 = arith.constant 0 : index
    %33 = vector.load %arg9[%c16_33, %c0_34] : memref<128x16xf32, #tpu.memory_space<vmem>>, vector<16x16xf32>
    %34 = arith.truncf %33 : vector<16x16xf32> to vector<16x16xbf16>
    %cst_35 = arith.constant dense<0.000000e+00> : vector<16x16xf32>
    %35 = tpu.matmul %2, %32, %cst_35 {dimension_numbers = #tpu.dot_dimension_numbers<[1], [0], [0], [1], [0, 0, 1, 1], [], []>} : vector<16x16xbf16>, vector<16x16xbf16>, vector<16x16xf32> -> vector<16x16xf32>
    %cst_36 = arith.constant dense<0.000000e+00> : vector<16x16xf32>
    %36 = tpu.matmul %3, %34, %cst_36 {dimension_numbers = #tpu.dot_dimension_numbers<[1], [0], [0], [1], [0, 0, 1, 1], [], []>} : vector<16x16xbf16>, vector<16x16xbf16>, vector<16x16xf32> -> vector<16x16xf32>
    %37 = arith.subf %35, %36 : vector<16x16xf32>
    %cst_37 = arith.constant dense<0.000000e+00> : vector<16x16xf32>
    %38 = tpu.matmul %2, %34, %cst_37 {dimension_numbers = #tpu.dot_dimension_numbers<[1], [0], [0], [1], [0, 0, 1, 1], [], []>} : vector<16x16xbf16>, vector<16x16xbf16>, vector<16x16xf32> -> vector<16x16xf32>
    %cst_38 = arith.constant dense<0.000000e+00> : vector<16x16xf32>
    %39 = tpu.matmul %3, %32, %cst_38 {dimension_numbers = #tpu.dot_dimension_numbers<[1], [0], [0], [1], [0, 0, 1, 1], [], []>} : vector<16x16xbf16>, vector<16x16xbf16>, vector<16x16xf32> -> vector<16x16xf32>
    %40 = arith.addf %38, %39 : vector<16x16xf32>
    %41 = arith.mulf %37, %16 : vector<16x16xf32>
    %c16_39 = arith.constant 16 : index
    %c0_40 = arith.constant 0 : index
    %42 = vector.load %arg8[%c16_39, %c0_40] : memref<128x16xf32, #tpu.memory_space<vmem>>, vector<16x16xf32>
    tpu.vector_store %arg8[%c16_39, %c0_40], %41 {strides = array<i32>} : memref<128x16xf32, #tpu.memory_space<vmem>>, vector<16x16xf32>,
    %43 = arith.mulf %40, %16 : vector<16x16xf32>
    %c16_41 = arith.constant 16 : index
    %c0_42 = arith.constant 0 : index
    %44 = vector.load %arg9[%c16_41, %c0_42] : memref<128x16xf32, #tpu.memory_space<vmem>>, vector<16x16xf32>
    tpu.vector_store %arg9[%c16_41, %c0_42], %43 {strides = array<i32>} : memref<128x16xf32, #tpu.memory_space<vmem>>, vector<16x16xf32>,
    %c32 = arith.constant 32 : index
    %c0_43 = arith.constant 0 : index
    %45 = vector.load %arg8[%c32, %c0_43] : memref<128x16xf32, #tpu.memory_space<vmem>>, vector<16x16xf32>
    %46 = arith.truncf %45 : vector<16x16xf32> to vector<16x16xbf16>
    %c32_44 = arith.constant 32 : index
    %c0_45 = arith.constant 0 : index
    %47 = vector.load %arg9[%c32_44, %c0_45] : memref<128x16xf32, #tpu.memory_space<vmem>>, vector<16x16xf32>
    %48 = arith.truncf %47 : vector<16x16xf32> to vector<16x16xbf16>
    %cst_46 = arith.constant dense<0.000000e+00> : vector<16x16xf32>
    %49 = tpu.matmul %2, %46, %cst_46 {dimension_numbers = #tpu.dot_dimension_numbers<[1], [0], [0], [1], [0, 0, 1, 1], [], []>} : vector<16x16xbf16>, vector<16x16xbf16>, vector<16x16xf32> -> vector<16x16xf32>
    %cst_47 = arith.constant dense<0.000000e+00> : vector<16x16xf32>
    %50 = tpu.matmul %3, %48, %cst_47 {dimension_numbers = #tpu.dot_dimension_numbers<[1], [0], [0], [1], [0, 0, 1, 1], [], []>} : vector<16x16xbf16>, vector<16x16xbf16>, vector<16x16xf32> -> vector<16x16xf32>
    %51 = arith.subf %49, %50 : vector<16x16xf32>
    %cst_48 = arith.constant dense<0.000000e+00> : vector<16x16xf32>
    %52 = tpu.matmul %2, %48, %cst_48 {dimension_numbers = #tpu.dot_dimension_numbers<[1], [0], [0], [1], [0, 0, 1, 1], [], []>} : vector<16x16xbf16>, vector<16x16xbf16>, vector<16x16xf32> -> vector<16x16xf32>
    %cst_49 = arith.constant dense<0.000000e+00> : vector<16x16xf32>
    %53 = tpu.matmul %3, %46, %cst_49 {dimension_numbers = #tpu.dot_dimension_numbers<[1], [0], [0], [1], [0, 0, 1, 1], [], []>} : vector<16x16xbf16>, vector<16x16xbf16>, vector<16x16xf32> -> vector<16x16xf32>
    %54 = arith.addf %52, %53 : vector<16x16xf32>
    %55 = arith.mulf %51, %16 : vector<16x16xf32>
    %c32_50 = arith.constant 32 : index
    %c0_51 = arith.constant 0 : index
    %56 = vector.load %arg8[%c32_50, %c0_51] : memref<128x16xf32, #tpu.memory_space<vmem>>, vector<16x16xf32>
    tpu.vector_store %arg8[%c32_50, %c0_51], %55 {strides = array<i32>} : memref<128x16xf32, #tpu.memory_space<vmem>>, vector<16x16xf32>,
    %57 = arith.mulf %54, %16 : vector<16x16xf32>
    %c32_52 = arith.constant 32 : index
    %c0_53 = arith.constant 0 : index
    %58 = vector.load %arg9[%c32_52, %c0_53] : memref<128x16xf32, #tpu.memory_space<vmem>>, vector<16x16xf32>
    tpu.vector_store %arg9[%c32_52, %c0_53], %57 {strides = array<i32>} : memref<128x16xf32, #tpu.memory_space<vmem>>, vector<16x16xf32>,
    %c48 = arith.constant 48 : index
    %c0_54 = arith.constant 0 : index
    %59 = vector.load %arg8[%c48, %c0_54] : memref<128x16xf32, #tpu.memory_space<vmem>>, vector<16x16xf32>
    %60 = arith.truncf %59 : vector<16x16xf32> to vector<16x16xbf16>
    %c48_55 = arith.constant 48 : index
    %c0_56 = arith.constant 0 : index
    %61 = vector.load %arg9[%c48_55, %c0_56] : memref<128x16xf32, #tpu.memory_space<vmem>>, vector<16x16xf32>
    %62 = arith.truncf %61 : vector<16x16xf32> to vector<16x16xbf16>
    %cst_57 = arith.constant dense<0.000000e+00> : vector<16x16xf32>
    %63 = tpu.matmul %2, %60, %cst_57 {dimension_numbers = #tpu.dot_dimension_numbers<[1], [0], [0], [1], [0, 0, 1, 1], [], []>} : vector<16x16xbf16>, vector<16x16xbf16>, vector<16x16xf32> -> vector<16x16xf32>
    %cst_58 = arith.constant dense<0.000000e+00> : vector<16x16xf32>
    %64 = tpu.matmul %3, %62, %cst_58 {dimension_numbers = #tpu.dot_dimension_numbers<[1], [0], [0], [1], [0, 0, 1, 1], [], []>} : vector<16x16xbf16>, vector<16x16xbf16>, vector<16x16xf32> -> vector<16x16xf32>
    %65 = arith.subf %63, %64 : vector<16x16xf32>
    %cst_59 = arith.constant dense<0.000000e+00> : vector<16x16xf32>
    %66 = tpu.matmul %2, %62, %cst_59 {dimension_numbers = #tpu.dot_dimension_numbers<[1], [0], [0], [1], [0, 0, 1, 1], [], []>} : vector<16x16xbf16>, vector<16x16xbf16>, vector<16x16xf32> -> vector<16x16xf32>
    %cst_60 = arith.constant dense<0.000000e+00> : vector<16x16xf32>
    %67 = tpu.matmul %3, %60, %cst_60 {dimension_numbers = #tpu.dot_dimension_numbers<[1], [0], [0], [1], [0, 0, 1, 1], [], []>} : vector<16x16xbf16>, vector<16x16xbf16>, vector<16x16xf32> -> vector<16x16xf32>
    %68 = arith.addf %66, %67 : vector<16x16xf32>
    %69 = arith.mulf %65, %16 : vector<16x16xf32>
    %c48_61 = arith.constant 48 : index
    %c0_62 = arith.constant 0 : index
    %70 = vector.load %arg8[%c48_61, %c0_62] : memref<128x16xf32, #tpu.memory_space<vmem>>, vector<16x16xf32>
    tpu.vector_store %arg8[%c48_61, %c0_62], %69 {strides = array<i32>} : memref<128x16xf32, #tpu.memory_space<vmem>>, vector<16x16xf32>,
    %71 = arith.mulf %68, %16 : vector<16x16xf32>
    %c48_63 = arith.constant 48 : index
    %c0_64 = arith.constant 0 : index
    %72 = vector.load %arg9[%c48_63, %c0_64] : memref<128x16xf32, #tpu.memory_space<vmem>>, vector<16x16xf32>
    tpu.vector_store %arg9[%c48_63, %c0_64], %71 {strides = array<i32>} : memref<128x16xf32, #tpu.memory_space<vmem>>, vector<16x16xf32>,
    %c64 = arith.constant 64 : index
    %c0_65 = arith.constant 0 : index
    %73 = vector.load %arg8[%c64, %c0_65] : memref<128x16xf32, #tpu.memory_space<vmem>>, vector<16x16xf32>
    %74 = arith.truncf %73 : vector<16x16xf32> to vector<16x16xbf16>
    %c64_66 = arith.constant 64 : index
    %c0_67 = arith.constant 0 : index
    %75 = vector.load %arg9[%c64_66, %c0_67] : memref<128x16xf32, #tpu.memory_space<vmem>>, vector<16x16xf32>
    %76 = arith.truncf %75 : vector<16x16xf32> to vector<16x16xbf16>
    %cst_68 = arith.constant dense<0.000000e+00> : vector<16x16xf32>
    %77 = tpu.matmul %2, %74, %cst_68 {dimension_numbers = #tpu.dot_dimension_numbers<[1], [0], [0], [1], [0, 0, 1, 1], [], []>} : vector<16x16xbf16>, vector<16x16xbf16>, vector<16x16xf32> -> vector<16x16xf32>
    %cst_69 = arith.constant dense<0.000000e+00> : vector<16x16xf32>
    %78 = tpu.matmul %3, %76, %cst_69 {dimension_numbers = #tpu.dot_dimension_numbers<[1], [0], [0], [1], [0, 0, 1, 1], [], []>} : vector<16x16xbf16>, vector<16x16xbf16>, vector<16x16xf32> -> vector<16x16xf32>
    %79 = arith.subf %77, %78 : vector<16x16xf32>
    %cst_70 = arith.constant dense<0.000000e+00> : vector<16x16xf32>
    %80 = tpu.matmul %2, %76, %cst_70 {dimension_numbers = #tpu.dot_dimension_numbers<[1], [0], [0], [1], [0, 0, 1, 1], [], []>} : vector<16x16xbf16>, vector<16x16xbf16>, vector<16x16xf32> -> vector<16x16xf32>
    %cst_71 = arith.constant dense<0.000000e+00> : vector<16x16xf32>
    %81 = tpu.matmul %3, %74, %cst_71 {dimension_numbers = #tpu.dot_dimension_numbers<[1], [0], [0], [1], [0, 0, 1, 1], [], []>} : vector<16x16xbf16>, vector<16x16xbf16>, vector<16x16xf32> -> vector<16x16xf32>
    %82 = arith.addf %80, %81 : vector<16x16xf32>
    %83 = arith.mulf %79, %16 : vector<16x16xf32>
    %c64_72 = arith.constant 64 : index
    %c0_73 = arith.constant 0 : index
    %84 = vector.load %arg8[%c64_72, %c0_73] : memref<128x16xf32, #tpu.memory_space<vmem>>, vector<16x16xf32>
    tpu.vector_store %arg8[%c64_72, %c0_73], %83 {strides = array<i32>} : memref<128x16xf32, #tpu.memory_space<vmem>>, vector<16x16xf32>,
    %85 = arith.mulf %82, %16 : vector<16x16xf32>
    %c64_74 = arith.constant 64 : index
    %c0_75 = arith.constant 0 : index
    %86 = vector.load %arg9[%c64_74, %c0_75] : memref<128x16xf32, #tpu.memory_space<vmem>>, vector<16x16xf32>
    tpu.vector_store %arg9[%c64_74, %c0_75], %85 {strides = array<i32>} : memref<128x16xf32, #tpu.memory_space<vmem>>, vector<16x16xf32>,
    %c80 = arith.constant 80 : index
    %c0_76 = arith.constant 0 : index
    %87 = vector.load %arg8[%c80, %c0_76] : memref<128x16xf32, #tpu.memory_space<vmem>>, vector<16x16xf32>
    %88 = arith.truncf %87 : vector<16x16xf32> to vector<16x16xbf16>
    %c80_77 = arith.constant 80 : index
    %c0_78 = arith.constant 0 : index
    %89 = vector.load %arg9[%c80_77, %c0_78] : memref<128x16xf32, #tpu.memory_space<vmem>>, vector<16x16xf32>
    %90 = arith.truncf %89 : vector<16x16xf32> to vector<16x16xbf16>
    %cst_79 = arith.constant dense<0.000000e+00> : vector<16x16xf32>
    %91 = tpu.matmul %2, %88, %cst_79 {dimension_numbers = #tpu.dot_dimension_numbers<[1], [0], [0], [1], [0, 0, 1, 1], [], []>} : vector<16x16xbf16>, vector<16x16xbf16>, vector<16x16xf32> -> vector<16x16xf32>
    %cst_80 = arith.constant dense<0.000000e+00> : vector<16x16xf32>
    %92 = tpu.matmul %3, %90, %cst_80 {dimension_numbers = #tpu.dot_dimension_numbers<[1], [0], [0], [1], [0, 0, 1, 1], [], []>} : vector<16x16xbf16>, vector<16x16xbf16>, vector<16x16xf32> -> vector<16x16xf32>
    %93 = arith.subf %91, %92 : vector<16x16xf32>
    %cst_81 = arith.constant dense<0.000000e+00> : vector<16x16xf32>
    %94 = tpu.matmul %2, %90, %cst_81 {dimension_numbers = #tpu.dot_dimension_numbers<[1], [0], [0], [1], [0, 0, 1, 1], [], []>} : vector<16x16xbf16>, vector<16x16xbf16>, vector<16x16xf32> -> vector<16x16xf32>
    %cst_82 = arith.constant dense<0.000000e+00> : vector<16x16xf32>
    %95 = tpu.matmul %3, %88, %cst_82 {dimension_numbers = #tpu.dot_dimension_numbers<[1], [0], [0], [1], [0, 0, 1, 1], [], []>} : vector<16x16xbf16>, vector<16x16xbf16>, vector<16x16xf32> -> vector<16x16xf32>
    %96 = arith.addf %94, %95 : vector<16x16xf32>
    %97 = arith.mulf %93, %16 : vector<16x16xf32>
    %c80_83 = arith.constant 80 : index
    %c0_84 = arith.constant 0 : index
    %98 = vector.load %arg8[%c80_83, %c0_84] : memref<128x16xf32, #tpu.memory_space<vmem>>, vector<16x16xf32>
    tpu.vector_store %arg8[%c80_83, %c0_84], %97 {strides = array<i32>} : memref<128x16xf32, #tpu.memory_space<vmem>>, vector<16x16xf32>,
    %99 = arith.mulf %96, %16 : vector<16x16xf32>
    %c80_85 = arith.constant 80 : index
    %c0_86 = arith.constant 0 : index
    %100 = vector.load %arg9[%c80_85, %c0_86] : memref<128x16xf32, #tpu.memory_space<vmem>>, vector<16x16xf32>
    tpu.vector_store %arg9[%c80_85, %c0_86], %99 {strides = array<i32>} : memref<128x16xf32, #tpu.memory_space<vmem>>, vector<16x16xf32>,
    %c96 = arith.constant 96 : index
    %c0_87 = arith.constant 0 : index
    %101 = vector.load %arg8[%c96, %c0_87] : memref<128x16xf32, #tpu.memory_space<vmem>>, vector<16x16xf32>
    %102 = arith.truncf %101 : vector<16x16xf32> to vector<16x16xbf16>
    %c96_88 = arith.constant 96 : index
    %c0_89 = arith.constant 0 : index
    %103 = vector.load %arg9[%c96_88, %c0_89] : memref<128x16xf32, #tpu.memory_space<vmem>>, vector<16x16xf32>
    %104 = arith.truncf %103 : vector<16x16xf32> to vector<16x16xbf16>
    %cst_90 = arith.constant dense<0.000000e+00> : vector<16x16xf32>
    %105 = tpu.matmul %2, %102, %cst_90 {dimension_numbers = #tpu.dot_dimension_numbers<[1], [0], [0], [1], [0, 0, 1, 1], [], []>} : vector<16x16xbf16>, vector<16x16xbf16>, vector<16x16xf32> -> vector<16x16xf32>
    %cst_91 = arith.constant dense<0.000000e+00> : vector<16x16xf32>
    %106 = tpu.matmul %3, %104, %cst_91 {dimension_numbers = #tpu.dot_dimension_numbers<[1], [0], [0], [1], [0, 0, 1, 1], [], []>} : vector<16x16xbf16>, vector<16x16xbf16>, vector<16x16xf32> -> vector<16x16xf32>
    %107 = arith.subf %105, %106 : vector<16x16xf32>
    %cst_92 = arith.constant dense<0.000000e+00> : vector<16x16xf32>
    %108 = tpu.matmul %2, %104, %cst_92 {dimension_numbers = #tpu.dot_dimension_numbers<[1], [0], [0], [1], [0, 0, 1, 1], [], []>} : vector<16x16xbf16>, vector<16x16xbf16>, vector<16x16xf32> -> vector<16x16xf32>
    %cst_93 = arith.constant dense<0.000000e+00> : vector<16x16xf32>
    %109 = tpu.matmul %3, %102, %cst_93 {dimension_numbers = #tpu.dot_dimension_numbers<[1], [0], [0], [1], [0, 0, 1, 1], [], []>} : vector<16x16xbf16>, vector<16x16xbf16>, vector<16x16xf32> -> vector<16x16xf32>
    %110 = arith.addf %108, %109 : vector<16x16xf32>
    %111 = arith.mulf %107, %16 : vector<16x16xf32>
    %c96_94 = arith.constant 96 : index
    %c0_95 = arith.constant 0 : index
    %112 = vector.load %arg8[%c96_94, %c0_95] : memref<128x16xf32, #tpu.memory_space<vmem>>, vector<16x16xf32>
    tpu.vector_store %arg8[%c96_94, %c0_95], %111 {strides = array<i32>} : memref<128x16xf32, #tpu.memory_space<vmem>>, vector<16x16xf32>,
    %113 = arith.mulf %110, %16 : vector<16x16xf32>
    %c96_96 = arith.constant 96 : index
    %c0_97 = arith.constant 0 : index
    %114 = vector.load %arg9[%c96_96, %c0_97] : memref<128x16xf32, #tpu.memory_space<vmem>>, vector<16x16xf32>
    tpu.vector_store %arg9[%c96_96, %c0_97], %113 {strides = array<i32>} : memref<128x16xf32, #tpu.memory_space<vmem>>, vector<16x16xf32>,
    %c112 = arith.constant 112 : index
    %c0_98 = arith.constant 0 : index
    %115 = vector.load %arg8[%c112, %c0_98] : memref<128x16xf32, #tpu.memory_space<vmem>>, vector<16x16xf32>
    %116 = arith.truncf %115 : vector<16x16xf32> to vector<16x16xbf16>
    %c112_99 = arith.constant 112 : index
    %c0_100 = arith.constant 0 : index
    %117 = vector.load %arg9[%c112_99, %c0_100] : memref<128x16xf32, #tpu.memory_space<vmem>>, vector<16x16xf32>
    %118 = arith.truncf %117 : vector<16x16xf32> to vector<16x16xbf16>
    %cst_101 = arith.constant dense<0.000000e+00> : vector<16x16xf32>
    %119 = tpu.matmul %2, %116, %cst_101 {dimension_numbers = #tpu.dot_dimension_numbers<[1], [0], [0], [1], [0, 0, 1, 1], [], []>} : vector<16x16xbf16>, vector<16x16xbf16>, vector<16x16xf32> -> vector<16x16xf32>
    %cst_102 = arith.constant dense<0.000000e+00> : vector<16x16xf32>
    %120 = tpu.matmul %3, %118, %cst_102 {dimension_numbers = #tpu.dot_dimension_numbers<[1], [0], [0], [1], [0, 0, 1, 1], [], []>} : vector<16x16xbf16>, vector<16x16xbf16>, vector<16x16xf32> -> vector<16x16xf32>
    %121 = arith.subf %119, %120 : vector<16x16xf32>
    %cst_103 = arith.constant dense<0.000000e+00> : vector<16x16xf32>
    %122 = tpu.matmul %2, %118, %cst_103 {dimension_numbers = #tpu.dot_dimension_numbers<[1], [0], [0], [1], [0, 0, 1, 1], [], []>} : vector<16x16xbf16>, vector<16x16xbf16>, vector<16x16xf32> -> vector<16x16xf32>
    %cst_104 = arith.constant dense<0.000000e+00> : vector<16x16xf32>
    %123 = tpu.matmul %3, %116, %cst_104 {dimension_numbers = #tpu.dot_dimension_numbers<[1], [0], [0], [1], [0, 0, 1, 1], [], []>} : vector<16x16xbf16>, vector<16x16xbf16>, vector<16x16xf32> -> vector<16x16xf32>
    %124 = arith.addf %122, %123 : vector<16x16xf32>
    %125 = arith.mulf %121, %16 : vector<16x16xf32>
    %c112_105 = arith.constant 112 : index
    %c0_106 = arith.constant 0 : index
    %126 = vector.load %arg8[%c112_105, %c0_106] : memref<128x16xf32, #tpu.memory_space<vmem>>, vector<16x16xf32>
    tpu.vector_store %arg8[%c112_105, %c0_106], %125 {strides = array<i32>} : memref<128x16xf32, #tpu.memory_space<vmem>>, vector<16x16xf32>,
    %127 = arith.mulf %124, %16 : vector<16x16xf32>
    %c112_107 = arith.constant 112 : index
    %c0_108 = arith.constant 0 : index
    %128 = vector.load %arg9[%c112_107, %c0_108] : memref<128x16xf32, #tpu.memory_space<vmem>>, vector<16x16xf32>
    tpu.vector_store %arg9[%c112_107, %c0_108], %127 {strides = array<i32>} : memref<128x16xf32, #tpu.memory_space<vmem>>, vector<16x16xf32>,
    return
  }
  func.func @transform_0(%arg0: i32) -> (i32, i32) {
    %c0_i32 = arith.constant 0 : i32
    %c0_i32_0 = arith.constant 0 : i32
    return %arg0, %c0_i32 : i32, i32
  }
  func.func @transform_1(%arg0: i32) -> (i32, i32) {
    %c0_i32 = arith.constant 0 : i32
    %c0_i32_0 = arith.constant 0 : i32
    return %arg0, %c0_i32 : i32, i32
  }
  func.func @transform_2(%arg0: i32) -> (i32, i32) {
    %c0_i32 = arith.constant 0 : i32
    %c0_i32_0 = arith.constant 0 : i32
    %c0_i32_1 = arith.constant 0 : i32
    return %c0_i32, %c0_i32_0 : i32, i32
  }
  func.func @transform_3(%arg0: i32) -> (i32, i32) {
    %c0_i32 = arith.constant 0 : i32
    %c0_i32_0 = arith.constant 0 : i32
    %c0_i32_1 = arith.constant 0 : i32
    return %c0_i32, %c0_i32_0 : i32, i32
  }
  func.func @transform_4(%arg0: i32) -> (i32, i32) {
    %c0_i32 = arith.constant 0 : i32
    %c0_i32_0 = arith.constant 0 : i32
    %c0_i32_1 = arith.constant 0 : i32
    return %c0_i32, %c0_i32_0 : i32, i32
  }
  func.func @transform_5(%arg0: i32) -> (i32, i32) {
    %c0_i32 = arith.constant 0 : i32
    %c0_i32_0 = arith.constant 0 : i32
    %c0_i32_1 = arith.constant 0 : i32
    return %c0_i32, %c0_i32_0 : i32, i32
  }
  func.func @transform_6(%arg0: i32) -> (i32, i32) {
    %c0_i32 = arith.constant 0 : i32
    %c0_i32_0 = arith.constant 0 : i32
    %c0_i32_1 = arith.constant 0 : i32
    return %c0_i32, %c0_i32_0 : i32, i32
  }
  func.func @transform_7(%arg0: i32) -> (i32, i32) {
    %c0_i32 = arith.constant 0 : i32
    %c0_i32_0 = arith.constant 0 : i32
    return %arg0, %c0_i32 : i32, i32
  }
  func.func @transform_8(%arg0: i32) -> (i32, i32) {
    %c0_i32 = arith.constant 0 : i32
    %c0_i32_0 = arith.constant 0 : i32
    return %arg0, %c0_i32 : i32, i32
  }
}

</mosaic_0001>

<bundles_post_ra>
// kernel: custom-call.1
= control target key start
LH: loop header
LB: loop body
LE: loop exit
PB: predicated region body
PF: predicated region fallthrough
CT: control target
= control target key end

     0   :  { %s56_s0 = inlined_call_operand.hbm [shape: c64[2,4,16,16], index: 0, kind: input, shape index: {}]   ;;  %s57_s1 = inlined_call_operand.vmem [shape: f32[2,4,16,16], index: 1, kind: output, shape index: {}]  }
   0x1   :  { %s2_s8 = scalar_lea.hbm %s56_s0, 128 }
   0x2   :  { %3 = vsyncpa [#allocation0], 0  ;;  %s5_s9 = sshll.u32 %s2_s8, 4  ;;  %s7_s12 = sshll.u32 %s57_s1, 4  ;;  %s6_s9 = int_to_ptr.hbm [resolvable:$true] %s5_s9  ;;  %s8_s12 = int_to_ptr.vmem [resolvable:$true] %s7_s12 }
   0x3   :  { %10 = dma.hbm_to_vmem [thread:$0]  %s6_s9, 2048, %s8_s12, [#allocation0] }
   0x4   :  { %38 = dma.done.wait [#allocation0], 2048  }
   0x5   :  { %39 = vsyncadd [#allocation0], 4294965248 }
   0x6   :  { %13 = vsyncpa [#allocation0], 1 }

// kernel: custom-call
= control target key start
LH: loop header
LB: loop body
LE: loop exit
PB: predicated region body
PF: predicated region fallthrough
CT: control target
= control target key end

     0   :  { %2 = vsyncpa [#allocation0], 0  ;;  %s55_s0 = inlined_call_operand.hbm [shape: c64[2,4,16,16], index: 0, kind: input, shape index: {}]   ;;  %s56_s1 = inlined_call_operand.vmem [shape: f32[2,4,16,16], index: 1, kind: output, shape index: {}]  }
   0x1   :  { %s4_s8 = sshll.u32 %s55_s0, 4  ;;  %s6_s11 = sshll.u32 %s56_s1, 4  ;;  %s5_s8 = int_to_ptr.hbm [resolvable:$true] %s4_s8  ;;  %s7_s11 = int_to_ptr.vmem [resolvable:$true] %s6_s11 }
   0x2   :  { %9 = dma.hbm_to_vmem [thread:$0]  %s5_s8, 2048, %s7_s11, [#allocation0] }
   0x3   :  { %37 = dma.done.wait [#allocation0], 2048  }
   0x4   :  { %38 = vsyncadd [#allocation0], 4294965248 }
   0x5   :  { %12 = vsyncpa [#allocation0], 1 }

// kernel: custom-call.2
= control target key start
LH: loop header
LB: loop body
LE: loop exit
PB: predicated region body
PF: predicated region fallthrough
CT: control target
= control target key end

     0   :  { %s105_s0 = inlined_call_operand.vmem [shape: f32[2,4,16,16], index: 0, kind: input, shape index: {}]   ;;  %s106_s1 = inlined_call_operand.vmem [shape: f32[2,4,16,16], index: 1, kind: input, shape index: {}]   ;;  %s107_s2 = inlined_call_operand.hbm [shape: c64[2,4,16,16], index: 2, kind: output, shape index: {}]  }
   0x1   :  { %s3_s11 = scalar_lea.hbm %s107_s2, 128 }
   0x2   :  { %4 = vsyncpa [#allocation0], 0  ;;  %s6_s14 = sshll.u32 %s105_s0, 4  ;;  %s8_s17 = sshll.u32 %s107_s2, 4  ;;  %s7_s14 = int_to_ptr.vmem [resolvable:$true] %s6_s14  ;;  %s9_s17 = int_to_ptr.hbm [resolvable:$true] %s8_s17 }
   0x3   :  { %11 = dma.vmem_to_hbm [thread:$0]  %s7_s14, 2048, %s9_s17, [#allocation0] }
   0x4   :  { %74 = dma.done.wait [#allocation0], 2048  }
   0x5   :  { %75 = vsyncadd [#allocation0], 4294965248 }
   0x6   :  { %14 = vsyncpa [#allocation0], 1 }
   0x7   :  { %15 = vsyncpa [#allocation1], 0  ;;  %s17_s20 = sshll.u32 %s106_s1, 4  ;;  %s19_s21 = sshll.u32 %s3_s11, 4  ;;  %s18_s20 = int_to_ptr.vmem [resolvable:$true] %s17_s20  ;;  %s20_s21 = int_to_ptr.hbm [resolvable:$true] %s19_s21 }
   0x8   :  { %22 = dma.vmem_to_hbm [thread:$0]  %s18_s20, 2048, %s20_s21, [#allocation1] }
   0x9   :  { %76 = dma.done.wait [#allocation1], 2048  }
   0xa   :  { %77 = vsyncadd [#allocation1], 4294965248 }
   0xb   :  { %25 = vsyncpa [#allocation1], 1 }

// kernel: forward_op.1
= control target key start
LH: loop header
LB: loop body
LE: loop exit
PB: predicated region body
PF: predicated region fallthrough
CT: control target
= control target key end

     0   :  { %14 = vsyncpa [#allocation3], 0  ;;  %s1957_s0 = inlined_call_operand.vmem [shape: f32[128,16], index: 0, kind: input, shape index: {}]   ;;  %s1958_s1 = inlined_call_operand.vmem [shape: f32[128,16], index: 1, kind: input, shape index: {}]   ;;  %s1959_s2 = inlined_call_operand.hbm [shape: f32[16,16], index: 2, kind: input, shape index: {}]   ;;  %s1960_s3 = inlined_call_operand.hbm [shape: bf16[16,16], index: 3, kind: input, shape index: {}, may-alias: {3,5}]   ;;  %s1961_s4 = inlined_call_operand.hbm [shape: bf16[16,16], index: 4, kind: input, shape index: {}, may-alias: {4,6}]   ;;  %s1962_s5 = inlined_call_operand.hbm [shape: bf16[16,16], index: 5, kind: input, shape index: {}, may-alias: {3,5}]   ;;  %s1963_s6 = inlined_call_operand.hbm [shape: bf16[16,16], index: 6, kind: input, shape index: {}, may-alias: {4,6}]   ;;  %s1964_s7 = inlined_call_operand.vmem [shape: f32[128,16], index: 7, kind: output, shape index: {0}]   ;;  %s1965_s8 = inlined_call_operand.vmem [shape: f32[128,16], index: 8, kind: output, shape index: {1}]  }
   0x1   :  { %15 = vsyncpa [#allocation5], 0  ;;  %s38_s29 = sshll.u32 %s1960_s3, 4  ;;  %s39_s29 = int_to_ptr.hbm [resolvable:$true] %s38_s29 }
   0x2   :  { %16 = vsyncpa [#allocation8], 0  ;;  %s1292_s30 = smov [#allocation4]   ;;  %s64_s12 = sshll.u32 %s1962_s5, 4  ;;  %s65_s12 = int_to_ptr.hbm [resolvable:$true] %s64_s12 }
   0x3   :  { %s40_s9 = sshll.u32 %s1292_s30, 4  ;;  %s1293_s13 = smov 64   ;;  %s41_s9 = int_to_ptr.vmem [resolvable:$true] %s40_s9 }
   0x4   :  { %s1294_s14 = smov 4   ;;  %s1295_s15 = smov [#allocation7]  }
   0x5   :  { %46 = dma.hbm_to_vmem [thread:$0]  %s39_s29, 128, %s41_s9, [#allocation5], %s1293_s13, %s1293_s13, %s1294_s14  }
   0x6   :  { %s66_s16 = sshll.u32 %s1295_s15, 4  ;;  %s25_s18 = sshll.u32 %s1959_s2, 4  ;;  %s67_s16 = int_to_ptr.vmem [resolvable:$true] %s66_s16  ;;  %s26_s18 = int_to_ptr.hbm [resolvable:$true] %s25_s18 }
   0x7   :  { %72 = dma.hbm_to_vmem [thread:$0]  %s65_s12, 128, %s67_s16, [#allocation8], %s1293_s13, %s1293_s13, %s1294_s14  }
   0x8   :  { %s1296_s5 = smov [#allocation2]   ;;  %s51_s22 = sshll.u32 %s1961_s4, 4  ;;  %s52_s22 = int_to_ptr.hbm [resolvable:$true] %s51_s22 }
   0x9   :  { %s27_s19 = sshll.u32 %s1296_s5, 4  ;;  %s1297_s23 = smov 128   ;;  %s28_s19 = int_to_ptr.vmem [resolvable:$true] %s27_s19 }
   0xa   :  { %s1298_s24 = smov 8   ;;  %s1299_s25 = smov [#allocation6]  }
   0xb   :  { %33 = dma.hbm_to_vmem [thread:$0]  %s26_s18, 256, %s28_s19, [#allocation3], %s1297_s23, %s1297_s23, %s1298_s24  }
   0xc   :  { %s53_s26 = sshll.u32 %s1299_s25, 4  ;;  %s77_s28 = sshll.u32 %s1963_s6, 4  ;;  %s54_s26 = int_to_ptr.vmem [resolvable:$true] %s53_s26  ;;  %s78_s28 = int_to_ptr.hbm [resolvable:$true] %s77_s28 }
   0xd   :  { %59 = dma.hbm_to_vmem [thread:$0]  %s52_s22, 128, %s54_s26, [#allocation5], %s1293_s13, %s1293_s13, %s1294_s14  }
   0xe   :  { %s1300_s29 = smov [#allocation9]  }
   0xf   :  { %s79_s30 = sshll.u32 %s1300_s29, 4  ;;  %s80_s30 = int_to_ptr.vmem [resolvable:$true] %s79_s30 }
  0x10   :  { %85 = dma.hbm_to_vmem [thread:$0]  %s78_s28, 128, %s80_s30, [#allocation8], %s1293_s13, %s1293_s13, %s1294_s14  }
  0x11   :  { %1286 = dma.done.wait [#allocation3], 256  }
  0x12   :  { %1287 = vsyncadd [#allocation3], 4294967040 }
  0x13   :  { %1288 = dma.done.wait [#allocation5], 256  }
  0x14   :  { %1289 = vsyncadd [#allocation5], 4294967040 }
  0x15   :  { %1290 = dma.done.wait [#allocation8], 256  }
  0x16   :  { %1291 = vsyncadd [#allocation8], 4294967040  ;;  %v1153_v0 = vld [vmem:[#allocation7] sm:$0xff]  ;;  %v1154_v1 = vld [vmem:[#allocation9] sm:$0xff]  ;;  %vm169_vm0 = vcmask 130048  }
  0x17   :  { %v115_v2 = vld [vmem:[%s1957_s0] sm:$0xff]  ;;  %v116_v3 = vld [vmem:[%s1957_s0 + $0x8] sm:$0xff]  ;;  %201 = vmatpush.bf16.msra.mxu0 %v1153_v0  ;;  %280 = vmatpush.bf16.msra.mxu1 %v1154_v1  ;;  %v141_v8 = vld [vmem:[%s1958_s1 + $0x10] sm:$0xff] }
  0x18   :  { %v139_v4 = vld [vmem:[%s1958_s1] sm:$0xff]  ;;  %v140_v5 = vld [vmem:[%s1958_s1 + $0x8] sm:$0xff]  ;;  %v131_v6 = vpack.c.bf16 %v116_v3, %v115_v2  ;;  %361 = vmatpush.bf16.msra.mxu2 %v1153_v0  ;;  %410 = vmatpush.bf16.msra.mxu3 %v1154_v1  ;;  %v142_v9 = vld [vmem:[%s1958_s1 + $0x18] sm:$0xff] }
  0x19   :  { %v155_v7 = vpack.c.bf16 %v140_v5, %v139_v4  ;;  %v117_v10 = vld [vmem:[%s1957_s0 + $0x10] sm:$0xff]  ;;  %v118_v11 = vld [vmem:[%s1957_s0 + $0x18] sm:$0xff]  ;;  %v156_v12 = vpack.c.bf16 %v142_v9, %v141_v8  ;;  %v143_v14 = vld [vmem:[%s1958_s1 + $0x20] sm:$0xff] }
  0x1a   :  { %1077 = vmatmul.msk.bf16.vlgmr.msra.gmra.mxu0 %vm169_vm0, %v131_v6  ;;  %v132_v13 = vpack.c.bf16 %v118_v11, %v117_v10  ;;  %v144_v15 = vld [vmem:[%s1958_s1 + $0x28] sm:$0xff]  ;;  %v119_v16 = vld [vmem:[%s1957_s0 + $0x20] sm:$0xff]  ;;  %v145_v20 = vld [vmem:[%s1958_s1 + $0x30] sm:$0xff] }
  0x1b   :  { %1089 = vmatmul.msk.bf16.vlgmr.msra.gmra.mxu1 %vm169_vm0, %v155_v7  ;;  %1097 = vmatmul.msk.bf16.vlgmr.msra.gmra.mxu2 %vm169_vm0, %v155_v7  ;;  %v120_v17 = vld [vmem:[%s1957_s0 + $0x28] sm:$0xff]  ;;  %v157_v18 = vpack.c.bf16 %v144_v15, %v143_v14  ;;  %v146_v21 = vld [vmem:[%s1958_s1 + $0x38] sm:$0xff]  ;;  %v121_v22 = vld [vmem:[%s1957_s0 + $0x30] sm:$0xff] }
  0x1c   :  { %1105 = vmatmul.msk.bf16.vlgmr.msra.gmra.mxu3 %vm169_vm0, %v131_v6  ;;  %v133_v19 = vpack.c.bf16 %v120_v17, %v119_v16  ;;  %v122_v23 = vld [vmem:[%s1957_s0 + $0x38] sm:$0xff]  ;;  %v158_v24 = vpack.c.bf16 %v146_v21, %v145_v20  ;;  %v147_v26 = vld [vmem:[%s1958_s1 + $0x40] sm:$0xff]  ;;  %v148_v27 = vld [vmem:[%s1958_s1 + $0x48] sm:$0xff] }
  0x1d   :  { %v134_v25 = vpack.c.bf16 %v122_v23, %v121_v22  ;;  %v123_v28 = vld [vmem:[%s1957_s0 + $0x40] sm:$0xff]  ;;  %v124_v29 = vld [vmem:[%s1957_s0 + $0x48] sm:$0xff]  ;;  %v159_v30 = vpack.c.bf16 %v148_v27, %v147_v26  ;;  %v149_v32 = vld [vmem:[%s1958_s1 + $0x50] sm:$0xff] }
  0x1e   :  { %v135_v31 = vpack.c.bf16 %v124_v29, %v123_v28  ;;  %v150_v33 = vld [vmem:[%s1958_s1 + $0x58] sm:$0xff]  ;;  %v125_v34 = vld [vmem:[%s1957_s0 + $0x50] sm:$0xff]  ;;  %v151_v38 = vld [vmem:[%s1958_s1 + $0x60] sm:$0xff] }
  0x1f   :  { %v126_v35 = vld [vmem:[%s1957_s0 + $0x58] sm:$0xff]  ;;  %v160_v36 = vpack.c.bf16 %v150_v33, %v149_v32  ;;  %v152_v39 = vld [vmem:[%s1958_s1 + $0x68] sm:$0xff]  ;;  %v127_v40 = vld [vmem:[%s1957_s0 + $0x60] sm:$0xff] }
  0x20   :  { %v136_v37 = vpack.c.bf16 %v126_v35, %v125_v34  ;;  %v128_v41 = vld [vmem:[%s1957_s0 + $0x68] sm:$0xff]  ;;  %v161_v42 = vpack.c.bf16 %v152_v39, %v151_v38  ;;  %v153_v44 = vld [vmem:[%s1958_s1 + $0x70] sm:$0xff]  ;;  %v154_v45 = vld [vmem:[%s1958_s1 + $0x78] sm:$0xff] }
  0x21   :  { %v137_v43 = vpack.c.bf16 %v128_v41, %v127_v40  ;;  %v129_v46 = vld [vmem:[%s1957_s0 + $0x70] sm:$0xff]  ;;  %v130_v47 = vld [vmem:[%s1957_s0 + $0x78] sm:$0xff]  ;;  %v162_v48 = vpack.c.bf16 %v154_v45, %v153_v44 }
  0x22   :  { %v138_v49 = vpack.c.bf16 %v130_v47, %v129_v46  ;;  %v1527_v4 = vld [vmem:[#allocation6] sm:$0xff]  ;;  %v1529_v5 = vld [vmem:[#allocation4] sm:$0xff] }
  0x2a   :  { %1078 = vmatmul.msk.bf16.gmra.mxu0 %vm169_vm0, %v132_v13 }
  0x2b   :  { %1090 = vmatmul.msk.bf16.gmra.mxu1 %vm169_vm0, %v156_v12  ;;  %1098 = vmatmul.msk.bf16.gmra.mxu2 %vm169_vm0, %v156_v12 }
  0x2c   :  { %1106 = vmatmul.msk.bf16.gmra.mxu3 %vm169_vm0, %v132_v13 }
  0x3a   :  { %1079 = vmatmul.msk.bf16.gmra.mxu0 %vm169_vm0, %v133_v19 }
  0x3b   :  { %1091 = vmatmul.msk.bf16.gmra.mxu1 %vm169_vm0, %v157_v18  ;;  %1099 = vmatmul.msk.bf16.gmra.mxu2 %vm169_vm0, %v157_v18 }
  0x3c   :  { %1107 = vmatmul.msk.bf16.gmra.mxu3 %vm169_vm0, %v133_v19 }
  0x4a   :  { %1080 = vmatmul.msk.bf16.gmra.mxu0 %vm169_vm0, %v134_v25 }
  0x4b   :  { %1092 = vmatmul.msk.bf16.gmra.mxu1 %vm169_vm0, %v158_v24  ;;  %1100 = vmatmul.msk.bf16.gmra.mxu2 %vm169_vm0, %v158_v24 }
  0x4c   :  { %1108 = vmatmul.msk.bf16.gmra.mxu3 %vm169_vm0, %v134_v25 }
  0x5a   :  { %1081 = vmatmul.msk.bf16.gmra.mxu0 %vm169_vm0, %v135_v31 }
  0x5b   :  { %1093 = vmatmul.msk.bf16.gmra.mxu1 %vm169_vm0, %v159_v30  ;;  %1101 = vmatmul.msk.bf16.gmra.mxu2 %vm169_vm0, %v159_v30 }
  0x5c   :  { %1109 = vmatmul.msk.bf16.gmra.mxu3 %vm169_vm0, %v135_v31 }
  0x6a   :  { %1082 = vmatmul.msk.bf16.gmra.mxu0 %vm169_vm0, %v136_v37 }
  0x6b   :  { %1094 = vmatmul.msk.bf16.gmra.mxu1 %vm169_vm0, %v160_v36  ;;  %1102 = vmatmul.msk.bf16.gmra.mxu2 %vm169_vm0, %v160_v36 }
  0x6c   :  { %1110 = vmatmul.msk.bf16.gmra.mxu3 %vm169_vm0, %v136_v37 }
  0x7a   :  { %1083 = vmatmul.msk.bf16.gmra.mxu0 %vm169_vm0, %v137_v43 }
  0x7b   :  { %1095 = vmatmul.msk.bf16.gmra.mxu1 %vm169_vm0, %v161_v42  ;;  %1103 = vmatmul.msk.bf16.gmra.mxu2 %vm169_vm0, %v161_v42 }
  0x7c   :  { %1111 = vmatmul.msk.bf16.gmra.mxu3 %vm169_vm0, %v137_v43 }
  0x8a   :  { %1084 = vmatmul.msk.bf16.gmra.mxu0 %vm169_vm0, %v138_v49 }
  0x8b   :  { %1096 = vmatmul.msk.bf16.gmra.mxu1 %vm169_vm0, %v162_v48  ;;  %1104 = vmatmul.msk.bf16.gmra.mxu2 %vm169_vm0, %v162_v48 }
  0x8c   :  { %1112 = vmatmul.msk.bf16.gmra.mxu3 %vm169_vm0, %v138_v49 }
  0x97   :  { %v203_v50 = vpop.f32.mrf.mxu0 }
  0x98   :  { %v282_v51 = vpop.f32.mrf.mxu1 }
  0x99   :  { %v322_v52 = vsub.f32 %v203_v50, %v282_v51 }
  0x9b   :  { %338 = vst.msk [vmem:[%s1964_s7] sm:$0xff] %vm169_vm0, %v322_v52 }
  0x9e   :  { %v363_v53 = vpop.f32.mrf.mxu2 }
  0x9f   :  { %v412_v54 = vpop.f32.mrf.mxu3  ;;  %v205_v56 = vpop.f32.mrf.mxu0 }
  0xa0   :  { %v413_v55 = vadd.f32 %v412_v54, %v363_v53  ;;  %v284_v57 = vpop.f32.mrf.mxu1 }
  0xa1   :  { %v323_v58 = vsub.f32 %v205_v56, %v284_v57 }
  0xa2   :  { %452 = vst.msk [vmem:[%s1965_s8] sm:$0xff] %vm169_vm0, %v413_v55  ;;  %v470_v1 = vld [vmem:[%s1964_s7] sm:$0xff] }
  0xa3   :  { %339 = vst.msk [vmem:[%s1964_s7 + $0x8] sm:$0xff] %vm169_vm0, %v323_v58 }
  0xa6   :  { %v365_v59 = vpop.f32.mrf.mxu2 }
  0xa7   :  { %v414_v60 = vpop.f32.mrf.mxu3  ;;  %v208_v62 = vpop.f32.mrf.mxu0 }
  0xa8   :  { %v415_v61 = vadd.f32 %v414_v60, %v365_v59  ;;  %v287_v63 = vpop.f32.mrf.mxu1 }
  0xa9   :  { %v324_v0 = vsub.f32 %v208_v62, %v287_v63  ;;  %v473_v11 = vld [vmem:[%s1965_s8] sm:$0xff] }
  0xaa   :  { %453 = vst.msk [vmem:[%s1965_s8 + $0x8] sm:$0xff] %vm169_vm0, %v415_v61  ;;  %v471_v2 = vld [vmem:[%s1964_s7 + $0x8] sm:$0xff] }
  0xab   :  { %v472_v3 = vpack.c.bf16 %v471_v2, %v470_v1  ;;  %340 = vst.msk [vmem:[%s1964_s7 + $0x10] sm:$0xff] %vm169_vm0, %v324_v0 }
  0xad   :  { %491 = vmatpush.bf16.msrb.mxu0 %v472_v3  ;;  %529 = vmatpush.bf16.msrb.mxu2 %v472_v3 }
  0xae   :  { %v368_v6 = vpop.f32.mrf.mxu2 }
  0xaf   :  { %v417_v7 = vpop.f32.mrf.mxu3  ;;  %v210_v9 = vpop.f32.mrf.mxu0 }
  0xb0   :  { %v418_v8 = vadd.f32 %v417_v7, %v368_v6  ;;  %v289_v10 = vpop.f32.mrf.mxu1  ;;  %1123 = vmatmul.msk.bf16.vlgmr.msrb.gmra.mxu2 %vm169_vm0, %v1527_v4  ;;  %1117 = vmatmul.msk.bf16.vlgmr.msrb.gmra.mxu0 %vm169_vm0, %v1529_v5 }
  0xb1   :  { %v474_v12 = vld [vmem:[%s1965_s8 + $0x8] sm:$0xff]  ;;  %v325_v13 = vsub.f32 %v210_v9, %v289_v10 }
  0xb2   :  { %v475_v14 = vpack.c.bf16 %v474_v12, %v473_v11  ;;  %454 = vst.msk [vmem:[%s1965_s8 + $0x10] sm:$0xff] %vm169_vm0, %v418_v8  ;;  %v558_v21 = vld [vmem:[%s1964_s7 + $0x10] sm:$0xff] }
  0xb3   :  { %341 = vst.msk [vmem:[%s1964_s7 + $0x18] sm:$0xff] %vm169_vm0, %v325_v13 }
  0xb4   :  { %513 = vmatpush.bf16.msrb.mxu1 %v475_v14  ;;  %543 = vmatpush.bf16.msrb.mxu3 %v475_v14 }
  0xb6   :  { %v370_v15 = vpop.f32.mrf.mxu2 }
  0xb7   :  { %v419_v16 = vpop.f32.mrf.mxu3  ;;  %1124 = vmatmul.msk.bf16.vlgmr.msrb.gmra.mxu3 %vm169_vm0, %v1529_v5  ;;  %1122 = vmatmul.msk.bf16.vlgmr.msrb.gmra.mxu1 %vm169_vm0, %v1527_v4  ;;  %v213_v18 = vpop.f32.mrf.mxu0 }
  0xb8   :  { %v420_v17 = vadd.f32 %v419_v16, %v370_v15  ;;  %v292_v19 = vpop.f32.mrf.mxu1 }
  0xb9   :  { %v326_v20 = vsub.f32 %v213_v18, %v292_v19  ;;  %v561_v29 = vld [vmem:[%s1965_s8 + $0x10] sm:$0xff] }
  0xba   :  { %455 = vst.msk [vmem:[%s1965_s8 + $0x18] sm:$0xff] %vm169_vm0, %v420_v17  ;;  %v559_v22 = vld [vmem:[%s1964_s7 + $0x18] sm:$0xff] }
  0xbb   :  { %342 = vst.msk [vmem:[%s1964_s7 + $0x20] sm:$0xff] %vm169_vm0, %v326_v20  ;;  %v560_v23 = vpack.c.bf16 %v559_v22, %v558_v21 }
  0xbd   :  { %571 = vmatpush.bf16.msra.mxu0 %v560_v23  ;;  %601 = vmatpush.bf16.msra.mxu2 %v560_v23 }
  0xbe   :  { %v373_v24 = vpop.f32.mrf.mxu2 }
  0xbf   :  { %v422_v25 = vpop.f32.mrf.mxu3  ;;  %v215_v27 = vpop.f32.mrf.mxu0 }
  0xc0   :  { %v423_v26 = vadd.f32 %v422_v25, %v373_v24  ;;  %v294_v28 = vpop.f32.mrf.mxu1  ;;  %1127 = vmatmul.msk.bf16.vlgmr.msra.gmra.mxu2 %vm169_vm0, %v1527_v4  ;;  %1125 = vmatmul.msk.bf16.vlgmr.msra.gmra.mxu0 %vm169_vm0, %v1529_v5 }
  0xc1   :  { %v562_v30 = vld [vmem:[%s1965_s8 + $0x18] sm:$0xff]  ;;  %v327_v31 = vsub.f32 %v215_v27, %v294_v28 }
  0xc2   :  { %456 = vst.msk [vmem:[%s1965_s8 + $0x20] sm:$0xff] %vm169_vm0, %v423_v26  ;;  %v563_v32 = vpack.c.bf16 %v562_v30, %v561_v29  ;;  %v630_v39 = vld [vmem:[%s1964_s7 + $0x20] sm:$0xff] }
  0xc3   :  { %343 = vst.msk [vmem:[%s1964_s7 + $0x28] sm:$0xff] %vm169_vm0, %v327_v31 }
  0xc4   :  { %585 = vmatpush.bf16.msra.mxu1 %v563_v32  ;;  %615 = vmatpush.bf16.msra.mxu3 %v563_v32 }
  0xc6   :  { %v375_v33 = vpop.f32.mrf.mxu2 }
  0xc7   :  { %v424_v34 = vpop.f32.mrf.mxu3  ;;  %1128 = vmatmul.msk.bf16.vlgmr.msra.gmra.mxu3 %vm169_vm0, %v1529_v5  ;;  %1126 = vmatmul.msk.bf16.vlgmr.msra.gmra.mxu1 %vm169_vm0, %v1527_v4  ;;  %v218_v36 = vpop.f32.mrf.mxu0 }
  0xc8   :  { %v425_v35 = vadd.f32 %v424_v34, %v375_v33  ;;  %v297_v37 = vpop.f32.mrf.mxu1 }
  0xc9   :  { %v328_v38 = vsub.f32 %v218_v36, %v297_v37  ;;  %v633_v47 = vld [vmem:[%s1965_s8 + $0x20] sm:$0xff] }
  0xca   :  { %457 = vst.msk [vmem:[%s1965_s8 + $0x28] sm:$0xff] %vm169_vm0, %v425_v35  ;;  %v631_v40 = vld [vmem:[%s1964_s7 + $0x28] sm:$0xff] }
  0xcb   :  { %344 = vst.msk [vmem:[%s1964_s7 + $0x30] sm:$0xff] %vm169_vm0, %v328_v38  ;;  %v632_v41 = vpack.c.bf16 %v631_v40, %v630_v39 }
  0xcd   :  { %643 = vmatpush.bf16.msrb.mxu0 %v632_v41  ;;  %673 = vmatpush.bf16.msrb.mxu2 %v632_v41 }
  0xce   :  { %v378_v42 = vpop.f32.mrf.mxu2 }
  0xcf   :  { %v427_v43 = vpop.f32.mrf.mxu3  ;;  %v220_v45 = vpop.f32.mrf.mxu0 }
  0xd0   :  { %v428_v44 = vadd.f32 %v427_v43, %v378_v42  ;;  %v299_v46 = vpop.f32.mrf.mxu1  ;;  %1131 = vmatmul.msk.bf16.vlgmr.msrb.gmra.mxu2 %vm169_vm0, %v1527_v4  ;;  %1129 = vmatmul.msk.bf16.vlgmr.msrb.gmra.mxu0 %vm169_vm0, %v1529_v5 }
  0xd1   :  { %v634_v48 = vld [vmem:[%s1965_s8 + $0x28] sm:$0xff]  ;;  %v329_v49 = vsub.f32 %v220_v45, %v299_v46 }
  0xd2   :  { %458 = vst.msk [vmem:[%s1965_s8 + $0x30] sm:$0xff] %vm169_vm0, %v428_v44  ;;  %v635_v50 = vpack.c.bf16 %v634_v48, %v633_v47  ;;  %v702_v57 = vld [vmem:[%s1964_s7 + $0x30] sm:$0xff] }
  0xd3   :  { %345 = vst.msk [vmem:[%s1964_s7 + $0x38] sm:$0xff] %vm169_vm0, %v329_v49 }
  0xd4   :  { %657 = vmatpush.bf16.msrb.mxu1 %v635_v50  ;;  %687 = vmatpush.bf16.msrb.mxu3 %v635_v50 }
  0xd6   :  { %v380_v51 = vpop.f32.mrf.mxu2 }
  0xd7   :  { %v429_v52 = vpop.f32.mrf.mxu3  ;;  %1132 = vmatmul.msk.bf16.vlgmr.msrb.gmra.mxu3 %vm169_vm0, %v1529_v5  ;;  %1130 = vmatmul.msk.bf16.vlgmr.msrb.gmra.mxu1 %vm169_vm0, %v1527_v4  ;;  %v223_v54 = vpop.f32.mrf.mxu0 }
  0xd8   :  { %v430_v53 = vadd.f32 %v429_v52, %v380_v51  ;;  %v302_v55 = vpop.f32.mrf.mxu1 }
  0xd9   :  { %v330_v56 = vsub.f32 %v223_v54, %v302_v55  ;;  %v705_v1 = vld [vmem:[%s1965_s8 + $0x30] sm:$0xff] }
  0xda   :  { %459 = vst.msk [vmem:[%s1965_s8 + $0x38] sm:$0xff] %vm169_vm0, %v430_v53  ;;  %v703_v58 = vld [vmem:[%s1964_s7 + $0x38] sm:$0xff] }
  0xdb   :  { %346 = vst.msk [vmem:[%s1964_s7 + $0x40] sm:$0xff] %vm169_vm0, %v330_v56  ;;  %v704_v59 = vpack.c.bf16 %v703_v58, %v702_v57 }
  0xdd   :  { %715 = vmatpush.bf16.msra.mxu0 %v704_v59  ;;  %745 = vmatpush.bf16.msra.mxu2 %v704_v59 }
  0xde   :  { %v383_v60 = vpop.f32.mrf.mxu2 }
  0xdf   :  { %v432_v61 = vpop.f32.mrf.mxu3  ;;  %v225_v63 = vpop.f32.mrf.mxu0 }
  0xe0   :  { %v433_v62 = vadd.f32 %v432_v61, %v383_v60  ;;  %v304_v0 = vpop.f32.mrf.mxu1  ;;  %1135 = vmatmul.msk.bf16.vlgmr.msra.gmra.mxu2 %vm169_vm0, %v1527_v4  ;;  %1133 = vmatmul.msk.bf16.vlgmr.msra.gmra.mxu0 %vm169_vm0, %v1529_v5 }
  0xe1   :  { %v706_v2 = vld [vmem:[%s1965_s8 + $0x38] sm:$0xff]  ;;  %v331_v3 = vsub.f32 %v225_v63, %v304_v0 }
  0xe2   :  { %460 = vst.msk [vmem:[%s1965_s8 + $0x40] sm:$0xff] %vm169_vm0, %v433_v62  ;;  %v707_v6 = vpack.c.bf16 %v706_v2, %v705_v1  ;;  %v774_v13 = vld [vmem:[%s1964_s7 + $0x40] sm:$0xff] }
  0xe3   :  { %347 = vst.msk [vmem:[%s1964_s7 + $0x48] sm:$0xff] %vm169_vm0, %v331_v3 }
  0xe4   :  { %729 = vmatpush.bf16.msra.mxu1 %v707_v6  ;;  %759 = vmatpush.bf16.msra.mxu3 %v707_v6 }
  0xe6   :  { %v385_v7 = vpop.f32.mrf.mxu2 }
  0xe7   :  { %v434_v8 = vpop.f32.mrf.mxu3  ;;  %1136 = vmatmul.msk.bf16.vlgmr.msra.gmra.mxu3 %vm169_vm0, %v1529_v5  ;;  %1134 = vmatmul.msk.bf16.vlgmr.msra.gmra.mxu1 %vm169_vm0, %v1527_v4  ;;  %v228_v10 = vpop.f32.mrf.mxu0 }
  0xe8   :  { %v435_v9 = vadd.f32 %v434_v8, %v385_v7  ;;  %v307_v11 = vpop.f32.mrf.mxu1 }
  0xe9   :  { %v332_v12 = vsub.f32 %v228_v10, %v307_v11  ;;  %v777_v21 = vld [vmem:[%s1965_s8 + $0x40] sm:$0xff] }
  0xea   :  { %461 = vst.msk [vmem:[%s1965_s8 + $0x48] sm:$0xff] %vm169_vm0, %v435_v9  ;;  %v775_v14 = vld [vmem:[%s1964_s7 + $0x48] sm:$0xff]  ;;  %v1793_v10 = vld [vmem:[#allocation2] sm:$0xff] }
  0xeb   :  { %348 = vst.msk [vmem:[%s1964_s7 + $0x50] sm:$0xff] %vm169_vm0, %v332_v12  ;;  %v776_v15 = vpack.c.bf16 %v775_v14, %v774_v13 }
  0xed   :  { %787 = vmatpush.bf16.msrb.mxu0 %v776_v15  ;;  %817 = vmatpush.bf16.msrb.mxu2 %v776_v15 }
  0xee   :  { %v388_v16 = vpop.f32.mrf.mxu2 }
  0xef   :  { %v437_v17 = vpop.f32.mrf.mxu3  ;;  %v230_v19 = vpop.f32.mrf.mxu0 }
  0xf0   :  { %v438_v18 = vadd.f32 %v437_v17, %v388_v16  ;;  %v309_v20 = vpop.f32.mrf.mxu1  ;;  %1139 = vmatmul.msk.bf16.vlgmr.msrb.gmra.mxu2 %vm169_vm0, %v1527_v4  ;;  %1137 = vmatmul.msk.bf16.vlgmr.msrb.gmra.mxu0 %vm169_vm0, %v1529_v5  ;;  %v1800_v17 = vld [vmem:[#allocation2 + $0x8] sm:$0xff] }
  0xf1   :  { %v778_v22 = vld [vmem:[%s1965_s8 + $0x48] sm:$0xff]  ;;  %v333_v23 = vsub.f32 %v230_v19, %v309_v20 }
  0xf2   :  { %462 = vst.msk [vmem:[%s1965_s8 + $0x50] sm:$0xff] %vm169_vm0, %v438_v18  ;;  %v779_v24 = vpack.c.bf16 %v778_v22, %v777_v21  ;;  %v846_v31 = vld [vmem:[%s1964_s7 + $0x50] sm:$0xff] }
  0xf3   :  { %349 = vst.msk [vmem:[%s1964_s7 + $0x58] sm:$0xff] %vm169_vm0, %v333_v23 }
  0xf4   :  { %801 = vmatpush.bf16.msrb.mxu1 %v779_v24  ;;  %831 = vmatpush.bf16.msrb.mxu3 %v779_v24 }
  0xf6   :  { %v390_v25 = vpop.f32.mrf.mxu2 }
  0xf7   :  { %v439_v26 = vpop.f32.mrf.mxu3  ;;  %1140 = vmatmul.msk.bf16.vlgmr.msrb.gmra.mxu3 %vm169_vm0, %v1529_v5  ;;  %1138 = vmatmul.msk.bf16.vlgmr.msrb.gmra.mxu1 %vm169_vm0, %v1527_v4  ;;  %v233_v28 = vpop.f32.mrf.mxu0 }
  0xf8   :  { %v440_v27 = vadd.f32 %v439_v26, %v390_v25  ;;  %v312_v29 = vpop.f32.mrf.mxu1 }
  0xf9   :  { %v334_v30 = vsub.f32 %v233_v28, %v312_v29  ;;  %v849_v39 = vld [vmem:[%s1965_s8 + $0x50] sm:$0xff] }
  0xfa   :  { %463 = vst.msk [vmem:[%s1965_s8 + $0x58] sm:$0xff] %vm169_vm0, %v440_v27  ;;  %v847_v32 = vld [vmem:[%s1964_s7 + $0x58] sm:$0xff] }
  0xfb   :  { %350 = vst.msk [vmem:[%s1964_s7 + $0x60] sm:$0xff] %vm169_vm0, %v334_v30  ;;  %v848_v33 = vpack.c.bf16 %v847_v32, %v846_v31 }
  0xfd   :  { %859 = vmatpush.bf16.msra.mxu0 %v848_v33  ;;  %889 = vmatpush.bf16.msra.mxu2 %v848_v33 }
  0xfe   :  { %v393_v34 = vpop.f32.mrf.mxu2 }
  0xff   :  { %v442_v35 = vpop.f32.mrf.mxu3  ;;  %v235_v37 = vpop.f32.mrf.mxu0 }
 0x100   :  { %v443_v36 = vadd.f32 %v442_v35, %v393_v34  ;;  %v314_v38 = vpop.f32.mrf.mxu1  ;;  %1143 = vmatmul.msk.bf16.vlgmr.msra.gmra.mxu2 %vm169_vm0, %v1527_v4  ;;  %1141 = vmatmul.msk.bf16.vlgmr.msra.gmra.mxu0 %vm169_vm0, %v1529_v5 }
 0x101   :  { %v850_v40 = vld [vmem:[%s1965_s8 + $0x58] sm:$0xff]  ;;  %v335_v41 = vsub.f32 %v235_v37, %v314_v38 }
 0x102   :  { %464 = vst.msk [vmem:[%s1965_s8 + $0x60] sm:$0xff] %vm169_vm0, %v443_v36  ;;  %v851_v42 = vpack.c.bf16 %v850_v40, %v849_v39  ;;  %v918_v49 = vld [vmem:[%s1964_s7 + $0x60] sm:$0xff] }
 0x103   :  { %351 = vst.msk [vmem:[%s1964_s7 + $0x68] sm:$0xff] %vm169_vm0, %v335_v41 }
 0x104   :  { %873 = vmatpush.bf16.msra.mxu1 %v851_v42  ;;  %903 = vmatpush.bf16.msra.mxu3 %v851_v42 }
 0x106   :  { %v395_v43 = vpop.f32.mrf.mxu2 }
 0x107   :  { %v444_v44 = vpop.f32.mrf.mxu3  ;;  %1144 = vmatmul.msk.bf16.vlgmr.msra.gmra.mxu3 %vm169_vm0, %v1529_v5  ;;  %1142 = vmatmul.msk.bf16.vlgmr.msra.gmra.mxu1 %vm169_vm0, %v1527_v4  ;;  %v238_v46 = vpop.f32.mrf.mxu0 }
 0x108   :  { %v445_v45 = vadd.f32 %v444_v44, %v395_v43  ;;  %v317_v47 = vpop.f32.mrf.mxu1 }
 0x109   :  { %v336_v48 = vsub.f32 %v238_v46, %v317_v47  ;;  %v921_v57 = vld [vmem:[%s1965_s8 + $0x60] sm:$0xff] }
 0x10a   :  { %465 = vst.msk [vmem:[%s1965_s8 + $0x68] sm:$0xff] %vm169_vm0, %v445_v45  ;;  %v919_v50 = vld [vmem:[%s1964_s7 + $0x68] sm:$0xff] }
 0x10b   :  { %352 = vst.msk [vmem:[%s1964_s7 + $0x70] sm:$0xff] %vm169_vm0, %v336_v48  ;;  %v920_v51 = vpack.c.bf16 %v919_v50, %v918_v49 }
 0x10d   :  { %931 = vmatpush.bf16.msrb.mxu0 %v920_v51  ;;  %961 = vmatpush.bf16.msrb.mxu2 %v920_v51 }
 0x10e   :  { %v398_v52 = vpop.f32.mrf.mxu2 }
 0x10f   :  { %v447_v53 = vpop.f32.mrf.mxu3  ;;  %v240_v55 = vpop.f32.mrf.mxu0 }
 0x110   :  { %v448_v54 = vadd.f32 %v447_v53, %v398_v52  ;;  %v319_v56 = vpop.f32.mrf.mxu1  ;;  %1147 = vmatmul.msk.bf16.vlgmr.msrb.gmra.mxu2 %vm169_vm0, %v1527_v4  ;;  %1145 = vmatmul.msk.bf16.vlgmr.msrb.gmra.mxu0 %vm169_vm0, %v1529_v5 }
 0x111   :  { %v922_v58 = vld [vmem:[%s1965_s8 + $0x68] sm:$0xff]  ;;  %v337_v59 = vsub.f32 %v240_v55, %v319_v56 }
 0x112   :  { %466 = vst.msk [vmem:[%s1965_s8 + $0x70] sm:$0xff] %vm169_vm0, %v448_v54  ;;  %v923_v60 = vpack.c.bf16 %v922_v58, %v921_v57  ;;  %v990_v0 = vld [vmem:[%s1964_s7 + $0x70] sm:$0xff] }
 0x113   :  { %353 = vst.msk [vmem:[%s1964_s7 + $0x78] sm:$0xff] %vm169_vm0, %v337_v59 }
 0x114   :  { %945 = vmatpush.bf16.msrb.mxu1 %v923_v60  ;;  %975 = vmatpush.bf16.msrb.mxu3 %v923_v60 }
 0x116   :  { %v400_v61 = vpop.f32.mrf.mxu2 }
 0x117   :  { %v449_v62 = vpop.f32.mrf.mxu3  ;;  %1148 = vmatmul.msk.bf16.vlgmr.msrb.gmra.mxu3 %vm169_vm0, %v1529_v5  ;;  %1146 = vmatmul.msk.bf16.vlgmr.msrb.gmra.mxu1 %vm169_vm0, %v1527_v4 }
 0x118   :  { %v450_v63 = vadd.f32 %v449_v62, %v400_v61 }
 0x119   :  { %v993_v3 = vld [vmem:[%s1965_s8 + $0x70] sm:$0xff] }
 0x11a   :  { %467 = vst.msk [vmem:[%s1965_s8 + $0x78] sm:$0xff] %vm169_vm0, %v450_v63  ;;  %v991_v1 = vld [vmem:[%s1964_s7 + $0x78] sm:$0xff] }
 0x11b   :  { %v992_v2 = vpack.c.bf16 %v991_v1, %v990_v0 }
 0x11d   :  { %1003 = vmatpush.bf16.msra.mxu0 %v992_v2  ;;  %1033 = vmatpush.bf16.msra.mxu2 %v992_v2 }
 0x120   :  { %1151 = vmatmul.msk.bf16.vlgmr.msra.gmra.mxu2 %vm169_vm0, %v1527_v4  ;;  %1149 = vmatmul.msk.bf16.vlgmr.msra.gmra.mxu0 %vm169_vm0, %v1529_v5 }
 0x121   :  { %v994_v6 = vld [vmem:[%s1965_s8 + $0x78] sm:$0xff] }
 0x122   :  { %v995_v7 = vpack.c.bf16 %v994_v6, %v993_v3 }
 0x124   :  { %1017 = vmatpush.bf16.msra.mxu1 %v995_v7  ;;  %1047 = vmatpush.bf16.msra.mxu3 %v995_v7 }
 0x127   :  { %1152 = vmatmul.msk.bf16.vlgmr.msra.gmra.mxu3 %vm169_vm0, %v1529_v5  ;;  %1150 = vmatmul.msk.bf16.vlgmr.msra.gmra.mxu1 %vm169_vm0, %v1527_v4 }
 0x12d   :  { %v493_v8 = vpop.f32.mrf.mxu0 }
 0x133   :  { %v531_v9 = vpop.f32.mrf.mxu2 }
 0x134   :  { %v515_v11 = vpop.f32.mrf.mxu1 }
 0x135   :  { %v520_v12 = vsub.f32 %v493_v8, %v515_v11  ;;  %v495_v13 = vpop.f32.mrf.mxu0 }
 0x137   :  { %v550_v14 = vmul.f32 %v520_v12, %v1793_v10 }
 0x139   :  { %552 = vst.msk [vmem:[%s1964_s7] sm:$0xff] %vm169_vm0, %v550_v14 }
 0x13a   :  { %v545_v15 = vpop.f32.mrf.mxu3 }
 0x13b   :  { %v546_v16 = vadd.f32 %v545_v15, %v531_v9  ;;  %v533_v5 = vpop.f32.mrf.mxu2 }
 0x13c   :  { %v517_v4 = vpop.f32.mrf.mxu1 }
 0x13d   :  { %v554_v18 = vmul.f32 %v546_v16, %v1793_v10  ;;  %v521_v19 = vsub.f32 %v495_v13, %v517_v4  ;;  %v573_v20 = vpop.f32.mrf.mxu0 }
 0x13f   :  { %556 = vst.msk [vmem:[%s1965_s8] sm:$0xff] %vm169_vm0, %v554_v18  ;;  %v551_v21 = vmul.f32 %v521_v19, %v1800_v17 }
 0x141   :  { %553 = vst.msk [vmem:[%s1964_s7 + $0x8] sm:$0xff] %vm169_vm0, %v551_v21 }
 0x142   :  { %v547_v22 = vpop.f32.mrf.mxu3 }
 0x143   :  { %v548_v23 = vadd.f32 %v547_v22, %v533_v5  ;;  %v603_v24 = vpop.f32.mrf.mxu2 }
 0x144   :  { %v587_v25 = vpop.f32.mrf.mxu1 }
 0x145   :  { %v555_v26 = vmul.f32 %v548_v23, %v1800_v17  ;;  %v592_v27 = vsub.f32 %v573_v20, %v587_v25  ;;  %v575_v28 = vpop.f32.mrf.mxu0 }
 0x147   :  { %557 = vst.msk [vmem:[%s1965_s8 + $0x8] sm:$0xff] %vm169_vm0, %v555_v26  ;;  %v622_v29 = vmul.f32 %v592_v27, %v1793_v10 }
 0x149   :  { %624 = vst.msk [vmem:[%s1964_s7 + $0x10] sm:$0xff] %vm169_vm0, %v622_v29 }
 0x14a   :  { %v617_v30 = vpop.f32.mrf.mxu3 }
 0x14b   :  { %v618_v31 = vadd.f32 %v617_v30, %v603_v24  ;;  %v605_v32 = vpop.f32.mrf.mxu2 }
 0x14c   :  { %v589_v33 = vpop.f32.mrf.mxu1 }
 0x14d   :  { %v626_v34 = vmul.f32 %v618_v31, %v1793_v10  ;;  %v593_v35 = vsub.f32 %v575_v28, %v589_v33  ;;  %v645_v36 = vpop.f32.mrf.mxu0 }
 0x14f   :  { %628 = vst.msk [vmem:[%s1965_s8 + $0x10] sm:$0xff] %vm169_vm0, %v626_v34  ;;  %v623_v37 = vmul.f32 %v593_v35, %v1800_v17 }
 0x151   :  { %625 = vst.msk [vmem:[%s1964_s7 + $0x18] sm:$0xff] %vm169_vm0, %v623_v37 }
 0x152   :  { %v619_v38 = vpop.f32.mrf.mxu3 }
 0x153   :  { %v620_v39 = vadd.f32 %v619_v38, %v605_v32  ;;  %v675_v40 = vpop.f32.mrf.mxu2 }
 0x154   :  { %v659_v41 = vpop.f32.mrf.mxu1 }
 0x155   :  { %v627_v42 = vmul.f32 %v620_v39, %v1800_v17  ;;  %v664_v43 = vsub.f32 %v645_v36, %v659_v41  ;;  %v647_v44 = vpop.f32.mrf.mxu0 }
 0x157   :  { %629 = vst.msk [vmem:[%s1965_s8 + $0x18] sm:$0xff] %vm169_vm0, %v627_v42  ;;  %v694_v45 = vmul.f32 %v664_v43, %v1793_v10 }
 0x159   :  { %696 = vst.msk [vmem:[%s1964_s7 + $0x20] sm:$0xff] %vm169_vm0, %v694_v45 }
 0x15a   :  { %v689_v46 = vpop.f32.mrf.mxu3 }
 0x15b   :  { %v690_v47 = vadd.f32 %v689_v46, %v675_v40  ;;  %v677_v48 = vpop.f32.mrf.mxu2 }
 0x15c   :  { %v661_v49 = vpop.f32.mrf.mxu1 }
 0x15d   :  { %v698_v50 = vmul.f32 %v690_v47, %v1793_v10  ;;  %v665_v51 = vsub.f32 %v647_v44, %v661_v49  ;;  %v717_v52 = vpop.f32.mrf.mxu0 }
 0x15f   :  { %700 = vst.msk [vmem:[%s1965_s8 + $0x20] sm:$0xff] %vm169_vm0, %v698_v50  ;;  %v695_v53 = vmul.f32 %v665_v51, %v1800_v17 }
 0x161   :  { %697 = vst.msk [vmem:[%s1964_s7 + $0x28] sm:$0xff] %vm169_vm0, %v695_v53 }
 0x162   :  { %v691_v54 = vpop.f32.mrf.mxu3 }
 0x163   :  { %v692_v55 = vadd.f32 %v691_v54, %v677_v48  ;;  %v747_v56 = vpop.f32.mrf.mxu2 }
 0x164   :  { %v731_v57 = vpop.f32.mrf.mxu1 }
 0x165   :  { %v699_v58 = vmul.f32 %v692_v55, %v1800_v17  ;;  %v736_v59 = vsub.f32 %v717_v52, %v731_v57  ;;  %v719_v60 = vpop.f32.mrf.mxu0 }
 0x167   :  { %701 = vst.msk [vmem:[%s1965_s8 + $0x28] sm:$0xff] %vm169_vm0, %v699_v58  ;;  %v766_v61 = vmul.f32 %v736_v59, %v1793_v10 }
 0x169   :  { %768 = vst.msk [vmem:[%s1964_s7 + $0x30] sm:$0xff] %vm169_vm0, %v766_v61 }
 0x16a   :  { %v761_v62 = vpop.f32.mrf.mxu3 }
 0x16b   :  { %v762_v63 = vadd.f32 %v761_v62, %v747_v56  ;;  %v749_v0 = vpop.f32.mrf.mxu2 }
 0x16c   :  { %v733_v1 = vpop.f32.mrf.mxu1 }
 0x16d   :  { %v770_v2 = vmul.f32 %v762_v63, %v1793_v10  ;;  %v737_v3 = vsub.f32 %v719_v60, %v733_v1  ;;  %v789_v6 = vpop.f32.mrf.mxu0 }
 0x16f   :  { %772 = vst.msk [vmem:[%s1965_s8 + $0x30] sm:$0xff] %vm169_vm0, %v770_v2  ;;  %v767_v7 = vmul.f32 %v737_v3, %v1800_v17 }
 0x171   :  { %769 = vst.msk [vmem:[%s1964_s7 + $0x38] sm:$0xff] %vm169_vm0, %v767_v7 }
 0x172   :  { %v763_v8 = vpop.f32.mrf.mxu3 }
 0x173   :  { %v764_v9 = vadd.f32 %v763_v8, %v749_v0  ;;  %v819_v11 = vpop.f32.mrf.mxu2 }
 0x174   :  { %v803_v12 = vpop.f32.mrf.mxu1 }
 0x175   :  { %v771_v13 = vmul.f32 %v764_v9, %v1800_v17  ;;  %v808_v14 = vsub.f32 %v789_v6, %v803_v12  ;;  %v791_v15 = vpop.f32.mrf.mxu0 }
 0x177   :  { %773 = vst.msk [vmem:[%s1965_s8 + $0x38] sm:$0xff] %vm169_vm0, %v771_v13  ;;  %v838_v16 = vmul.f32 %v808_v14, %v1793_v10 }
 0x179   :  { %840 = vst.msk [vmem:[%s1964_s7 + $0x40] sm:$0xff] %vm169_vm0, %v838_v16 }
 0x17a   :  { %v833_v5 = vpop.f32.mrf.mxu3 }
 0x17b   :  { %v834_v4 = vadd.f32 %v833_v5, %v819_v11  ;;  %v821_v18 = vpop.f32.mrf.mxu2 }
 0x17c   :  { %v805_v19 = vpop.f32.mrf.mxu1 }
 0x17d   :  { %v842_v20 = vmul.f32 %v834_v4, %v1793_v10  ;;  %v809_v21 = vsub.f32 %v791_v15, %v805_v19  ;;  %v861_v22 = vpop.f32.mrf.mxu0 }
 0x17f   :  { %844 = vst.msk [vmem:[%s1965_s8 + $0x40] sm:$0xff] %vm169_vm0, %v842_v20  ;;  %v839_v23 = vmul.f32 %v809_v21, %v1800_v17 }
 0x181   :  { %841 = vst.msk [vmem:[%s1964_s7 + $0x48] sm:$0xff] %vm169_vm0, %v839_v23 }
 0x182   :  { %v835_v24 = vpop.f32.mrf.mxu3 }
 0x183   :  { %v836_v25 = vadd.f32 %v835_v24, %v821_v18  ;;  %v891_v26 = vpop.f32.mrf.mxu2 }
 0x184   :  { %v875_v27 = vpop.f32.mrf.mxu1 }
 0x185   :  { %v843_v28 = vmul.f32 %v836_v25, %v1800_v17  ;;  %v880_v29 = vsub.f32 %v861_v22, %v875_v27  ;;  %v863_v30 = vpop.f32.mrf.mxu0 }
 0x187   :  { %845 = vst.msk [vmem:[%s1965_s8 + $0x48] sm:$0xff] %vm169_vm0, %v843_v28  ;;  %v910_v31 = vmul.f32 %v880_v29, %v1793_v10 }
 0x189   :  { %912 = vst.msk [vmem:[%s1964_s7 + $0x50] sm:$0xff] %vm169_vm0, %v910_v31 }
 0x18a   :  { %v905_v32 = vpop.f32.mrf.mxu3 }
 0x18b   :  { %v906_v33 = vadd.f32 %v905_v32, %v891_v26  ;;  %v893_v34 = vpop.f32.mrf.mxu2 }
 0x18c   :  { %v877_v35 = vpop.f32.mrf.mxu1 }
 0x18d   :  { %v914_v36 = vmul.f32 %v906_v33, %v1793_v10  ;;  %v881_v37 = vsub.f32 %v863_v30, %v877_v35  ;;  %v933_v38 = vpop.f32.mrf.mxu0 }
 0x18f   :  { %916 = vst.msk [vmem:[%s1965_s8 + $0x50] sm:$0xff] %vm169_vm0, %v914_v36  ;;  %v911_v39 = vmul.f32 %v881_v37, %v1800_v17 }
 0x191   :  { %913 = vst.msk [vmem:[%s1964_s7 + $0x58] sm:$0xff] %vm169_vm0, %v911_v39 }
 0x192   :  { %v907_v40 = vpop.f32.mrf.mxu3 }
 0x193   :  { %v908_v41 = vadd.f32 %v907_v40, %v893_v34  ;;  %v963_v43 = vpop.f32.mrf.mxu2 }
 0x194   :  { %v947_v42 = vpop.f32.mrf.mxu1 }
 0x195   :  { %v915_v44 = vmul.f32 %v908_v41, %v1800_v17  ;;  %v952_v45 = vsub.f32 %v933_v38, %v947_v42  ;;  %v935_v47 = vpop.f32.mrf.mxu0 }
 0x197   :  { %917 = vst.msk [vmem:[%s1965_s8 + $0x58] sm:$0xff] %vm169_vm0, %v915_v44  ;;  %v982_v46 = vmul.f32 %v952_v45, %v1793_v10 }
 0x199   :  { %984 = vst.msk [vmem:[%s1964_s7 + $0x60] sm:$0xff] %vm169_vm0, %v982_v46 }
 0x19a   :  { %v977_v48 = vpop.f32.mrf.mxu3 }
 0x19b   :  { %v978_v49 = vadd.f32 %v977_v48, %v963_v43  ;;  %v965_v53 = vpop.f32.mrf.mxu2 }
 0x19c   :  { %v949_v50 = vpop.f32.mrf.mxu1 }
 0x19d   :  { %v986_v51 = vmul.f32 %v978_v49, %v1793_v10  ;;  %v953_v52 = vsub.f32 %v935_v47, %v949_v50  ;;  %v1005_v56 = vpop.f32.mrf.mxu0 }
 0x19f   :  { %988 = vst.msk [vmem:[%s1965_s8 + $0x60] sm:$0xff] %vm169_vm0, %v986_v51  ;;  %v983_v54 = vmul.f32 %v953_v52, %v1800_v17 }
 0x1a1   :  { %985 = vst.msk [vmem:[%s1964_s7 + $0x68] sm:$0xff] %vm169_vm0, %v983_v54 }
 0x1a2   :  { %v979_v55 = vpop.f32.mrf.mxu3 }
 0x1a3   :  { %v980_v57 = vadd.f32 %v979_v55, %v965_v53  ;;  %v1035_v62 = vpop.f32.mrf.mxu2 }
 0x1a4   :  { %v1019_v58 = vpop.f32.mrf.mxu1 }
 0x1a5   :  { %v987_v59 = vmul.f32 %v980_v57, %v1800_v17  ;;  %v1024_v60 = vsub.f32 %v1005_v56, %v1019_v58  ;;  %v1007_v1 = vpop.f32.mrf.mxu0 }
 0x1a7   :  { %989 = vst.msk [vmem:[%s1965_s8 + $0x68] sm:$0xff] %vm169_vm0, %v987_v59  ;;  %v1054_v61 = vmul.f32 %v1024_v60, %v1793_v10 }
 0x1a9   :  { %1056 = vst.msk [vmem:[%s1964_s7 + $0x70] sm:$0xff] %vm169_vm0, %v1054_v61 }
 0x1aa   :  { %v1049_v63 = vpop.f32.mrf.mxu3 }
 0x1ab   :  { %v1050_v0 = vadd.f32 %v1049_v63, %v1035_v62  ;;  %v1037_v8 = vpop.f32.mrf.mxu2 }
 0x1ac   :  { %v1021_v2 = vpop.f32.mrf.mxu1 }
 0x1ad   :  { %v1058_v3 = vmul.f32 %v1050_v0, %v1793_v10  ;;  %v1025_v6 = vsub.f32 %v1007_v1, %v1021_v2 }
 0x1af   :  { %1060 = vst.msk [vmem:[%s1965_s8 + $0x70] sm:$0xff] %vm169_vm0, %v1058_v3  ;;  %v1055_v7 = vmul.f32 %v1025_v6, %v1800_v17 }
 0x1b1   :  { %1057 = vst.msk [vmem:[%s1964_s7 + $0x78] sm:$0xff] %vm169_vm0, %v1055_v7 }
 0x1b2   :  { %v1051_v9 = vpop.f32.mrf.mxu3 }
 0x1b3   :  { %v1052_v11 = vadd.f32 %v1051_v9, %v1037_v8 }
 0x1b5   :  { %v1059_v12 = vmul.f32 %v1052_v11, %v1800_v17 }
 0x1b7   :  { %1061 = vst.msk [vmem:[%s1965_s8 + $0x78] sm:$0xff] %vm169_vm0, %v1059_v12 }
 0x1b8   :  { %1070 = vsyncpa [#allocation3], 1 }
 0x1b9   :  { %1071 = vsyncpa [#allocation5], 1 }
 0x1ba   :  { %1072 = vsyncpa [#allocation8], 1 }

// kernel: custom-call.2
= control target key start
LH: loop header
LB: loop body
LE: loop exit
PB: predicated region body
PF: predicated region fallthrough
CT: control target
= control target key end

     0   :  { %s105_s0 = inlined_call_operand.vmem [shape: f32[2,4,16,16], index: 0, kind: input, shape index: {}]   ;;  %s106_s1 = inlined_call_operand.vmem [shape: f32[2,4,16,16], index: 1, kind: input, shape index: {}]   ;;  %s107_s2 = inlined_call_operand.hbm [shape: c64[2,4,16,16], index: 2, kind: output, shape index: {}]  }
   0x1   :  { %s3_s11 = scalar_lea.hbm %s107_s2, 128 }
   0x2   :  { %4 = vsyncpa [#allocation0], 0  ;;  %s6_s14 = sshll.u32 %s105_s0, 4  ;;  %s8_s17 = sshll.u32 %s107_s2, 4  ;;  %s7_s14 = int_to_ptr.vmem [resolvable:$true] %s6_s14  ;;  %s9_s17 = int_to_ptr.hbm [resolvable:$true] %s8_s17 }
   0x3   :  { %11 = dma.vmem_to_hbm [thread:$0]  %s7_s14, 2048, %s9_s17, [#allocation0] }
   0x4   :  { %74 = dma.done.wait [#allocation0], 2048  }
   0x5   :  { %75 = vsyncadd [#allocation0], 4294965248 }
   0x6   :  { %14 = vsyncpa [#allocation0], 1 }
   0x7   :  { %15 = vsyncpa [#allocation1], 0  ;;  %s17_s20 = sshll.u32 %s106_s1, 4  ;;  %s19_s21 = sshll.u32 %s3_s11, 4  ;;  %s18_s20 = int_to_ptr.vmem [resolvable:$true] %s17_s20  ;;  %s20_s21 = int_to_ptr.hbm [resolvable:$true] %s19_s21 }
   0x8   :  { %22 = dma.vmem_to_hbm [thread:$0]  %s18_s20, 2048, %s20_s21, [#allocation1] }
   0x9   :  { %76 = dma.done.wait [#allocation1], 2048  }
   0xa   :  { %77 = vsyncadd [#allocation1], 4294965248 }
   0xb   :  { %25 = vsyncpa [#allocation1], 1 }

// kernel: custom-call
= control target key start
LH: loop header
LB: loop body
LE: loop exit
PB: predicated region body
PF: predicated region fallthrough
CT: control target
= control target key end

     0   :  { %2 = vsyncpa [#allocation0], 0  ;;  %s55_s0 = inlined_call_operand.hbm [shape: c64[2,4,16,16], index: 0, kind: input, shape index: {}]   ;;  %s56_s1 = inlined_call_operand.vmem [shape: f32[2,4,16,16], index: 1, kind: output, shape index: {}]  }
   0x1   :  { %s4_s8 = sshll.u32 %s55_s0, 4  ;;  %s6_s11 = sshll.u32 %s56_s1, 4  ;;  %s5_s8 = int_to_ptr.hbm [resolvable:$true] %s4_s8  ;;  %s7_s11 = int_to_ptr.vmem [resolvable:$true] %s6_s11 }
   0x2   :  { %9 = dma.hbm_to_vmem [thread:$0]  %s5_s8, 2048, %s7_s11, [#allocation0] }
   0x3   :  { %37 = dma.done.wait [#allocation0], 2048  }
   0x4   :  { %38 = vsyncadd [#allocation0], 4294965248 }
   0x5   :  { %12 = vsyncpa [#allocation0], 1 }

// kernel: custom-call.1
= control target key start
LH: loop header
LB: loop body
LE: loop exit
PB: predicated region body
PF: predicated region fallthrough
CT: control target
= control target key end

     0   :  { %s56_s0 = inlined_call_operand.hbm [shape: c64[2,4,16,16], index: 0, kind: input, shape index: {}]   ;;  %s57_s1 = inlined_call_operand.vmem [shape: f32[2,4,16,16], index: 1, kind: output, shape index: {}]  }
   0x1   :  { %s2_s8 = scalar_lea.hbm %s56_s0, 128 }
   0x2   :  { %3 = vsyncpa [#allocation0], 0  ;;  %s5_s9 = sshll.u32 %s2_s8, 4  ;;  %s7_s12 = sshll.u32 %s57_s1, 4  ;;  %s6_s9 = int_to_ptr.hbm [resolvable:$true] %s5_s9  ;;  %s8_s12 = int_to_ptr.vmem [resolvable:$true] %s7_s12 }
   0x3   :  { %10 = dma.hbm_to_vmem [thread:$0]  %s6_s9, 2048, %s8_s12, [#allocation0] }
   0x4   :  { %38 = dma.done.wait [#allocation0], 2048  }
   0x5   :  { %39 = vsyncadd [#allocation0], 4294965248 }
   0x6   :  { %13 = vsyncpa [#allocation0], 1 }

// kernel: forward_op.1
= control target key start
LH: loop header
LB: loop body
LE: loop exit
PB: predicated region body
PF: predicated region fallthrough
CT: control target
= control target key end

     0   :  { %14 = vsyncpa [#allocation3], 0  ;;  %s1957_s0 = inlined_call_operand.vmem [shape: f32[128,16], index: 0, kind: input, shape index: {}]   ;;  %s1958_s1 = inlined_call_operand.vmem [shape: f32[128,16], index: 1, kind: input, shape index: {}]   ;;  %s1959_s2 = inlined_call_operand.hbm [shape: f32[16,16], index: 2, kind: input, shape index: {}]   ;;  %s1960_s3 = inlined_call_operand.hbm [shape: bf16[16,16], index: 3, kind: input, shape index: {}, may-alias: {3,5}]   ;;  %s1961_s4 = inlined_call_operand.hbm [shape: bf16[16,16], index: 4, kind: input, shape index: {}, may-alias: {4,6}]   ;;  %s1962_s5 = inlined_call_operand.hbm [shape: bf16[16,16], index: 5, kind: input, shape index: {}, may-alias: {3,5}]   ;;  %s1963_s6 = inlined_call_operand.hbm [shape: bf16[16,16], index: 6, kind: input, shape index: {}, may-alias: {4,6}]   ;;  %s1964_s7 = inlined_call_operand.vmem [shape: f32[128,16], index: 7, kind: output, shape index: {0}]   ;;  %s1965_s8 = inlined_call_operand.vmem [shape: f32[128,16], index: 8, kind: output, shape index: {1}]  }
   0x1   :  { %15 = vsyncpa [#allocation5], 0  ;;  %s38_s29 = sshll.u32 %s1960_s3, 4  ;;  %s39_s29 = int_to_ptr.hbm [resolvable:$true] %s38_s29 }
   0x2   :  { %16 = vsyncpa [#allocation8], 0  ;;  %s1292_s30 = smov [#allocation4]   ;;  %s64_s12 = sshll.u32 %s1962_s5, 4  ;;  %s65_s12 = int_to_ptr.hbm [resolvable:$true] %s64_s12 }
   0x3   :  { %s40_s9 = sshll.u32 %s1292_s30, 4  ;;  %s1293_s13 = smov 64   ;;  %s41_s9 = int_to_ptr.vmem [resolvable:$true] %s40_s9 }
   0x4   :  { %s1294_s14 = smov 4   ;;  %s1295_s15 = smov [#allocation7]  }
   0x5   :  { %46 = dma.hbm_to_vmem [thread:$0]  %s39_s29, 128, %s41_s9, [#allocation5], %s1293_s13, %s1293_s13, %s1294_s14  }
   0x6   :  { %s66_s16 = sshll.u32 %s1295_s15, 4  ;;  %s25_s18 = sshll.u32 %s1959_s2, 4  ;;  %s67_s16 = int_to_ptr.vmem [resolvable:$true] %s66_s16  ;;  %s26_s18 = int_to_ptr.hbm [resolvable:$true] %s25_s18 }
   0x7   :  { %72 = dma.hbm_to_vmem [thread:$0]  %s65_s12, 128, %s67_s16, [#allocation8], %s1293_s13, %s1293_s13, %s1294_s14  }
   0x8   :  { %s1296_s5 = smov [#allocation2]   ;;  %s51_s22 = sshll.u32 %s1961_s4, 4  ;;  %s52_s22 = int_to_ptr.hbm [resolvable:$true] %s51_s22 }
   0x9   :  { %s27_s19 = sshll.u32 %s1296_s5, 4  ;;  %s1297_s23 = smov 128   ;;  %s28_s19 = int_to_ptr.vmem [resolvable:$true] %s27_s19 }
   0xa   :  { %s1298_s24 = smov 8   ;;  %s1299_s25 = smov [#allocation6]  }
   0xb   :  { %33 = dma.hbm_to_vmem [thread:$0]  %s26_s18, 256, %s28_s19, [#allocation3], %s1297_s23, %s1297_s23, %s1298_s24  }
   0xc   :  { %s53_s26 = sshll.u32 %s1299_s25, 4  ;;  %s77_s28 = sshll.u32 %s1963_s6, 4  ;;  %s54_s26 = int_to_ptr.vmem [resolvable:$true] %s53_s26  ;;  %s78_s28 = int_to_ptr.hbm [resolvable:$true] %s77_s28 }
   0xd   :  { %59 = dma.hbm_to_vmem [thread:$0]  %s52_s22, 128, %s54_s26, [#allocation5], %s1293_s13, %s1293_s13, %s1294_s14  }
   0xe   :  { %s1300_s29 = smov [#allocation9]  }
   0xf   :  { %s79_s30 = sshll.u32 %s1300_s29, 4  ;;  %s80_s30 = int_to_ptr.vmem [resolvable:$true] %s79_s30 }
  0x10   :  { %85 = dma.hbm_to_vmem [thread:$0]  %s78_s28, 128, %s80_s30, [#allocation8], %s1293_s13, %s1293_s13, %s1294_s14  }
  0x11   :  { %1286 = dma.done.wait [#allocation3], 256  }
  0x12   :  { %1287 = vsyncadd [#allocation3], 4294967040 }
  0x13   :  { %1288 = dma.done.wait [#allocation5], 256  }
  0x14   :  { %1289 = vsyncadd [#allocation5], 4294967040 }
  0x15   :  { %1290 = dma.done.wait [#allocation8], 256  }
  0x16   :  { %1291 = vsyncadd [#allocation8], 4294967040  ;;  %v1153_v0 = vld [vmem:[#allocation7] sm:$0xff]  ;;  %v1154_v1 = vld [vmem:[#allocation9] sm:$0xff]  ;;  %vm169_vm0 = vcmask 130048  }
  0x17   :  { %v115_v2 = vld [vmem:[%s1957_s0] sm:$0xff]  ;;  %v116_v3 = vld [vmem:[%s1957_s0 + $0x8] sm:$0xff]  ;;  %201 = vmatpush.bf16.msra.mxu0 %v1153_v0  ;;  %280 = vmatpush.bf16.msra.mxu1 %v1154_v1  ;;  %v141_v8 = vld [vmem:[%s1958_s1 + $0x10] sm:$0xff] }
  0x18   :  { %v139_v4 = vld [vmem:[%s1958_s1] sm:$0xff]  ;;  %v140_v5 = vld [vmem:[%s1958_s1 + $0x8] sm:$0xff]  ;;  %v131_v6 = vpack.c.bf16 %v116_v3, %v115_v2  ;;  %361 = vmatpush.bf16.msra.mxu2 %v1153_v0  ;;  %410 = vmatpush.bf16.msra.mxu3 %v1154_v1  ;;  %v142_v9 = vld [vmem:[%s1958_s1 + $0x18] sm:$0xff] }
  0x19   :  { %v155_v7 = vpack.c.bf16 %v140_v5, %v139_v4  ;;  %v117_v10 = vld [vmem:[%s1957_s0 + $0x10] sm:$0xff]  ;;  %v118_v11 = vld [vmem:[%s1957_s0 + $0x18] sm:$0xff]  ;;  %v156_v12 = vpack.c.bf16 %v142_v9, %v141_v8  ;;  %v143_v14 = vld [vmem:[%s1958_s1 + $0x20] sm:$0xff] }
  0x1a   :  { %1077 = vmatmul.msk.bf16.vlgmr.msra.gmra.mxu0 %vm169_vm0, %v131_v6  ;;  %v132_v13 = vpack.c.bf16 %v118_v11, %v117_v10  ;;  %v144_v15 = vld [vmem:[%s1958_s1 + $0x28] sm:$0xff]  ;;  %v119_v16 = vld [vmem:[%s1957_s0 + $0x20] sm:$0xff]  ;;  %v145_v20 = vld [vmem:[%s1958_s1 + $0x30] sm:$0xff] }
  0x1b   :  { %1089 = vmatmul.msk.bf16.vlgmr.msra.gmra.mxu1 %vm169_vm0, %v155_v7  ;;  %1097 = vmatmul.msk.bf16.vlgmr.msra.gmra.mxu2 %vm169_vm0, %v155_v7  ;;  %v120_v17 = vld [vmem:[%s1957_s0 + $0x28] sm:$0xff]  ;;  %v157_v18 = vpack.c.bf16 %v144_v15, %v143_v14  ;;  %v146_v21 = vld [vmem:[%s1958_s1 + $0x38] sm:$0xff]  ;;  %v121_v22 = vld [vmem:[%s1957_s0 + $0x30] sm:$0xff] }
  0x1c   :  { %1105 = vmatmul.msk.bf16.vlgmr.msra.gmra.mxu3 %vm169_vm0, %v131_v6  ;;  %v133_v19 = vpack.c.bf16 %v120_v17, %v119_v16  ;;  %v122_v23 = vld [vmem:[%s1957_s0 + $0x38] sm:$0xff]  ;;  %v158_v24 = vpack.c.bf16 %v146_v21, %v145_v20  ;;  %v147_v26 = vld [vmem:[%s1958_s1 + $0x40] sm:$0xff]  ;;  %v148_v27 = vld [vmem:[%s1958_s1 + $0x48] sm:$0xff] }
  0x1d   :  { %v134_v25 = vpack.c.bf16 %v122_v23, %v121_v22  ;;  %v123_v28 = vld [vmem:[%s1957_s0 + $0x40] sm:$0xff]  ;;  %v124_v29 = vld [vmem:[%s1957_s0 + $0x48] sm:$0xff]  ;;  %v159_v30 = vpack.c.bf16 %v148_v27, %v147_v26  ;;  %v149_v32 = vld [vmem:[%s1958_s1 + $0x50] sm:$0xff] }
  0x1e   :  { %v135_v31 = vpack.c.bf16 %v124_v29, %v123_v28  ;;  %v150_v33 = vld [vmem:[%s1958_s1 + $0x58] sm:$0xff]  ;;  %v125_v34 = vld [vmem:[%s1957_s0 + $0x50] sm:$0xff]  ;;  %v151_v38 = vld [vmem:[%s1958_s1 + $0x60] sm:$0xff] }
  0x1f   :  { %v126_v35 = vld [vmem:[%s1957_s0 + $0x58] sm:$0xff]  ;;  %v160_v36 = vpack.c.bf16 %v150_v33, %v149_v32  ;;  %v152_v39 = vld [vmem:[%s1958_s1 + $0x68] sm:$0xff]  ;;  %v127_v40 = vld [vmem:[%s1957_s0 + $0x60] sm:$0xff] }
  0x20   :  { %v136_v37 = vpack.c.bf16 %v126_v35, %v125_v34  ;;  %v128_v41 = vld [vmem:[%s1957_s0 + $0x68] sm:$0xff]  ;;  %v161_v42 = vpack.c.bf16 %v152_v39, %v151_v38  ;;  %v153_v44 = vld [vmem:[%s1958_s1 + $0x70] sm:$0xff]  ;;  %v154_v45 = vld [vmem:[%s1958_s1 + $0x78] sm:$0xff] }
  0x21   :  { %v137_v43 = vpack.c.bf16 %v128_v41, %v127_v40  ;;  %v129_v46 = vld [vmem:[%s1957_s0 + $0x70] sm:$0xff]  ;;  %v130_v47 = vld [vmem:[%s1957_s0 + $0x78] sm:$0xff]  ;;  %v162_v48 = vpack.c.bf16 %v154_v45, %v153_v44 }
  0x22   :  { %v138_v49 = vpack.c.bf16 %v130_v47, %v129_v46  ;;  %v1527_v4 = vld [vmem:[#allocation6] sm:$0xff]  ;;  %v1529_v5 = vld [vmem:[#allocation4] sm:$0xff] }
  0x2a   :  { %1078 = vmatmul.msk.bf16.gmra.mxu0 %vm169_vm0, %v132_v13 }
  0x2b   :  { %1090 = vmatmul.msk.bf16.gmra.mxu1 %vm169_vm0, %v156_v12  ;;  %1098 = vmatmul.msk.bf16.gmra.mxu2 %vm169_vm0, %v156_v12 }
  0x2c   :  { %1106 = vmatmul.msk.bf16.gmra.mxu3 %vm169_vm0, %v132_v13 }
  0x3a   :  { %1079 = vmatmul.msk.bf16.gmra.mxu0 %vm169_vm0, %v133_v19 }
  0x3b   :  { %1091 = vmatmul.msk.bf16.gmra.mxu1 %vm169_vm0, %v157_v18  ;;  %1099 = vmatmul.msk.bf16.gmra.mxu2 %vm169_vm0, %v157_v18 }
  0x3c   :  { %1107 = vmatmul.msk.bf16.gmra.mxu3 %vm169_vm0, %v133_v19 }
  0x4a   :  { %1080 = vmatmul.msk.bf16.gmra.mxu0 %vm169_vm0, %v134_v25 }
  0x4b   :  { %1092 = vmatmul.msk.bf16.gmra.mxu1 %vm169_vm0, %v158_v24  ;;  %1100 = vmatmul.msk.bf16.gmra.mxu2 %vm169_vm0, %v158_v24 }
  0x4c   :  { %1108 = vmatmul.msk.bf16.gmra.mxu3 %vm169_vm0, %v134_v25 }
  0x5a   :  { %1081 = vmatmul.msk.bf16.gmra.mxu0 %vm169_vm0, %v135_v31 }
  0x5b   :  { %1093 = vmatmul.msk.bf16.gmra.mxu1 %vm169_vm0, %v159_v30  ;;  %1101 = vmatmul.msk.bf16.gmra.mxu2 %vm169_vm0, %v159_v30 }
  0x5c   :  { %1109 = vmatmul.msk.bf16.gmra.mxu3 %vm169_vm0, %v135_v31 }
  0x6a   :  { %1082 = vmatmul.msk.bf16.gmra.mxu0 %vm169_vm0, %v136_v37 }
  0x6b   :  { %1094 = vmatmul.msk.bf16.gmra.mxu1 %vm169_vm0, %v160_v36  ;;  %1102 = vmatmul.msk.bf16.gmra.mxu2 %vm169_vm0, %v160_v36 }
  0x6c   :  { %1110 = vmatmul.msk.bf16.gmra.mxu3 %vm169_vm0, %v136_v37 }
  0x7a   :  { %1083 = vmatmul.msk.bf16.gmra.mxu0 %vm169_vm0, %v137_v43 }
  0x7b   :  { %1095 = vmatmul.msk.bf16.gmra.mxu1 %vm169_vm0, %v161_v42  ;;  %1103 = vmatmul.msk.bf16.gmra.mxu2 %vm169_vm0, %v161_v42 }
  0x7c   :  { %1111 = vmatmul.msk.bf16.gmra.mxu3 %vm169_vm0, %v137_v43 }
  0x8a   :  { %1084 = vmatmul.msk.bf16.gmra.mxu0 %vm169_vm0, %v138_v49 }
  0x8b   :  { %1096 = vmatmul.msk.bf16.gmra.mxu1 %vm169_vm0, %v162_v48  ;;  %1104 = vmatmul.msk.bf16.gmra.mxu2 %vm169_vm0, %v162_v48 }
  0x8c   :  { %1112 = vmatmul.msk.bf16.gmra.mxu3 %vm169_vm0, %v138_v49 }
  0x97   :  { %v203_v50 = vpop.f32.mrf.mxu0 }
  0x98   :  { %v282_v51 = vpop.f32.mrf.mxu1 }
  0x99   :  { %v322_v52 = vsub.f32 %v203_v50, %v282_v51 }
  0x9b   :  { %338 = vst.msk [vmem:[%s1964_s7] sm:$0xff] %vm169_vm0, %v322_v52 }
  0x9e   :  { %v363_v53 = vpop.f32.mrf.mxu2 }
  0x9f   :  { %v412_v54 = vpop.f32.mrf.mxu3  ;;  %v205_v56 = vpop.f32.mrf.mxu0 }
  0xa0   :  { %v413_v55 = vadd.f32 %v412_v54, %v363_v53  ;;  %v284_v57 = vpop.f32.mrf.mxu1 }
  0xa1   :  { %v323_v58 = vsub.f32 %v205_v56, %v284_v57 }
  0xa2   :  { %452 = vst.msk [vmem:[%s1965_s8] sm:$0xff] %vm169_vm0, %v413_v55  ;;  %v470_v1 = vld [vmem:[%s1964_s7] sm:$0xff] }
  0xa3   :  { %339 = vst.msk [vmem:[%s1964_s7 + $0x8] sm:$0xff] %vm169_vm0, %v323_v58 }
  0xa6   :  { %v365_v59 = vpop.f32.mrf.mxu2 }
  0xa7   :  { %v414_v60 = vpop.f32.mrf.mxu3  ;;  %v208_v62 = vpop.f32.mrf.mxu0 }
  0xa8   :  { %v415_v61 = vadd.f32 %v414_v60, %v365_v59  ;;  %v287_v63 = vpop.f32.mrf.mxu1 }
  0xa9   :  { %v324_v0 = vsub.f32 %v208_v62, %v287_v63  ;;  %v473_v11 = vld [vmem:[%s1965_s8] sm:$0xff] }
  0xaa   :  { %453 = vst.msk [vmem:[%s1965_s8 + $0x8] sm:$0xff] %vm169_vm0, %v415_v61  ;;  %v471_v2 = vld [vmem:[%s1964_s7 + $0x8] sm:$0xff] }
  0xab   :  { %v472_v3 = vpack.c.bf16 %v471_v2, %v470_v1  ;;  %340 = vst.msk [vmem:[%s1964_s7 + $0x10] sm:$0xff] %vm169_vm0, %v324_v0 }
  0xad   :  { %491 = vmatpush.bf16.msrb.mxu0 %v472_v3  ;;  %529 = vmatpush.bf16.msrb.mxu2 %v472_v3 }
  0xae   :  { %v368_v6 = vpop.f32.mrf.mxu2 }
  0xaf   :  { %v417_v7 = vpop.f32.mrf.mxu3  ;;  %v210_v9 = vpop.f32.mrf.mxu0 }
  0xb0   :  { %v418_v8 = vadd.f32 %v417_v7, %v368_v6  ;;  %v289_v10 = vpop.f32.mrf.mxu1  ;;  %1123 = vmatmul.msk.bf16.vlgmr.msrb.gmra.mxu2 %vm169_vm0, %v1527_v4  ;;  %1117 = vmatmul.msk.bf16.vlgmr.msrb.gmra.mxu0 %vm169_vm0, %v1529_v5 }
  0xb1   :  { %v474_v12 = vld [vmem:[%s1965_s8 + $0x8] sm:$0xff]  ;;  %v325_v13 = vsub.f32 %v210_v9, %v289_v10 }
  0xb2   :  { %v475_v14 = vpack.c.bf16 %v474_v12, %v473_v11  ;;  %454 = vst.msk [vmem:[%s1965_s8 + $0x10] sm:$0xff] %vm169_vm0, %v418_v8  ;;  %v558_v21 = vld [vmem:[%s1964_s7 + $0x10] sm:$0xff] }
  0xb3   :  { %341 = vst.msk [vmem:[%s1964_s7 + $0x18] sm:$0xff] %vm169_vm0, %v325_v13 }
  0xb4   :  { %513 = vmatpush.bf16.msrb.mxu1 %v475_v14  ;;  %543 = vmatpush.bf16.msrb.mxu3 %v475_v14 }
  0xb6   :  { %v370_v15 = vpop.f32.mrf.mxu2 }
  0xb7   :  { %v419_v16 = vpop.f32.mrf.mxu3  ;;  %1124 = vmatmul.msk.bf16.vlgmr.msrb.gmra.mxu3 %vm169_vm0, %v1529_v5  ;;  %1122 = vmatmul.msk.bf16.vlgmr.msrb.gmra.mxu1 %vm169_vm0, %v1527_v4  ;;  %v213_v18 = vpop.f32.mrf.mxu0 }
  0xb8   :  { %v420_v17 = vadd.f32 %v419_v16, %v370_v15  ;;  %v292_v19 = vpop.f32.mrf.mxu1 }
  0xb9   :  { %v326_v20 = vsub.f32 %v213_v18, %v292_v19  ;;  %v561_v29 = vld [vmem:[%s1965_s8 + $0x10] sm:$0xff] }
  0xba   :  { %455 = vst.msk [vmem:[%s1965_s8 + $0x18] sm:$0xff] %vm169_vm0, %v420_v17  ;;  %v559_v22 = vld [vmem:[%s1964_s7 + $0x18] sm:$0xff] }
  0xbb   :  { %342 = vst.msk [vmem:[%s1964_s7 + $0x20] sm:$0xff] %vm169_vm0, %v326_v20  ;;  %v560_v23 = vpack.c.bf16 %v559_v22, %v558_v21 }
  0xbd   :  { %571 = vmatpush.bf16.msra.mxu0 %v560_v23  ;;  %601 = vmatpush.bf16.msra.mxu2 %v560_v23 }
  0xbe   :  { %v373_v24 = vpop.f32.mrf.mxu2 }
  0xbf   :  { %v422_v25 = vpop.f32.mrf.mxu3  ;;  %v215_v27 = vpop.f32.mrf.mxu0 }
  0xc0   :  { %v423_v26 = vadd.f32 %v422_v25, %v373_v24  ;;  %v294_v28 = vpop.f32.mrf.mxu1  ;;  %1127 = vmatmul.msk.bf16.vlgmr.msra.gmra.mxu2 %vm169_vm0, %v1527_v4  ;;  %1125 = vmatmul.msk.bf16.vlgmr.msra.gmra.mxu0 %vm169_vm0, %v1529_v5 }
  0xc1   :  { %v562_v30 = vld [vmem:[%s1965_s8 + $0x18] sm:$0xff]  ;;  %v327_v31 = vsub.f32 %v215_v27, %v294_v28 }
  0xc2   :  { %456 = vst.msk [vmem:[%s1965_s8 + $0x20] sm:$0xff] %vm169_vm0, %v423_v26  ;;  %v563_v32 = vpack.c.bf16 %v562_v30, %v561_v29  ;;  %v630_v39 = vld [vmem:[%s1964_s7 + $0x20] sm:$0xff] }
  0xc3   :  { %343 = vst.msk [vmem:[%s1964_s7 + $0x28] sm:$0xff] %vm169_vm0, %v327_v31 }
  0xc4   :  { %585 = vmatpush.bf16.msra.mxu1 %v563_v32  ;;  %615 = vmatpush.bf16.msra.mxu3 %v563_v32 }
  0xc6   :  { %v375_v33 = vpop.f32.mrf.mxu2 }
  0xc7   :  { %v424_v34 = vpop.f32.mrf.mxu3  ;;  %1128 = vmatmul.msk.bf16.vlgmr.msra.gmra.mxu3 %vm169_vm0, %v1529_v5  ;;  %1126 = vmatmul.msk.bf16.vlgmr.msra.gmra.mxu1 %vm169_vm0, %v1527_v4  ;;  %v218_v36 = vpop.f32.mrf.mxu0 }
  0xc8   :  { %v425_v35 = vadd.f32 %v424_v34, %v375_v33  ;;  %v297_v37 = vpop.f32.mrf.mxu1 }
  0xc9   :  { %v328_v38 = vsub.f32 %v218_v36, %v297_v37  ;;  %v633_v47 = vld [vmem:[%s1965_s8 + $0x20] sm:$0xff] }
  0xca   :  { %457 = vst.msk [vmem:[%s1965_s8 + $0x28] sm:$0xff] %vm169_vm0, %v425_v35  ;;  %v631_v40 = vld [vmem:[%s1964_s7 + $0x28] sm:$0xff] }
  0xcb   :  { %344 = vst.msk [vmem:[%s1964_s7 + $0x30] sm:$0xff] %vm169_vm0, %v328_v38  ;;  %v632_v41 = vpack.c.bf16 %v631_v40, %v630_v39 }
  0xcd   :  { %643 = vmatpush.bf16.msrb.mxu0 %v632_v41  ;;  %673 = vmatpush.bf16.msrb.mxu2 %v632_v41 }
  0xce   :  { %v378_v42 = vpop.f32.mrf.mxu2 }
  0xcf   :  { %v427_v43 = vpop.f32.mrf.mxu3  ;;  %v220_v45 = vpop.f32.mrf.mxu0 }
  0xd0   :  { %v428_v44 = vadd.f32 %v427_v43, %v378_v42  ;;  %v299_v46 = vpop.f32.mrf.mxu1  ;;  %1131 = vmatmul.msk.bf16.vlgmr.msrb.gmra.mxu2 %vm169_vm0, %v1527_v4  ;;  %1129 = vmatmul.msk.bf16.vlgmr.msrb.gmra.mxu0 %vm169_vm0, %v1529_v5 }
  0xd1   :  { %v634_v48 = vld [vmem:[%s1965_s8 + $0x28] sm:$0xff]  ;;  %v329_v49 = vsub.f32 %v220_v45, %v299_v46 }
  0xd2   :  { %458 = vst.msk [vmem:[%s1965_s8 + $0x30] sm:$0xff] %vm169_vm0, %v428_v44  ;;  %v635_v50 = vpack.c.bf16 %v634_v48, %v633_v47  ;;  %v702_v57 = vld [vmem:[%s1964_s7 + $0x30] sm:$0xff] }
  0xd3   :  { %345 = vst.msk [vmem:[%s1964_s7 + $0x38] sm:$0xff] %vm169_vm0, %v329_v49 }
  0xd4   :  { %657 = vmatpush.bf16.msrb.mxu1 %v635_v50  ;;  %687 = vmatpush.bf16.msrb.mxu3 %v635_v50 }
  0xd6   :  { %v380_v51 = vpop.f32.mrf.mxu2 }
  0xd7   :  { %v429_v52 = vpop.f32.mrf.mxu3  ;;  %1132 = vmatmul.msk.bf16.vlgmr.msrb.gmra.mxu3 %vm169_vm0, %v1529_v5  ;;  %1130 = vmatmul.msk.bf16.vlgmr.msrb.gmra.mxu1 %vm169_vm0, %v1527_v4  ;;  %v223_v54 = vpop.f32.mrf.mxu0 }
  0xd8   :  { %v430_v53 = vadd.f32 %v429_v52, %v380_v51  ;;  %v302_v55 = vpop.f32.mrf.mxu1 }
  0xd9   :  { %v330_v56 = vsub.f32 %v223_v54, %v302_v55  ;;  %v705_v1 = vld [vmem:[%s1965_s8 + $0x30] sm:$0xff] }
  0xda   :  { %459 = vst.msk [vmem:[%s1965_s8 + $0x38] sm:$0xff] %vm169_vm0, %v430_v53  ;;  %v703_v58 = vld [vmem:[%s1964_s7 + $0x38] sm:$0xff] }
  0xdb   :  { %346 = vst.msk [vmem:[%s1964_s7 + $0x40] sm:$0xff] %vm169_vm0, %v330_v56  ;;  %v704_v59 = vpack.c.bf16 %v703_v58, %v702_v57 }
  0xdd   :  { %715 = vmatpush.bf16.msra.mxu0 %v704_v59  ;;  %745 = vmatpush.bf16.msra.mxu2 %v704_v59 }
  0xde   :  { %v383_v60 = vpop.f32.mrf.mxu2 }
  0xdf   :  { %v432_v61 = vpop.f32.mrf.mxu3  ;;  %v225_v63 = vpop.f32.mrf.mxu0 }
  0xe0   :  { %v433_v62 = vadd.f32 %v432_v61, %v383_v60  ;;  %v304_v0 = vpop.f32.mrf.mxu1  ;;  %1135 = vmatmul.msk.bf16.vlgmr.msra.gmra.mxu2 %vm169_vm0, %v1527_v4  ;;  %1133 = vmatmul.msk.bf16.vlgmr.msra.gmra.mxu0 %vm169_vm0, %v1529_v5 }
  0xe1   :  { %v706_v2 = vld [vmem:[%s1965_s8 + $0x38] sm:$0xff]  ;;  %v331_v3 = vsub.f32 %v225_v63, %v304_v0 }
  0xe2   :  { %460 = vst.msk [vmem:[%s1965_s8 + $0x40] sm:$0xff] %vm169_vm0, %v433_v62  ;;  %v707_v6 = vpack.c.bf16 %v706_v2, %v705_v1  ;;  %v774_v13 = vld [vmem:[%s1964_s7 + $0x40] sm:$0xff] }
  0xe3   :  { %347 = vst.msk [vmem:[%s1964_s7 + $0x48] sm:$0xff] %vm169_vm0, %v331_v3 }
  0xe4   :  { %729 = vmatpush.bf16.msra.mxu1 %v707_v6  ;;  %759 = vmatpush.bf16.msra.mxu3 %v707_v6 }
  0xe6   :  { %v385_v7 = vpop.f32.mrf.mxu2 }
  0xe7   :  { %v434_v8 = vpop.f32.mrf.mxu3  ;;  %1136 = vmatmul.msk.bf16.vlgmr.msra.gmra.mxu3 %vm169_vm0, %v1529_v5  ;;  %1134 = vmatmul.msk.bf16.vlgmr.msra.gmra.mxu1 %vm169_vm0, %v1527_v4  ;;  %v228_v10 = vpop.f32.mrf.mxu0 }
  0xe8   :  { %v435_v9 = vadd.f32 %v434_v8, %v385_v7  ;;  %v307_v11 = vpop.f32.mrf.mxu1 }
  0xe9   :  { %v332_v12 = vsub.f32 %v228_v10, %v307_v11  ;;  %v777_v21 = vld [vmem:[%s1965_s8 + $0x40] sm:$0xff] }
  0xea   :  { %461 = vst.msk [vmem:[%s1965_s8 + $0x48] sm:$0xff] %vm169_vm0, %v435_v9  ;;  %v775_v14 = vld [vmem:[%s1964_s7 + $0x48] sm:$0xff]  ;;  %v1793_v10 = vld [vmem:[#allocation2] sm:$0xff] }
  0xeb   :  { %348 = vst.msk [vmem:[%s1964_s7 + $0x50] sm:$0xff] %vm169_vm0, %v332_v12  ;;  %v776_v15 = vpack.c.bf16 %v775_v14, %v774_v13 }
  0xed   :  { %787 = vmatpush.bf16.msrb.mxu0 %v776_v15  ;;  %817 = vmatpush.bf16.msrb.mxu2 %v776_v15 }
  0xee   :  { %v388_v16 = vpop.f32.mrf.mxu2 }
  0xef   :  { %v437_v17 = vpop.f32.mrf.mxu3  ;;  %v230_v19 = vpop.f32.mrf.mxu0 }
  0xf0   :  { %v438_v18 = vadd.f32 %v437_v17, %v388_v16  ;;  %v309_v20 = vpop.f32.mrf.mxu1  ;;  %1139 = vmatmul.msk.bf16.vlgmr.msrb.gmra.mxu2 %vm169_vm0, %v1527_v4  ;;  %1137 = vmatmul.msk.bf16.vlgmr.msrb.gmra.mxu0 %vm169_vm0, %v1529_v5  ;;  %v1800_v17 = vld [vmem:[#allocation2 + $0x8] sm:$0xff] }
  0xf1   :  { %v778_v22 = vld [vmem:[%s1965_s8 + $0x48] sm:$0xff]  ;;  %v333_v23 = vsub.f32 %v230_v19, %v309_v20 }
  0xf2   :  { %462 = vst.msk [vmem:[%s1965_s8 + $0x50] sm:$0xff] %vm169_vm0, %v438_v18  ;;  %v779_v24 = vpack.c.bf16 %v778_v22, %v777_v21  ;;  %v846_v31 = vld [vmem:[%s1964_s7 + $0x50] sm:$0xff] }
  0xf3   :  { %349 = vst.msk [vmem:[%s1964_s7 + $0x58] sm:$0xff] %vm169_vm0, %v333_v23 }
  0xf4   :  { %801 = vmatpush.bf16.msrb.mxu1 %v779_v24  ;;  %831 = vmatpush.bf16.msrb.mxu3 %v779_v24 }
  0xf6   :  { %v390_v25 = vpop.f32.mrf.mxu2 }
  0xf7   :  { %v439_v26 = vpop.f32.mrf.mxu3  ;;  %1140 = vmatmul.msk.bf16.vlgmr.msrb.gmra.mxu3 %vm169_vm0, %v1529_v5  ;;  %1138 = vmatmul.msk.bf16.vlgmr.msrb.gmra.mxu1 %vm169_vm0, %v1527_v4  ;;  %v233_v28 = vpop.f32.mrf.mxu0 }
  0xf8   :  { %v440_v27 = vadd.f32 %v439_v26, %v390_v25  ;;  %v312_v29 = vpop.f32.mrf.mxu1 }
  0xf9   :  { %v334_v30 = vsub.f32 %v233_v28, %v312_v29  ;;  %v849_v39 = vld [vmem:[%s1965_s8 + $0x50] sm:$0xff] }
  0xfa   :  { %463 = vst.msk [vmem:[%s1965_s8 + $0x58] sm:$0xff] %vm169_vm0, %v440_v27  ;;  %v847_v32 = vld [vmem:[%s1964_s7 + $0x58] sm:$0xff] }
  0xfb   :  { %350 = vst.msk [vmem:[%s1964_s7 + $0x60] sm:$0xff] %vm169_vm0, %v334_v30  ;;  %v848_v33 = vpack.c.bf16 %v847_v32, %v846_v31 }
  0xfd   :  { %859 = vmatpush.bf16.msra.mxu0 %v848_v33  ;;  %889 = vmatpush.bf16.msra.mxu2 %v848_v33 }
  0xfe   :  { %v393_v34 = vpop.f32.mrf.mxu2 }
  0xff   :  { %v442_v35 = vpop.f32.mrf.mxu3  ;;  %v235_v37 = vpop.f32.mrf.mxu0 }
 0x100   :  { %v443_v36 = vadd.f32 %v442_v35, %v393_v34  ;;  %v314_v38 = vpop.f32.mrf.mxu1  ;;  %1143 = vmatmul.msk.bf16.vlgmr.msra.gmra.mxu2 %vm169_vm0, %v1527_v4  ;;  %1141 = vmatmul.msk.bf16.vlgmr.msra.gmra.mxu0 %vm169_vm0, %v1529_v5 }
 0x101   :  { %v850_v40 = vld [vmem:[%s1965_s8 + $0x58] sm:$0xff]  ;;  %v335_v41 = vsub.f32 %v235_v37, %v314_v38 }
 0x102   :  { %464 = vst.msk [vmem:[%s1965_s8 + $0x60] sm:$0xff] %vm169_vm0, %v443_v36  ;;  %v851_v42 = vpack.c.bf16 %v850_v40, %v849_v39  ;;  %v918_v49 = vld [vmem:[%s1964_s7 + $0x60] sm:$0xff] }
 0x103   :  { %351 = vst.msk [vmem:[%s1964_s7 + $0x68] sm:$0xff] %vm169_vm0, %v335_v41 }
 0x104   :  { %873 = vmatpush.bf16.msra.mxu1 %v851_v42  ;;  %903 = vmatpush.bf16.msra.mxu3 %v851_v42 }
 0x106   :  { %v395_v43 = vpop.f32.mrf.mxu2 }
 0x107   :  { %v444_v44 = vpop.f32.mrf.mxu3  ;;  %1144 = vmatmul.msk.bf16.vlgmr.msra.gmra.mxu3 %vm169_vm0, %v1529_v5  ;;  %1142 = vmatmul.msk.bf16.vlgmr.msra.gmra.mxu1 %vm169_vm0, %v1527_v4  ;;  %v238_v46 = vpop.f32.mrf.mxu0 }
 0x108   :  { %v445_v45 = vadd.f32 %v444_v44, %v395_v43  ;;  %v317_v47 = vpop.f32.mrf.mxu1 }
 0x109   :  { %v336_v48 = vsub.f32 %v238_v46, %v317_v47  ;;  %v921_v57 = vld [vmem:[%s1965_s8 + $0x60] sm:$0xff] }
 0x10a   :  { %465 = vst.msk [vmem:[%s1965_s8 + $0x68] sm:$0xff] %vm169_vm0, %v445_v45  ;;  %v919_v50 = vld [vmem:[%s1964_s7 + $0x68] sm:$0xff] }
 0x10b   :  { %352 = vst.msk [vmem:[%s1964_s7 + $0x70] sm:$0xff] %vm169_vm0, %v336_v48  ;;  %v920_v51 = vpack.c.bf16 %v919_v50, %v918_v49 }
 0x10d   :  { %931 = vmatpush.bf16.msrb.mxu0 %v920_v51  ;;  %961 = vmatpush.bf16.msrb.mxu2 %v920_v51 }
 0x10e   :  { %v398_v52 = vpop.f32.mrf.mxu2 }
 0x10f   :  { %v447_v53 = vpop.f32.mrf.mxu3  ;;  %v240_v55 = vpop.f32.mrf.mxu0 }
 0x110   :  { %v448_v54 = vadd.f32 %v447_v53, %v398_v52  ;;  %v319_v56 = vpop.f32.mrf.mxu1  ;;  %1147 = vmatmul.msk.bf16.vlgmr.msrb.gmra.mxu2 %vm169_vm0, %v1527_v4  ;;  %1145 = vmatmul.msk.bf16.vlgmr.msrb.gmra.mxu0 %vm169_vm0, %v1529_v5 }
 0x111   :  { %v922_v58 = vld [vmem:[%s1965_s8 + $0x68] sm:$0xff]  ;;  %v337_v59 = vsub.f32 %v240_v55, %v319_v56 }
 0x112   :  { %466 = vst.msk [vmem:[%s1965_s8 + $0x70] sm:$0xff] %vm169_vm0, %v448_v54  ;;  %v923_v60 = vpack.c.bf16 %v922_v58, %v921_v57  ;;  %v990_v0 = vld [vmem:[%s1964_s7 + $0x70] sm:$0xff] }
 0x113   :  { %353 = vst.msk [vmem:[%s1964_s7 + $0x78] sm:$0xff] %vm169_vm0, %v337_v59 }
 0x114   :  { %945 = vmatpush.bf16.msrb.mxu1 %v923_v60  ;;  %975 = vmatpush.bf16.msrb.mxu3 %v923_v60 }
 0x116   :  { %v400_v61 = vpop.f32.mrf.mxu2 }
 0x117   :  { %v449_v62 = vpop.f32.mrf.mxu3  ;;  %1148 = vmatmul.msk.bf16.vlgmr.msrb.gmra.mxu3 %vm169_vm0, %v1529_v5  ;;  %1146 = vmatmul.msk.bf16.vlgmr.msrb.gmra.mxu1 %vm169_vm0, %v1527_v4 }
 0x118   :  { %v450_v63 = vadd.f32 %v449_v62, %v400_v61 }
 0x119   :  { %v993_v3 = vld [vmem:[%s1965_s8 + $0x70] sm:$0xff] }
 0x11a   :  { %467 = vst.msk [vmem:[%s1965_s8 + $0x78] sm:$0xff] %vm169_vm0, %v450_v63  ;;  %v991_v1 = vld [vmem:[%s1964_s7 + $0x78] sm:$0xff] }
 0x11b   :  { %v992_v2 = vpack.c.bf16 %v991_v1, %v990_v0 }
 0x11d   :  { %1003 = vmatpush.bf16.msra.mxu0 %v992_v2  ;;  %1033 = vmatpush.bf16.msra.mxu2 %v992_v2 }
 0x120   :  { %1151 = vmatmul.msk.bf16.vlgmr.msra.gmra.mxu2 %vm169_vm0, %v1527_v4  ;;  %1149 = vmatmul.msk.bf16.vlgmr.msra.gmra.mxu0 %vm169_vm0, %v1529_v5 }
 0x121   :  { %v994_v6 = vld [vmem:[%s1965_s8 + $0x78] sm:$0xff] }
 0x122   :  { %v995_v7 = vpack.c.bf16 %v994_v6, %v993_v3 }
 0x124   :  { %1017 = vmatpush.bf16.msra.mxu1 %v995_v7  ;;  %1047 = vmatpush.bf16.msra.mxu3 %v995_v7 }
 0x127   :  { %1152 = vmatmul.msk.bf16.vlgmr.msra.gmra.mxu3 %vm169_vm0, %v1529_v5  ;;  %1150 = vmatmul.msk.bf16.vlgmr.msra.gmra.mxu1 %vm169_vm0, %v1527_v4 }
 0x12d   :  { %v493_v8 = vpop.f32.mrf.mxu0 }
 0x133   :  { %v531_v9 = vpop.f32.mrf.mxu2 }
 0x134   :  { %v515_v11 = vpop.f32.mrf.mxu1 }
 0x135   :  { %v520_v12 = vsub.f32 %v493_v8, %v515_v11  ;;  %v495_v13 = vpop.f32.mrf.mxu0 }
 0x137   :  { %v550_v14 = vmul.f32 %v520_v12, %v1793_v10 }
 0x139   :  { %552 = vst.msk [vmem:[%s1964_s7] sm:$0xff] %vm169_vm0, %v550_v14 }
 0x13a   :  { %v545_v15 = vpop.f32.mrf.mxu3 }
 0x13b   :  { %v546_v16 = vadd.f32 %v545_v15, %v531_v9  ;;  %v533_v5 = vpop.f32.mrf.mxu2 }
 0x13c   :  { %v517_v4 = vpop.f32.mrf.mxu1 }
 0x13d   :  { %v554_v18 = vmul.f32 %v546_v16, %v1793_v10  ;;  %v521_v19 = vsub.f32 %v495_v13, %v517_v4  ;;  %v573_v20 = vpop.f32.mrf.mxu0 }
 0x13f   :  { %556 = vst.msk [vmem:[%s1965_s8] sm:$0xff] %vm169_vm0, %v554_v18  ;;  %v551_v21 = vmul.f32 %v521_v19, %v1800_v17 }
 0x141   :  { %553 = vst.msk [vmem:[%s1964_s7 + $0x8] sm:$0xff] %vm169_vm0, %v551_v21 }
 0x142   :  { %v547_v22 = vpop.f32.mrf.mxu3 }
 0x143   :  { %v548_v23 = vadd.f32 %v547_v22, %v533_v5  ;;  %v603_v24 = vpop.f32.mrf.mxu2 }
 0x144   :  { %v587_v25 = vpop.f32.mrf.mxu1 }
 0x145   :  { %v555_v26 = vmul.f32 %v548_v23, %v1800_v17  ;;  %v592_v27 = vsub.f32 %v573_v20, %v587_v25  ;;  %v575_v28 = vpop.f32.mrf.mxu0 }
 0x147   :  { %557 = vst.msk [vmem:[%s1965_s8 + $0x8] sm:$0xff] %vm169_vm0, %v555_v26  ;;  %v622_v29 = vmul.f32 %v592_v27, %v1793_v10 }
 0x149   :  { %624 = vst.msk [vmem:[%s1964_s7 + $0x10] sm:$0xff] %vm169_vm0, %v622_v29 }
 0x14a   :  { %v617_v30 = vpop.f32.mrf.mxu3 }
 0x14b   :  { %v618_v31 = vadd.f32 %v617_v30, %v603_v24  ;;  %v605_v32 = vpop.f32.mrf.mxu2 }
 0x14c   :  { %v589_v33 = vpop.f32.mrf.mxu1 }
 0x14d   :  { %v626_v34 = vmul.f32 %v618_v31, %v1793_v10  ;;  %v593_v35 = vsub.f32 %v575_v28, %v589_v33  ;;  %v645_v36 = vpop.f32.mrf.mxu0 }
 0x14f   :  { %628 = vst.msk [vmem:[%s1965_s8 + $0x10] sm:$0xff] %vm169_vm0, %v626_v34  ;;  %v623_v37 = vmul.f32 %v593_v35, %v1800_v17 }
 0x151   :  { %625 = vst.msk [vmem:[%s1964_s7 + $0x18] sm:$0xff] %vm169_vm0, %v623_v37 }
 0x152   :  { %v619_v38 = vpop.f32.mrf.mxu3 }
 0x153   :  { %v620_v39 = vadd.f32 %v619_v38, %v605_v32  ;;  %v675_v40 = vpop.f32.mrf.mxu2 }
 0x154   :  { %v659_v41 = vpop.f32.mrf.mxu1 }
 0x155   :  { %v627_v42 = vmul.f32 %v620_v39, %v1800_v17  ;;  %v664_v43 = vsub.f32 %v645_v36, %v659_v41  ;;  %v647_v44 = vpop.f32.mrf.mxu0 }
 0x157   :  { %629 = vst.msk [vmem:[%s1965_s8 + $0x18] sm:$0xff] %vm169_vm0, %v627_v42  ;;  %v694_v45 = vmul.f32 %v664_v43, %v1793_v10 }
 0x159   :  { %696 = vst.msk [vmem:[%s1964_s7 + $0x20] sm:$0xff] %vm169_vm0, %v694_v45 }
 0x15a   :  { %v689_v46 = vpop.f32.mrf.mxu3 }
 0x15b   :  { %v690_v47 = vadd.f32 %v689_v46, %v675_v40  ;;  %v677_v48 = vpop.f32.mrf.mxu2 }
 0x15c   :  { %v661_v49 = vpop.f32.mrf.mxu1 }
 0x15d   :  { %v698_v50 = vmul.f32 %v690_v47, %v1793_v10  ;;  %v665_v51 = vsub.f32 %v647_v44, %v661_v49  ;;  %v717_v52 = vpop.f32.mrf.mxu0 }
 0x15f   :  { %700 = vst.msk [vmem:[%s1965_s8 + $0x20] sm:$0xff] %vm169_vm0, %v698_v50  ;;  %v695_v53 = vmul.f32 %v665_v51, %v1800_v17 }
 0x161   :  { %697 = vst.msk [vmem:[%s1964_s7 + $0x28] sm:$0xff] %vm169_vm0, %v695_v53 }
 0x162   :  { %v691_v54 = vpop.f32.mrf.mxu3 }
 0x163   :  { %v692_v55 = vadd.f32 %v691_v54, %v677_v48  ;;  %v747_v56 = vpop.f32.mrf.mxu2 }
 0x164   :  { %v731_v57 = vpop.f32.mrf.mxu1 }
 0x165   :  { %v699_v58 = vmul.f32 %v692_v55, %v1800_v17  ;;  %v736_v59 = vsub.f32 %v717_v52, %v731_v57  ;;  %v719_v60 = vpop.f32.mrf.mxu0 }
 0x167   :  { %701 = vst.msk [vmem:[%s1965_s8 + $0x28] sm:$0xff] %vm169_vm0, %v699_v58  ;;  %v766_v61 = vmul.f32 %v736_v59, %v1793_v10 }
 0x169   :  { %768 = vst.msk [vmem:[%s1964_s7 + $0x30] sm:$0xff] %vm169_vm0, %v766_v61 }
 0x16a   :  { %v761_v62 = vpop.f32.mrf.mxu3 }
 0x16b   :  { %v762_v63 = vadd.f32 %v761_v62, %v747_v56  ;;  %v749_v0 = vpop.f32.mrf.mxu2 }
 0x16c   :  { %v733_v1 = vpop.f32.mrf.mxu1 }
 0x16d   :  { %v770_v2 = vmul.f32 %v762_v63, %v1793_v10  ;;  %v737_v3 = vsub.f32 %v719_v60, %v733_v1  ;;  %v789_v6 = vpop.f32.mrf.mxu0 }
 0x16f   :  { %772 = vst.msk [vmem:[%s1965_s8 + $0x30] sm:$0xff] %vm169_vm0, %v770_v2  ;;  %v767_v7 = vmul.f32 %v737_v3, %v1800_v17 }
 0x171   :  { %769 = vst.msk [vmem:[%s1964_s7 + $0x38] sm:$0xff] %vm169_vm0, %v767_v7 }
 0x172   :  { %v763_v8 = vpop.f32.mrf.mxu3 }
 0x173   :  { %v764_v9 = vadd.f32 %v763_v8, %v749_v0  ;;  %v819_v11 = vpop.f32.mrf.mxu2 }
 0x174   :  { %v803_v12 = vpop.f32.mrf.mxu1 }
 0x175   :  { %v771_v13 = vmul.f32 %v764_v9, %v1800_v17  ;;  %v808_v14 = vsub.f32 %v789_v6, %v803_v12  ;;  %v791_v15 = vpop.f32.mrf.mxu0 }
 0x177   :  { %773 = vst.msk [vmem:[%s1965_s8 + $0x38] sm:$0xff] %vm169_vm0, %v771_v13  ;;  %v838_v16 = vmul.f32 %v808_v14, %v1793_v10 }
 0x179   :  { %840 = vst.msk [vmem:[%s1964_s7 + $0x40] sm:$0xff] %vm169_vm0, %v838_v16 }
 0x17a   :  { %v833_v5 = vpop.f32.mrf.mxu3 }
 0x17b   :  { %v834_v4 = vadd.f32 %v833_v5, %v819_v11  ;;  %v821_v18 = vpop.f32.mrf.mxu2 }
 0x17c   :  { %v805_v19 = vpop.f32.mrf.mxu1 }
 0x17d   :  { %v842_v20 = vmul.f32 %v834_v4, %v1793_v10  ;;  %v809_v21 = vsub.f32 %v791_v15, %v805_v19  ;;  %v861_v22 = vpop.f32.mrf.mxu0 }
 0x17f   :  { %844 = vst.msk [vmem:[%s1965_s8 + $0x40] sm:$0xff] %vm169_vm0, %v842_v20  ;;  %v839_v23 = vmul.f32 %v809_v21, %v1800_v17 }
 0x181   :  { %841 = vst.msk [vmem:[%s1964_s7 + $0x48] sm:$0xff] %vm169_vm0, %v839_v23 }
 0x182   :  { %v835_v24 = vpop.f32.mrf.mxu3 }
 0x183   :  { %v836_v25 = vadd.f32 %v835_v24, %v821_v18  ;;  %v891_v26 = vpop.f32.mrf.mxu2 }
 0x184   :  { %v875_v27 = vpop.f32.mrf.mxu1 }
 0x185   :  { %v843_v28 = vmul.f32 %v836_v25, %v1800_v17  ;;  %v880_v29 = vsub.f32 %v861_v22, %v875_v27  ;;  %v863_v30 = vpop.f32.mrf.mxu0 }
 0x187   :  { %845 = vst.msk [vmem:[%s1965_s8 + $0x48] sm:$0xff] %vm169_vm0, %v843_v28  ;;  %v910_v31 = vmul.f32 %v880_v29, %v1793_v10 }
 0x189   :  { %912 = vst.msk [vmem:[%s1964_s7 + $0x50] sm:$0xff] %vm169_vm0, %v910_v31 }
 0x18a   :  { %v905_v32 = vpop.f32.mrf.mxu3 }
 0x18b   :  { %v906_v33 = vadd.f32 %v905_v32, %v891_v26  ;;  %v893_v34 = vpop.f32.mrf.mxu2 }
 0x18c   :  { %v877_v35 = vpop.f32.mrf.mxu1 }
 0x18d   :  { %v914_v36 = vmul.f32 %v906_v33, %v1793_v10  ;;  %v881_v37 = vsub.f32 %v863_v30, %v877_v35  ;;  %v933_v38 = vpop.f32.mrf.mxu0 }
 0x18f   :  { %916 = vst.msk [vmem:[%s1965_s8 + $0x50] sm:$0xff] %vm169_vm0, %v914_v36  ;;  %v911_v39 = vmul.f32 %v881_v37, %v1800_v17 }
 0x191   :  { %913 = vst.msk [vmem:[%s1964_s7 + $0x58] sm:$0xff] %vm169_vm0, %v911_v39 }
 0x192   :  { %v907_v40 = vpop.f32.mrf.mxu3 }
 0x193   :  { %v908_v41 = vadd.f32 %v907_v40, %v893_v34  ;;  %v963_v43 = vpop.f32.mrf.mxu2 }
 0x194   :  { %v947_v42 = vpop.f32.mrf.mxu1 }
 0x195   :  { %v915_v44 = vmul.f32 %v908_v41, %v1800_v17  ;;  %v952_v45 = vsub.f32 %v933_v38, %v947_v42  ;;  %v935_v47 = vpop.f32.mrf.mxu0 }
 0x197   :  { %917 = vst.msk [vmem:[%s1965_s8 + $0x58] sm:$0xff] %vm169_vm0, %v915_v44  ;;  %v982_v46 = vmul.f32 %v952_v45, %v1793_v10 }
 0x199   :  { %984 = vst.msk [vmem:[%s1964_s7 + $0x60] sm:$0xff] %vm169_vm0, %v982_v46 }
 0x19a   :  { %v977_v48 = vpop.f32.mrf.mxu3 }
 0x19b   :  { %v978_v49 = vadd.f32 %v977_v48, %v963_v43  ;;  %v965_v53 = vpop.f32.mrf.mxu2 }
 0x19c   :  { %v949_v50 = vpop.f32.mrf.mxu1 }
 0x19d   :  { %v986_v51 = vmul.f32 %v978_v49, %v1793_v10  ;;  %v953_v52 = vsub.f32 %v935_v47, %v949_v50  ;;  %v1005_v56 = vpop.f32.mrf.mxu0 }
 0x19f   :  { %988 = vst.msk [vmem:[%s1965_s8 + $0x60] sm:$0xff] %vm169_vm0, %v986_v51  ;;  %v983_v54 = vmul.f32 %v953_v52, %v1800_v17 }
 0x1a1   :  { %985 = vst.msk [vmem:[%s1964_s7 + $0x68] sm:$0xff] %vm169_vm0, %v983_v54 }
 0x1a2   :  { %v979_v55 = vpop.f32.mrf.mxu3 }
 0x1a3   :  { %v980_v57 = vadd.f32 %v979_v55, %v965_v53  ;;  %v1035_v62 = vpop.f32.mrf.mxu2 }
 0x1a4   :  { %v1019_v58 = vpop.f32.mrf.mxu1 }
 0x1a5   :  { %v987_v59 = vmul.f32 %v980_v57, %v1800_v17  ;;  %v1024_v60 = vsub.f32 %v1005_v56, %v1019_v58  ;;  %v1007_v1 = vpop.f32.mrf.mxu0 }
 0x1a7   :  { %989 = vst.msk [vmem:[%s1965_s8 + $0x68] sm:$0xff] %vm169_vm0, %v987_v59  ;;  %v1054_v61 = vmul.f32 %v1024_v60, %v1793_v10 }
 0x1a9   :  { %1056 = vst.msk [vmem:[%s1964_s7 + $0x70] sm:$0xff] %vm169_vm0, %v1054_v61 }
 0x1aa   :  { %v1049_v63 = vpop.f32.mrf.mxu3 }
 0x1ab   :  { %v1050_v0 = vadd.f32 %v1049_v63, %v1035_v62  ;;  %v1037_v8 = vpop.f32.mrf.mxu2 }
 0x1ac   :  { %v1021_v2 = vpop.f32.mrf.mxu1 }
 0x1ad   :  { %v1058_v3 = vmul.f32 %v1050_v0, %v1793_v10  ;;  %v1025_v6 = vsub.f32 %v1007_v1, %v1021_v2 }
 0x1af   :  { %1060 = vst.msk [vmem:[%s1965_s8 + $0x70] sm:$0xff] %vm169_vm0, %v1058_v3  ;;  %v1055_v7 = vmul.f32 %v1025_v6, %v1800_v17 }
 0x1b1   :  { %1057 = vst.msk [vmem:[%s1964_s7 + $0x78] sm:$0xff] %vm169_vm0, %v1055_v7 }
 0x1b2   :  { %v1051_v9 = vpop.f32.mrf.mxu3 }
 0x1b3   :  { %v1052_v11 = vadd.f32 %v1051_v9, %v1037_v8 }
 0x1b5   :  { %v1059_v12 = vmul.f32 %v1052_v11, %v1800_v17 }
 0x1b7   :  { %1061 = vst.msk [vmem:[%s1965_s8 + $0x78] sm:$0xff] %vm169_vm0, %v1059_v12 }
 0x1b8   :  { %1070 = vsyncpa [#allocation3], 1 }
 0x1b9   :  { %1071 = vsyncpa [#allocation5], 1 }
 0x1ba   :  { %1072 = vsyncpa [#allocation8], 1 }

</bundles_post_ra>
